<compile_context>
chip_gen: v7x
topology: tpu7x:2x2x1
jax: 0.10.0
libtpu: 0.0.40
codegen_flags: <defaults>
</compile_context>

<pallas_src>
from functools import partial

import jax
import jax.numpy as jnp
from jax import lax
from jax.experimental import pallas as pl
from jax.experimental.pallas import tpu as pltpu

BN_EPS = 1e-5
LANE = 128
VMEM_LIMIT = 32 * 1024 * 1024


def _pick_tile(dim, target, unit=128):
    """Largest multiple of `unit` that divides `dim` and is <= target.
    Falls back to the full dim (single block) if no such divisor exists."""
    if dim <= target:
        return dim
    start = (target // unit) * unit
    for cand in range(start, 0, -unit):
        if dim % cand == 0:
            return cand
    return dim


def _bn_relu(y, gamma, beta, eps):
    """Training-mode BatchNorm1d (+affine) + ReLU, all in f32, batch axis 0."""
    mean = jnp.mean(y, axis=0, keepdims=True)
    var = jnp.mean((y - mean) ** 2, axis=0, keepdims=True)
    y = (y - mean) * lax.rsqrt(var + eps)
    y = y * gamma + beta
    return jnp.maximum(y, 0.0)


def quantize_weight_int8(w):
    """Per-output-channel symmetric int8 quantization of an (in, out) weight."""
    w = w.astype(jnp.float32)
    amax = jnp.max(jnp.abs(w), axis=0, keepdims=True)
    scale = jnp.where(amax > 0, amax / 127.0, 1.0).astype(jnp.float32)
    w_q = jnp.round(w / scale).astype(jnp.int8)
    return w_q, scale


# ----------------------------------------------------------------------------
# Big first layer: y = ReLU(BN((x @ dequant(w_q)) * scale + b)).
# int8 weight streaming, x resident. Grid = (N // tn, K // tk); K last.
# ----------------------------------------------------------------------------
def big_layer_kernel(x_ref, w_ref, s_ref, b_ref, g_ref, bt_ref, o_ref, acc_ref,
                     *, tk, eps):
    k = pl.program_id(1)

    @pl.when(k == 0)
    def _():
        acc_ref[...] = jnp.zeros_like(acc_ref)

    ks = pl.multiple_of(k * tk, tk)
    # VPU dequant int8 -> bf16 (exact for |q| <= 127); per-channel scale is
    # applied once in the epilogue, not per K-block.
    w_bf16 = w_ref[...].astype(jnp.bfloat16)
    acc_ref[...] += jnp.dot(x_ref[:, pl.ds(ks, tk)], w_bf16,
                            preferred_element_type=jnp.float32)

    @pl.when(k == pl.num_programs(1) - 1)
    def _():
        y = acc_ref[...] * s_ref[...] + b_ref[...]
        y = _bn_relu(y, g_ref[...], bt_ref[...], eps)
        o_ref[...] = y.astype(o_ref.dtype)


def fused_linear_bn_relu(x, w_q, scale, b, gamma, beta, *,
                         eps=BN_EPS, tk=3584, tn=1024):
    B, K = x.shape
    Kw, N = w_q.shape
    assert K == Kw
    tk = _pick_tile(K, tk)
    tn = _pick_tile(N, tn)
    assert K % tk == 0 and N % tn == 0, (K, tk, N, tn)

    cost = pl.CostEstimate(
        flops=int(2 * B * K * N),
        transcendentals=0,
        bytes_accessed=int(K * N * 1            # int8 weights (dominant)
                           + B * K * 2          # resident x (bf16)
                           + B * N * 2          # output (bf16)
                           + 4 * N * 4),        # scale/bias/gamma/beta
    )

    kernel = partial(big_layer_kernel, tk=tk, eps=eps)
    return pl.pallas_call(
        kernel,
        out_shape=jax.ShapeDtypeStruct((B, N), jnp.bfloat16),
        grid_spec=pltpu.PrefetchScalarGridSpec(
            num_scalar_prefetch=0,
            grid=(N // tn, K // tk),                          # K (reduction) last
            in_specs=[
                # x: full array resident in VMEM (constant block index -> one DMA)
                pl.BlockSpec((B, K), lambda j, k: (0, 0)),
                # weights: int8, streamed (tk, tn) blocks
                pl.BlockSpec((tk, tn), lambda j, k: (k, j)),
                pl.BlockSpec((1, tn), lambda j, k: (0, j)),   # per-channel scale
                pl.BlockSpec((1, tn), lambda j, k: (0, j)),   # bias
                pl.BlockSpec((1, tn), lambda j, k: (0, j)),   # gamma
                pl.BlockSpec((1, tn), lambda j, k: (0, j)),   # beta
            ],
            out_specs=pl.BlockSpec((B, tn), lambda j, k: (0, j)),
            scratch_shapes=[pltpu.VMEM((B, tn), jnp.float32)],
        ),
        compiler_params=pltpu.CompilerParams(
            dimension_semantics=("parallel", "arbitrary"),
            vmem_limit_bytes=VMEM_LIMIT),
        cost_estimate=cost,
    )(x, w_q, scale, b, gamma, beta)


# ----------------------------------------------------------------------------
# Fused tail: Linear+BN+ReLU (d1->d2), Linear+BN+ReLU (d2->d3),
#             Linear+Sigmoid (d3->128 padded), in one kernel.
# Grid = (d1 // tk,); everything but (x, w2) stays resident in VMEM.
# ----------------------------------------------------------------------------
def tail_kernel(x_ref, w2_ref, b2_ref, g2_ref, bt2_ref,
                w3_ref, b3_ref, g3_ref, bt3_ref,
                w4_ref, b4_ref, o_ref, acc_ref, *, eps):
    k = pl.program_id(0)

    @pl.when(k == 0)
    def _():
        acc_ref[...] = jnp.zeros_like(acc_ref)

    acc_ref[...] += jnp.dot(x_ref[...], w2_ref[...],
                            preferred_element_type=jnp.float32)

    @pl.when(k == pl.num_programs(0) - 1)
    def _():
        y2 = _bn_relu(acc_ref[...] + b2_ref[...], g2_ref[...], bt2_ref[...], eps)
        y3 = jnp.dot(y2.astype(w3_ref.dtype), w3_ref[...],
                     preferred_element_type=jnp.float32) + b3_ref[...]
        y3 = _bn_relu(y3, g3_ref[...], bt3_ref[...], eps)
        y4 = jnp.dot(y3.astype(w4_ref.dtype), w4_ref[...],
                     preferred_element_type=jnp.float32) + b4_ref[...]
        o_ref[...] = jax.nn.sigmoid(y4).astype(o_ref.dtype)


def fused_tail(x, p2, p3, p4_padded, *, eps=BN_EPS, tk=2048):
    w2, b2, g2, bt2 = p2
    w3, b3, g3, bt3 = p3
    w4p, b4p = p4_padded
    B, K = x.shape
    _, N2 = w2.shape
    _, N3 = w3.shape
    _, N4 = w4p.shape
    tk = _pick_tile(K, tk)
    assert K % tk == 0, (K, tk)

    cost = pl.CostEstimate(
        flops=int(2 * B * (K * N2 + N2 * N3 + N3 * N4)),
        transcendentals=int(B * N4),
        bytes_accessed=int(K * N2 * 2 + N2 * N3 * 2 + N3 * N4 * 2
                           + B * K * 2 + B * N4 * 4),
    )

    kernel = partial(tail_kernel, eps=eps)
    return pl.pallas_call(
        kernel,
        out_shape=jax.ShapeDtypeStruct((B, N4), jnp.float32),
        grid_spec=pltpu.PrefetchScalarGridSpec(
            num_scalar_prefetch=0,
            grid=(K // tk,),
            in_specs=[
                pl.BlockSpec((B, tk), lambda k: (0, k)),    # x   (streamed)
                pl.BlockSpec((tk, N2), lambda k: (k, 0)),   # w2  (streamed)
                pl.BlockSpec((1, N2), lambda k: (0, 0)),    # b2
                pl.BlockSpec((1, N2), lambda k: (0, 0)),    # gamma2
                pl.BlockSpec((1, N2), lambda k: (0, 0)),    # beta2
                pl.BlockSpec((N2, N3), lambda k: (0, 0)),   # w3  (resident)
                pl.BlockSpec((1, N3), lambda k: (0, 0)),    # b3
                pl.BlockSpec((1, N3), lambda k: (0, 0)),    # gamma3
                pl.BlockSpec((1, N3), lambda k: (0, 0)),    # beta3
                pl.BlockSpec((N3, N4), lambda k: (0, 0)),   # w4 (padded to 128)
                pl.BlockSpec((1, N4), lambda k: (0, 0)),    # b4 (padded)
            ],
            out_specs=pl.BlockSpec((B, N4), lambda k: (0, 0)),
            scratch_shapes=[pltpu.VMEM((B, N2), jnp.float32)],
        ),
        compiler_params=pltpu.CompilerParams(
            dimension_semantics=("arbitrary",),
            vmem_limit_bytes=VMEM_LIMIT),
        cost_estimate=cost,
    )(x, w2, b2, g2, bt2, w3, b3, g3, bt3, w4p, b4p)


# ----------------------------------------------------------------------------
# Params / forward / reference
# ----------------------------------------------------------------------------
def init_params(key, dims):
    """Synthetic head params. dims = [d_in, d1, d2, d3, 1].
    Weights stored as (in, out) = PyTorch weight.T.
      layer 1 : int8 weight + per-output-channel f32 scale
      layers 2-3 : bf16 weight + BN params
      layer 4 : bf16 weight + bias only (Sigmoid, no BN)."""
    params = []
    for i in range(len(dims) - 1):
        d_in, d_out = dims[i], dims[i + 1]
        key, kw, kb = jax.random.split(key, 3)
        w = (jax.random.normal(kw, (d_in, d_out), jnp.float32)
             * (1.0 / jnp.sqrt(d_in)))
        b = jax.random.normal(kb, (1, d_out), jnp.float32) * 0.01
        gamma = jnp.ones((1, d_out), jnp.float32)     # PyTorch BN defaults
        beta = jnp.zeros((1, d_out), jnp.float32)
        if i == 0:
            w_q, scale = quantize_weight_int8(w)
            params.append((w_q, scale, b, gamma, beta))
        elif i < len(dims) - 2:
            params.append((w.astype(jnp.bfloat16), b, gamma, beta))
        else:
            params.append((w.astype(jnp.bfloat16), b))
    return params


def vgg_head_forward(x, params):
    """Pallas forward of VGGNetwork.head (4 Linear layers)."""
    (w1q, s1, b1, g1, bt1), p2, p3, (w4, b4) = params
    x = x.astype(jnp.bfloat16)

    # Layer 1: huge int8-weight-streaming Linear + BN + ReLU.
    y1 = fused_linear_bn_relu(x, w1q, s1, b1, g1, bt1)

    # Pad the final Linear (d3 -> 1) to 128 output lanes for a lane-dense store.
    d3, n_out = w4.shape
    w4p = jnp.zeros((d3, LANE), w4.dtype).at[:, :n_out].set(w4)
    b4p = jnp.zeros((1, LANE), b4.dtype).at[:, :n_out].set(b4)

    # Layers 2-4 fused in a single kernel; slice out the real output column.
    y = fused_tail(y1, p2, p3, (w4p, b4p))
    return y[:, :n_out]


def ref_forward(x, params):
    """Pure-JAX reference (training-mode BN) with the same quantization /
    bf16 rounding points as the Pallas kernels, for the correctness check."""
    f32 = jnp.float32
    (w1q, s1, b1, g1, bt1), (w2, b2, g2, bt2), (w3, b3, g3, bt3), (w4, b4) = params

    def bn_relu(y, g, bt):
        mean = y.mean(axis=0, keepdims=True)
        var = ((y - mean) ** 2).mean(axis=0, keepdims=True)
        return jnp.maximum((y - mean) / jnp.sqrt(var + BN_EPS) * g + bt, 0.0)

    x = x.astype(jnp.bfloat16).astype(f32)
    # Layer 1: dequantized int8 weight, scale applied post-accumulation.
    y = (x @ w1q.astype(f32)) * s1 + b1
    y = bn_relu(y, g1, bt1).astype(jnp.bfloat16).astype(f32)
    # Layer 2
    y = y @ w2.astype(f32) + b2
    y = bn_relu(y, g2, bt2)
    # Layer 3
    y = y @ w3.astype(f32) + b3
    y = bn_relu(y, g3, bt3)
    # Layer 4 + Sigmoid
    y = y @ w4.astype(f32) + b4
    return jax.nn.sigmoid(y)


if __name__ == "__main__":
    # Real head dims are [50176, 8192, 1024, 128, 1]; scaled down for the demo.
    B = 8
    dims = [2048, 1024, 256, 128, 1]

    key = jax.random.PRNGKey(0)
    key, kx = jax.random.split(key)
    x = jax.random.normal(kx, (B, dims[0]), jnp.float32)

    params = init_params(key, dims)

    out = jax.block_until_ready(vgg_head_forward(x, params))
    ref = jax.block_until_ready(ref_forward(x, params))

    assert out.shape == (B, 1), out.shape
    assert jnp.allclose(out, ref, rtol=5e-2, atol=5e-3), (out, ref)
    print("KERNEL_OK")
</pallas_src>

<mosaic_0001>
module attributes {stable_mosaic.version = 11 : i64} {
  func.func @big_layer_kernel(%arg0: i32, %arg1: i32, %arg2: memref<8x2048xbf16, #tpu.memory_space<vmem>>, %arg3: memref<2048x1024xi8, #tpu.memory_space<vmem>>, %arg4: memref<1x1024xf32, #tpu.memory_space<vmem>>, %arg5: memref<1x1024xf32, #tpu.memory_space<vmem>>, %arg6: memref<1x1024xf32, #tpu.memory_space<vmem>>, %arg7: memref<1x1024xf32, #tpu.memory_space<vmem>>, %arg8: memref<8x1024xbf16, #tpu.memory_space<vmem>>, %arg9: memref<8x1024xf32, #tpu.memory_space<vmem>>) attributes {dimension_semantics = [#tpu.dimension_semantics<parallel>, #tpu.dimension_semantics<arbitrary>], iteration_bounds = array<i64: 1, 1>, scalar_prefetch = 0 : i64, scratch_operands = 1 : i64, tpu.core_type = #tpu.core_type<tc>, window_params = [{pipeline_mode = #tpu.pipeline_mode<synchronous>, transform_indices = @transform_0, window_bounds = array<i64: 8, 2048>}, {transform_indices = @transform_1, window_bounds = array<i64: 2048, 1024>}, {transform_indices = @transform_2, window_bounds = array<i64: 1, 1024>}, {transform_indices = @transform_3, window_bounds = array<i64: 1, 1024>}, {transform_indices = @transform_4, window_bounds = array<i64: 1, 1024>}, {transform_indices = @transform_5, window_bounds = array<i64: 1, 1024>}, {transform_indices = @transform_6, window_bounds = array<i64: 8, 1024>}]} {
    %c0_i32 = arith.constant 0 : i32
    %0 = arith.cmpi eq, %arg1, %c0_i32 : i32
    %1 = arith.extui %0 : i1 to i32
    %c0_i32_0 = arith.constant 0 : i32
    %2 = arith.cmpi ne, %1, %c0_i32_0 : i32
    scf.if %2 {
      %cst_9 = arith.constant 0.000000e+00 : f32
      %16 = vector.broadcast %cst_9 : f32 to vector<8x1024xf32>
      %c0_10 = arith.constant 0 : index
      %c0_11 = arith.constant 0 : index
      %17 = vector.load %arg9[%c0_10, %c0_11] : memref<8x1024xf32, #tpu.memory_space<vmem>>, vector<8x1024xf32>
      tpu.vector_store %arg9[%c0_10, %c0_11], %16 {strides = array<i32>} : memref<8x1024xf32, #tpu.memory_space<vmem>>, vector<8x1024xf32>,
    } else {
    }
    %c2048_i32 = arith.constant 2048 : i32
    %3 = arith.muli %arg1, %c2048_i32 : i32
    %4 = tpu.assume_multiple %3, 2048 : i32
    %c0 = arith.constant 0 : index
    %c0_1 = arith.constant 0 : index
    %5 = vector.load %arg3[%c0, %c0_1] : memref<2048x1024xi8, #tpu.memory_space<vmem>>, vector<2048x1024xi8>
    %6 = arith.sitofp %5 : vector<2048x1024xi8> to vector<2048x1024xbf16>
    %c0_2 = arith.constant 0 : index
    %c0_3 = arith.constant 0 : index
    %7 = vector.load %arg9[%c0_2, %c0_3] : memref<8x1024xf32, #tpu.memory_space<vmem>>, vector<8x1024xf32>
    %c0_4 = arith.constant 0 : index
    %8 = arith.index_cast %4 : i32 to index
    %9 = vector.load %arg2[%c0_4, %8] : memref<8x2048xbf16, #tpu.memory_space<vmem>>, vector<8x2048xbf16>
    %cst = arith.constant dense<0.000000e+00> : vector<8x1024xf32>
    %10 = tpu.matmul %9, %6, %cst {dimension_numbers = #tpu.dot_dimension_numbers<[1], [0], [0], [1], [0, 0, 1, 1], [], []>} : vector<8x2048xbf16>, vector<2048x1024xbf16>, vector<8x1024xf32> -> vector<8x1024xf32>
    %11 = arith.addf %7, %10 : vector<8x1024xf32>
    %c0_5 = arith.constant 0 : index
    %c0_6 = arith.constant 0 : index
    %12 = vector.load %arg9[%c0_5, %c0_6] : memref<8x1024xf32, #tpu.memory_space<vmem>>, vector<8x1024xf32>
    tpu.vector_store %arg9[%c0_5, %c0_6], %11 {strides = array<i32>} : memref<8x1024xf32, #tpu.memory_space<vmem>>, vector<8x1024xf32>,
    %c0_i32_7 = arith.constant 0 : i32
    %13 = arith.cmpi eq, %arg1, %c0_i32_7 : i32
    %14 = arith.extui %13 : i1 to i32
    %c0_i32_8 = arith.constant 0 : i32
    %15 = arith.cmpi ne, %14, %c0_i32_8 : i32
    scf.if %15 {
      %c0_9 = arith.constant 0 : index
      %c0_10 = arith.constant 0 : index
      %16 = vector.load %arg9[%c0_9, %c0_10] : memref<8x1024xf32, #tpu.memory_space<vmem>>, vector<8x1024xf32>
      %c0_11 = arith.constant 0 : index
      %c0_12 = arith.constant 0 : index
      %17 = vector.load %arg4[%c0_11, %c0_12] : memref<1x1024xf32, #tpu.memory_space<vmem>>, vector<1x1024xf32>
      %18 = vector.broadcast %17 : vector<1x1024xf32> to vector<8x1024xf32>
      %19 = arith.mulf %16, %18 : vector<8x1024xf32>
      %c0_13 = arith.constant 0 : index
      %c0_14 = arith.constant 0 : index
      %20 = vector.load %arg5[%c0_13, %c0_14] : memref<1x1024xf32, #tpu.memory_space<vmem>>, vector<1x1024xf32>
      %21 = vector.broadcast %20 : vector<1x1024xf32> to vector<8x1024xf32>
      %22 = arith.addf %19, %21 : vector<8x1024xf32>
      %c0_15 = arith.constant 0 : index
      %c0_16 = arith.constant 0 : index
      %23 = vector.load %arg6[%c0_15, %c0_16] : memref<1x1024xf32, #tpu.memory_space<vmem>>, vector<1x1024xf32>
      %c0_17 = arith.constant 0 : index
      %c0_18 = arith.constant 0 : index
      %24 = vector.load %arg7[%c0_17, %c0_18] : memref<1x1024xf32, #tpu.memory_space<vmem>>, vector<1x1024xf32>
      %cst_19 = arith.constant dense<0.000000e+00> : vector<1024xf32>
      %25 = vector.multi_reduction <add>, %22, %cst_19 [0] : vector<8x1024xf32> to vector<1024xf32>
      %26 = vector.shape_cast %25 : vector<1024xf32> to vector<1x1024xf32>
      %cst_20 = arith.constant 8.000000e+00 : f32
      %27 = vector.broadcast %cst_20 : f32 to vector<1x1024xf32>
      %28 = arith.divf %26, %27 : vector<1x1024xf32>
      %29 = vector.broadcast %28 : vector<1x1024xf32> to vector<8x1024xf32>
      %30 = arith.subf %22, %29 : vector<8x1024xf32>
      %31 = arith.mulf %30, %30 : vector<8x1024xf32>
      %cst_21 = arith.constant dense<0.000000e+00> : vector<1024xf32>
      %32 = vector.multi_reduction <add>, %31, %cst_21 [0] : vector<8x1024xf32> to vector<1024xf32>
      %33 = vector.shape_cast %32 : vector<1024xf32> to vector<1x1024xf32>
      %cst_22 = arith.constant 8.000000e+00 : f32
      %34 = vector.broadcast %cst_22 : f32 to vector<1x1024xf32>
      %35 = arith.divf %33, %34 : vector<1x1024xf32>
      %36 = vector.broadcast %28 : vector<1x1024xf32> to vector<8x1024xf32>
      %37 = arith.subf %22, %36 : vector<8x1024xf32>
      %cst_23 = arith.constant 9.99999974E-6 : f32
      %38 = vector.broadcast %cst_23 : f32 to vector<1x1024xf32>
      %39 = arith.addf %35, %38 : vector<1x1024xf32>
      %40 = math.rsqrt %39 : vector<1x1024xf32>
      %41 = vector.broadcast %40 : vector<1x1024xf32> to vector<8x1024xf32>
      %42 = arith.mulf %37, %41 : vector<8x1024xf32>
      %43 = vector.broadcast %23 : vector<1x1024xf32> to vector<8x1024xf32>
      %44 = arith.mulf %42, %43 : vector<8x1024xf32>
      %45 = vector.broadcast %24 : vector<1x1024xf32> to vector<8x1024xf32>
      %46 = arith.addf %44, %45 : vector<8x1024xf32>
      %cst_24 = arith.constant 0.000000e+00 : f32
      %47 = vector.broadcast %cst_24 : f32 to vector<8x1024xf32>
      %48 = arith.maximumf %46, %47 : vector<8x1024xf32>
      %49 = arith.truncf %48 : vector<8x1024xf32> to vector<8x1024xbf16>
      %c0_25 = arith.constant 0 : index
      %c0_26 = arith.constant 0 : index
      %50 = vector.load %arg8[%c0_25, %c0_26] : memref<8x1024xbf16, #tpu.memory_space<vmem>>, vector<8x1024xbf16>
      tpu.vector_store %arg8[%c0_25, %c0_26], %49 {strides = array<i32>} : memref<8x1024xbf16, #tpu.memory_space<vmem>>, vector<8x1024xbf16>,
    } else {
    }
    return
  }
  func.func @transform_0(%arg0: i32, %arg1: i32) -> (i32, i32) {
    %c0_i32 = arith.constant 0 : i32
    %c0_i32_0 = arith.constant 0 : i32
    %c0_i32_1 = arith.constant 0 : i32
    return %c0_i32, %c0_i32_0 : i32, i32
  }
  func.func @transform_1(%arg0: i32, %arg1: i32) -> (i32, i32) {
    %c0_i32 = arith.constant 0 : i32
    return %arg1, %arg0 : i32, i32
  }
  func.func @transform_2(%arg0: i32, %arg1: i32) -> (i32, i32) {
    %c0_i32 = arith.constant 0 : i32
    %c0_i32_0 = arith.constant 0 : i32
    return %c0_i32, %arg0 : i32, i32
  }
  func.func @transform_3(%arg0: i32, %arg1: i32) -> (i32, i32) {
    %c0_i32 = arith.constant 0 : i32
    %c0_i32_0 = arith.constant 0 : i32
    return %c0_i32, %arg0 : i32, i32
  }
  func.func @transform_4(%arg0: i32, %arg1: i32) -> (i32, i32) {
    %c0_i32 = arith.constant 0 : i32
    %c0_i32_0 = arith.constant 0 : i32
    return %c0_i32, %arg0 : i32, i32
  }
  func.func @transform_5(%arg0: i32, %arg1: i32) -> (i32, i32) {
    %c0_i32 = arith.constant 0 : i32
    %c0_i32_0 = arith.constant 0 : i32
    return %c0_i32, %arg0 : i32, i32
  }
  func.func @transform_6(%arg0: i32, %arg1: i32) -> (i32, i32) {
    %c0_i32 = arith.constant 0 : i32
    %c0_i32_0 = arith.constant 0 : i32
    return %c0_i32, %arg0 : i32, i32
  }
}

</mosaic_0001>

<bundles_post_ra>
// kernel: tpu_custom_call.1
= control target key start
LH: loop header
LB: loop body
LE: loop exit
PB: predicated region body
PF: predicated region fallthrough
CT: control target
= control target key end

     0   :  { %11 = vsyncpa [#allocation4], 0  ;;  %s4192_s0 = inlined_call_operand.hbm [shape: bf16[8,2048], index: 0, kind: input, shape index: {}]   ;;  %s4193_s1 = inlined_call_operand.hbm [shape: s8[2048,1024], index: 1, kind: input, shape index: {}]   ;;  %s4194_s2 = inlined_call_operand.hbm [shape: f32[1,1024], index: 2, kind: input, shape index: {}]   ;;  %s4195_s3 = inlined_call_operand.hbm [shape: f32[1,1024], index: 3, kind: input, shape index: {}]   ;;  %s4196_s4 = inlined_call_operand.hbm [shape: f32[1,1024], index: 4, kind: input, shape index: {}]   ;;  %s4197_s5 = inlined_call_operand.hbm [shape: f32[1,1024], index: 5, kind: input, shape index: {}]   ;;  %s4198_s6 = inlined_call_operand.hbm [shape: bf16[8,1024], index: 6, kind: output, shape index: {}]  }
   0x1   :  { %12 = vsyncpa [#allocation7], 0 }
   0x2   :  { %13 = vsyncpa [#allocation10], 0 }
   0x3   :  { %14 = vsyncpa [#allocation13], 0 }
   0x4   :  { %15 = vsyncpa [#allocation5], 0  ;;  %s3822_s21 = smov [#allocation6]   ;;  %s3658_s25 = scalar_lea.hbm %s4193_s1, 65536 }
   0x5   :  { %s31_s22 = sshll.u32 %s3822_s21, 4  ;;  %p3659_p0 = scmp.ne.s32.totalorder %s4193_s1, %s3658_s25  ;;  %s32_s22 = int_to_ptr.vmem [resolvable:$true] %s31_s22 }
   0x6   :  { %p3662_p1 = scmp.lt.u32.totalorder %s3658_s25, %s4193_s1 }
   0x8   :  { %p3664_p2 = pnand %p3662_p1, %p3659_p0 }
   0xa   :  { %3667 = shalt.err (!%p3664_p2)
}
   0xb   :  { %s3668_s30 = scalar_lea.vmem %s32_s22, 65536  ;;  %p3673_p4 = scmp.lt.s32.totalorder %s32_s22, %s32_s22 }
   0xc   :  { %p3669_p3 = scmp.ne.s32.totalorder %s32_s22, %s3668_s30  ;;  %p3674_p5 = scmp.lt.s32.totalorder %s3668_s30, %s3668_s30 }
   0xe   :  { %p3675_p6 = por %p3674_p5, %p3673_p4 }
  0x10   :  { %p3676_p7 = pnand %p3675_p6, %p3669_p3 }
  0x12   :  { %3679 = shalt.err (!%p3676_p7)
}
  0x13   :  { %s3823_s7 = smov 1024   ;;  %s3824_s8 = smov 64  }
  0x14   :  { %37 = dma.hbm_to_vmem [thread:$0]  %s4193_s1, 65536, %s32_s22, [#allocation7], %s3823_s7, %s3823_s7, %s3824_s8  }
  0x15   :  { %s3825_s11 = smov [#allocation9]   ;;  %s3826_s13 = smov [#allocation3]  }
  0x16   :  { %s54_s12 = sshll.u32 %s3825_s11, 4  ;;  %s22_s14 = sshll.u32 %s3826_s13, 4  ;;  %s55_s12 = int_to_ptr.vmem [resolvable:$true] %s54_s12  ;;  %s23_s14 = int_to_ptr.vmem [resolvable:$true] %s22_s14 }
  0x17   :  { %s3680_s17 = scalar_lea.hbm %s4195_s3, 128 }
  0x18   :  { %p3681_p8 = scmp.ne.s32.totalorder %s4195_s3, %s3680_s17  ;;  %p3684_p9 = scmp.lt.u32.totalorder %s3680_s17, %s4195_s3 }
  0x1a   :  { %p3686_p10 = pnand %p3684_p9, %p3681_p8 }
  0x1c   :  { %3689 = shalt.err (!%p3686_p10)
}
  0x1d   :  { %s3690_s1 = scalar_lea.vmem %s55_s12, 128  ;;  %p3695_p12 = scmp.lt.s32.totalorder %s55_s12, %s55_s12 }
  0x1e   :  { %p3691_p11 = scmp.ne.s32.totalorder %s55_s12, %s3690_s1  ;;  %p3696_p13 = scmp.lt.s32.totalorder %s3690_s1, %s3690_s1 }
  0x20   :  { %p3697_p0 = por %p3696_p13, %p3695_p12 }
  0x22   :  { %p3698_p1 = pnand %p3697_p0, %p3691_p11 }
  0x24   :  { %3701 = shalt.err (!%p3698_p1)
}
  0x25   :  { %57 = dma.hbm_to_vmem [thread:$0]  %s4195_s3, 128, %s55_s12, [#allocation10]  }
  0x26   :  { %s3702_s26 = scalar_lea.hbm %s4192_s0, 1024 }
  0x27   :  { %p3703_p2 = scmp.ne.s32.totalorder %s4192_s0, %s3702_s26  ;;  %p3706_p3 = scmp.lt.u32.totalorder %s3702_s26, %s4192_s0 }
  0x29   :  { %p3708_p4 = pnand %p3706_p3, %p3703_p2 }
  0x2b   :  { %3711 = shalt.err (!%p3708_p4)
}
  0x2c   :  { %s3712_s7 = scalar_lea.vmem %s23_s14, 1024  ;;  %p3717_p6 = scmp.lt.s32.totalorder %s23_s14, %s23_s14 }
  0x2d   :  { %p3713_p5 = scmp.ne.s32.totalorder %s23_s14, %s3712_s7  ;;  %p3718_p7 = scmp.lt.s32.totalorder %s3712_s7, %s3712_s7 }
  0x2f   :  { %p3719_p8 = por %p3718_p7, %p3717_p6 }
  0x31   :  { %p3720_p9 = pnand %p3719_p8, %p3713_p5 }
  0x33   :  { %3723 = shalt.err (!%p3720_p9)
}
  0x34   :  { %25 = dma.hbm_to_vmem [thread:$0]  %s4192_s0, 1024, %s23_s14, [#allocation4]  }
  0x35   :  { %s3827_s9 = smov [#allocation8]   ;;  %s3828_s11 = smov [#allocation11]  }
  0x36   :  { %s44_s10 = sshll.u32 %s3827_s9, 4  ;;  %s64_s12 = sshll.u32 %s3828_s11, 4  ;;  %s45_s10 = int_to_ptr.vmem [resolvable:$true] %s44_s10  ;;  %s65_s12 = int_to_ptr.vmem [resolvable:$true] %s64_s12 }
  0x37   :  { %s3724_s16 = scalar_lea.hbm %s4194_s2, 128 }
  0x38   :  { %p3725_p10 = scmp.ne.s32.totalorder %s4194_s2, %s3724_s16  ;;  %p3728_p11 = scmp.lt.u32.totalorder %s3724_s16, %s4194_s2 }
  0x3a   :  { %p3730_p12 = pnand %p3728_p11, %p3725_p10 }
  0x3c   :  { %3733 = shalt.err (!%p3730_p12)
}
  0x3d   :  { %s3734_s0 = scalar_lea.vmem %s45_s10, 128  ;;  %p3739_p0 = scmp.lt.s32.totalorder %s45_s10, %s45_s10 }
  0x3e   :  { %p3735_p13 = scmp.ne.s32.totalorder %s45_s10, %s3734_s0  ;;  %p3740_p1 = scmp.lt.s32.totalorder %s3734_s0, %s3734_s0 }
  0x40   :  { %p3741_p2 = por %p3740_p1, %p3739_p0 }
  0x42   :  { %p3742_p3 = pnand %p3741_p2, %p3735_p13 }
  0x44   :  { %3745 = shalt.err (!%p3742_p3)
}
  0x45   :  { %47 = dma.hbm_to_vmem [thread:$0]  %s4194_s2, 128, %s45_s10, [#allocation7]  }
  0x46   :  { %s3746_s23 = scalar_lea.hbm %s4196_s4, 128 }
  0x47   :  { %p3747_p4 = scmp.ne.s32.totalorder %s4196_s4, %s3746_s23  ;;  %p3750_p5 = scmp.lt.u32.totalorder %s3746_s23, %s4196_s4 }
  0x49   :  { %p3752_p6 = pnand %p3750_p5, %p3747_p4 }
  0x4b   :  { %3755 = shalt.err (!%p3752_p6)
}
  0x4c   :  { %s3756_s28 = scalar_lea.vmem %s65_s12, 128  ;;  %p3761_p8 = scmp.lt.s32.totalorder %s65_s12, %s65_s12 }
  0x4d   :  { %p3757_p7 = scmp.ne.s32.totalorder %s65_s12, %s3756_s28  ;;  %p3762_p9 = scmp.lt.s32.totalorder %s3756_s28, %s3756_s28 }
  0x4f   :  { %p3763_p10 = por %p3762_p9, %p3761_p8 }
  0x51   :  { %p3764_p11 = pnand %p3763_p10, %p3757_p7 }
  0x53   :  { %3767 = shalt.err (!%p3764_p11)
}
  0x54   :  { %67 = dma.hbm_to_vmem [thread:$0]  %s4196_s4, 128, %s65_s12, [#allocation10]  }
  0x55   :  { %s3829_s30 = smov [#allocation12]   ;;  %s3768_s9 = scalar_lea.hbm %s4197_s5, 128 }
  0x56   :  { %s74_s7 = sshll.u32 %s3829_s30, 4  ;;  %p3769_p12 = scmp.ne.s32.totalorder %s4197_s5, %s3768_s9  ;;  %s75_s7 = int_to_ptr.vmem [resolvable:$true] %s74_s7 }
  0x57   :  { %p3772_p13 = scmp.lt.u32.totalorder %s3768_s9, %s4197_s5 }
  0x59   :  { %p3774_p0 = pnand %p3772_p13, %p3769_p12 }
  0x5b   :  { %3777 = shalt.err (!%p3774_p0)
}
  0x5c   :  { %s3778_s16 = scalar_lea.vmem %s75_s7, 128  ;;  %p3783_p2 = scmp.lt.s32.totalorder %s75_s7, %s75_s7 }
  0x5d   :  { %p3779_p1 = scmp.ne.s32.totalorder %s75_s7, %s3778_s16  ;;  %p3784_p3 = scmp.lt.s32.totalorder %s3778_s16, %s3778_s16 }
  0x5f   :  { %p3785_p4 = por %p3784_p3, %p3783_p2 }
  0x61   :  { %p3786_p5 = pnand %p3785_p4, %p3779_p1 }
  0x63   :  { %3789 = shalt.err (!%p3786_p5)
}
  0x64   :  { %77 = dma.hbm_to_vmem [thread:$0]  %s4197_s5, 128, %s75_s7, [#allocation13]  }
  0x65   :  { %3812 = dma.done.wait [#allocation4], 1024  }
  0x66   :  { %3813 = vsyncadd [#allocation4], 4294966272 }
  0x67   :  { %3814 = dma.done.wait [#allocation7], 65664  }
  0x68   :  { %3815 = vsyncadd [#allocation7], 4294901632 }
  0x69   :  { %3816 = dma.done.wait [#allocation10], 256  }
  0x6a   :  { %3817 = vsyncadd [#allocation10], 4294967040 }
  0x6b   :  { %3818 = dma.done.wait [#allocation13], 128  }
  0x6c   :  { %3819 = vsyncadd [#allocation13], 4294967168  ;;  %v110_v0 = vld [vmem:[#allocation6 + $0x8] sm:$0xff]  ;;  %v112_v1 = vld [vmem:[#allocation6 + $0x18] sm:$0xff]  ;;  %s3830_s5 = smov [#allocation14]  }
  0x6d   :  { %v109_v2 = vld [vmem:[#allocation6] sm:$0xff]  ;;  %v622_v3 = vunpack.c.l.s8.bf16 %v110_v0  ;;  %v630_v4 = vunpack.c.h.s8.bf16 %v110_v0  ;;  %v624_v5 = vunpack.c.l.s8.bf16 %v112_v1  ;;  %v632_v6 = vunpack.c.h.s8.bf16 %v112_v1  ;;  %v111_v7 = vld [vmem:[#allocation6 + $0x10] sm:$0xff]  ;;  %v118_v10 = vld [vmem:[#allocation6 + $0x48] sm:$0xff]  ;;  %s3463_s17 = sshll.u32 %s3830_s5, 4  ;;  %s3464_s17 = int_to_ptr.vmem [resolvable:$true] %s3463_s17 }
  0x6e   :  { %v621_v8 = vunpack.c.l.s8.bf16 %v109_v2  ;;  %v623_v9 = vunpack.c.l.s8.bf16 %v111_v7  ;;  %v120_v11 = vld [vmem:[#allocation6 + $0x58] sm:$0xff]  ;;  %v629_v12 = vunpack.c.h.s8.bf16 %v109_v2  ;;  %v631_v13 = vunpack.c.h.s8.bf16 %v111_v7  ;;  %v117_v16 = vld [vmem:[#allocation6 + $0x40] sm:$0xff]  ;;  %v119_v17 = vld [vmem:[#allocation6 + $0x50] sm:$0xff]  ;;  %s3790_s18 = scalar_lea.vmem %s3464_s17, 512  ;;  %p3795_p7 = scmp.lt.s32.totalorder %s3464_s17, %s3464_s17 }
  0x6f   :  { %1721 = vmatprep.subr.bf16.mxu0 %v622_v3  ;;  %2049 = vmatprep.subr.bf16.mxu1 %v624_v5  ;;  %v638_v14 = vunpack.c.l.s8.bf16 %v118_v10  ;;  %v640_v15 = vunpack.c.l.s8.bf16 %v120_v11  ;;  %v637_v18 = vunpack.c.l.s8.bf16 %v117_v16  ;;  %v639_v19 = vunpack.c.l.s8.bf16 %v119_v17  ;;  %v126_v22 = vld [vmem:[#allocation6 + $0x88] sm:$0xff]  ;;  %v128_v23 = vld [vmem:[#allocation6 + $0x98] sm:$0xff]  ;;  %v125_v28 = vld [vmem:[#allocation6 + $0x80] sm:$0xff]  ;;  %p3791_p6 = scmp.ne.s32.totalorder %s3464_s17, %s3790_s18  ;;  %p3796_p8 = scmp.lt.s32.totalorder %s3790_s18, %s3790_s18 }
  0x70   :  { %1722 = vmatpush1.bf16.msra.mxu0 %v621_v8  ;;  %2050 = vmatpush1.bf16.msra.mxu1 %v623_v9  ;;  %v646_v20 = vunpack.c.h.s8.bf16 %v118_v10  ;;  %v648_v21 = vunpack.c.h.s8.bf16 %v120_v11  ;;  %v645_v24 = vunpack.c.h.s8.bf16 %v117_v16  ;;  %v647_v25 = vunpack.c.h.s8.bf16 %v119_v17  ;;  %v127_v29 = vld [vmem:[#allocation6 + $0x90] sm:$0xff]  ;;  %v3938_v30 = vld [vmem:[#allocation3] sm:$0xff]  ;;  %v134_v36 = vld [vmem:[#allocation6 + $0xc8] sm:$0xff] }
  0x71   :  { %1723 = vmatprep.subr.bf16.mxu0 %v630_v4  ;;  %2051 = vmatprep.subr.bf16.mxu1 %v632_v6  ;;  %v654_v26 = vunpack.c.l.s8.bf16 %v126_v22  ;;  %v656_v27 = vunpack.c.l.s8.bf16 %v128_v23  ;;  %v653_v31 = vunpack.c.l.s8.bf16 %v125_v28  ;;  %v655_v32 = vunpack.c.l.s8.bf16 %v127_v29  ;;  %v136_v37 = vld [vmem:[#allocation6 + $0xd8] sm:$0xff]  ;;  %v133_v42 = vld [vmem:[#allocation6 + $0xc0] sm:$0xff]  ;;  %v135_v43 = vld [vmem:[#allocation6 + $0xd0] sm:$0xff]  ;;  %p3797_p9 = por %p3796_p8, %p3795_p7 }
  0x72   :  { %v662_v33 = vunpack.c.h.s8.bf16 %v126_v22  ;;  %v664_v34 = vunpack.c.h.s8.bf16 %v128_v23  ;;  %v3942_v35 = vcombine.high %v3938_v30, %v3938_v30  ;;  %v661_v38 = vunpack.c.h.s8.bf16 %v125_v28  ;;  %v142_v48 = vld [vmem:[#allocation6 + $0x108] sm:$0xff]  ;;  %v144_v49 = vld [vmem:[#allocation6 + $0x118] sm:$0xff]  ;;  %v141_v54 = vld [vmem:[#allocation6 + $0x100] sm:$0xff] }
  0x73   :  { %v663_v39 = vunpack.c.h.s8.bf16 %v127_v29  ;;  %v670_v40 = vunpack.c.l.s8.bf16 %v134_v36  ;;  %v672_v41 = vunpack.c.l.s8.bf16 %v136_v37  ;;  %v669_v44 = vunpack.c.l.s8.bf16 %v133_v42  ;;  %v143_v55 = vld [vmem:[#allocation6 + $0x110] sm:$0xff]  ;;  %v150_v60 = vld [vmem:[#allocation6 + $0x148] sm:$0xff]  ;;  %v152_v61 = vld [vmem:[#allocation6 + $0x158] sm:$0xff]  ;;  %p3798_p10 = pnand %p3797_p9, %p3791_p6 }
  0x74   :  { %1724 = vmatpush1.bf16.msra.mxu0 %v629_v12  ;;  %2052 = vmatpush1.bf16.msra.mxu1 %v631_v13  ;;  %v671_v45 = vunpack.c.l.s8.bf16 %v135_v43  ;;  %v678_v46 = vunpack.c.h.s8.bf16 %v134_v36  ;;  %v680_v47 = vunpack.c.h.s8.bf16 %v136_v37  ;;  %v677_v50 = vunpack.c.h.s8.bf16 %v133_v42  ;;  %v149_v2 = vld [vmem:[#allocation6 + $0x140] sm:$0xff]  ;;  %v151_v3 = vld [vmem:[#allocation6 + $0x150] sm:$0xff]  ;;  %v158_v8 = vld [vmem:[#allocation6 + $0x188] sm:$0xff] }
  0x75   :  { %1725 = vmatprep.subr.bf16.mxu0 %v638_v14  ;;  %2053 = vmatprep.subr.bf16.mxu1 %v640_v15  ;;  %v679_v51 = vunpack.c.h.s8.bf16 %v135_v43  ;;  %v686_v52 = vunpack.c.l.s8.bf16 %v142_v48  ;;  %v688_v53 = vunpack.c.l.s8.bf16 %v144_v49  ;;  %v685_v56 = vunpack.c.l.s8.bf16 %v141_v54  ;;  %v160_v9 = vld [vmem:[#allocation6 + $0x198] sm:$0xff]  ;;  %v157_v14 = vld [vmem:[#allocation6 + $0x180] sm:$0xff]  ;;  %v159_v15 = vld [vmem:[#allocation6 + $0x190] sm:$0xff] }
  0x76   :  { %1753 = vmatprep.mubr.bf16.mxu0 %v3942_v35  ;;  %2081 = vmatprep.mubr.bf16.mxu1 %v3942_v35  ;;  %v687_v57 = vunpack.c.l.s8.bf16 %v143_v55  ;;  %v694_v58 = vunpack.c.h.s8.bf16 %v142_v48  ;;  %v696_v59 = vunpack.c.h.s8.bf16 %v144_v49  ;;  %v693_v62 = vunpack.c.h.s8.bf16 %v141_v54  ;;  %v3950_v43 = vld [vmem:[#allocation3 + $0x8] sm:$0xff]  ;;  %v184_v49 = vld [vmem:[#allocation6 + $0x258] sm:$0xff]  ;;  %v181_v54 = vld [vmem:[#allocation6 + $0x240] sm:$0xff] }
  0x77   :  { %v695_v63 = vunpack.c.h.s8.bf16 %v143_v55  ;;  %v702_v0 = vunpack.c.l.s8.bf16 %v150_v60  ;;  %v704_v1 = vunpack.c.l.s8.bf16 %v152_v61  ;;  %v701_v4 = vunpack.c.l.s8.bf16 %v149_v2  ;;  %v182_v48 = vld [vmem:[#allocation6 + $0x248] sm:$0xff]  ;;  %v183_v55 = vld [vmem:[#allocation6 + $0x250] sm:$0xff] }
  0x78   :  { %1726 = vmatpush1.bf16.msra.mxu0 %v637_v18  ;;  %2054 = vmatpush1.bf16.msra.mxu1 %v639_v19  ;;  %v703_v5 = vunpack.c.l.s8.bf16 %v151_v3  ;;  %v710_v6 = vunpack.c.h.s8.bf16 %v150_v60  ;;  %v712_v7 = vunpack.c.h.s8.bf16 %v152_v61  ;;  %v709_v10 = vunpack.c.h.s8.bf16 %v149_v2  ;;  %v190_v60 = vld [vmem:[#allocation6 + $0x288] sm:$0xff]  ;;  %v192_v61 = vld [vmem:[#allocation6 + $0x298] sm:$0xff]  ;;  %v189_v2 = vld [vmem:[#allocation6 + $0x280] sm:$0xff] }
  0x79   :  { %1727 = vmatprep.subr.bf16.mxu0 %v646_v20  ;;  %2055 = vmatprep.subr.bf16.mxu1 %v648_v21  ;;  %v711_v11 = vunpack.c.h.s8.bf16 %v151_v3  ;;  %v718_v12 = vunpack.c.l.s8.bf16 %v158_v8  ;;  %v720_v13 = vunpack.c.l.s8.bf16 %v160_v9  ;;  %v717_v16 = vunpack.c.l.s8.bf16 %v157_v14  ;;  %v166_v20 = vld [vmem:[#allocation6 + $0x1c8] sm:$0xff]  ;;  %v168_v21 = vld [vmem:[#allocation6 + $0x1d8] sm:$0xff]  ;;  %v191_v3 = vld [vmem:[#allocation6 + $0x290] sm:$0xff] }
  0x7a   :  { %v719_v17 = vunpack.c.l.s8.bf16 %v159_v15  ;;  %v726_v18 = vunpack.c.h.s8.bf16 %v158_v8  ;;  %v728_v19 = vunpack.c.h.s8.bf16 %v160_v9  ;;  %v725_v22 = vunpack.c.h.s8.bf16 %v157_v14  ;;  %v198_v8 = vld [vmem:[#allocation6 + $0x2c8] sm:$0xff]  ;;  %v200_v9 = vld [vmem:[#allocation6 + $0x2d8] sm:$0xff]  ;;  %v197_v14 = vld [vmem:[#allocation6 + $0x2c0] sm:$0xff] }
  0x7b   :  { %v727_v23 = vunpack.c.h.s8.bf16 %v159_v15  ;;  %v3948_v42 = vcombine.low %v3938_v30, %v3938_v30  ;;  %v199_v15 = vld [vmem:[#allocation6 + $0x2d0] sm:$0xff] }
  0x7c   :  { %1728 = vmatpush1.bf16.msra.mxu0 %v645_v24  ;;  %2056 = vmatpush1.bf16.msra.mxu1 %v647_v25  ;;  %v734_v24 = vunpack.c.l.s8.bf16 %v166_v20  ;;  %v736_v25 = vunpack.c.l.s8.bf16 %v168_v21 }
  0x7d   :  { %1729 = vmatprep.subr.bf16.mxu0 %v654_v26  ;;  %2057 = vmatprep.subr.bf16.mxu1 %v656_v27  ;;  %v165_v26 = vld [vmem:[#allocation6 + $0x1c0] sm:$0xff]  ;;  %v167_v27 = vld [vmem:[#allocation6 + $0x1d0] sm:$0xff] }
  0x7e   :  { %v733_v28 = vunpack.c.l.s8.bf16 %v165_v26  ;;  %v735_v29 = vunpack.c.l.s8.bf16 %v167_v27  ;;  %v741_v36 = vunpack.c.h.s8.bf16 %v165_v26  ;;  %v743_v37 = vunpack.c.h.s8.bf16 %v167_v27  ;;  %v205_v26 = vld [vmem:[#allocation6 + $0x300] sm:$0xff]  ;;  %v207_v27 = vld [vmem:[#allocation6 + $0x310] sm:$0xff] }
  0x80   :  { %1730 = vmatpush1.bf16.msra.mxu0 %v653_v31  ;;  %2058 = vmatpush1.bf16.msra.mxu1 %v655_v32  ;;  %v742_v31 = vunpack.c.h.s8.bf16 %v166_v20  ;;  %v744_v32 = vunpack.c.h.s8.bf16 %v168_v21  ;;  %v206_v20 = vld [vmem:[#allocation6 + $0x308] sm:$0xff]  ;;  %v208_v21 = vld [vmem:[#allocation6 + $0x318] sm:$0xff] }
  0x81   :  { %1731 = vmatprep.subr.bf16.mxu0 %v662_v33  ;;  %2059 = vmatprep.subr.bf16.mxu1 %v664_v34  ;;  %v174_v33 = vld [vmem:[#allocation6 + $0x208] sm:$0xff]  ;;  %v176_v34 = vld [vmem:[#allocation6 + $0x218] sm:$0xff] }
  0x84   :  { %1732 = vmatpush1.bf16.msra.mxu0 %v661_v38  ;;  %2060 = vmatpush1.bf16.msra.mxu1 %v663_v39  ;;  %v750_v38 = vunpack.c.l.s8.bf16 %v174_v33  ;;  %v752_v39 = vunpack.c.l.s8.bf16 %v176_v34 }
  0x85   :  { %1733 = vmatprep.subr.bf16.mxu0 %v670_v40  ;;  %2061 = vmatprep.subr.bf16.mxu1 %v672_v41  ;;  %v173_v40 = vld [vmem:[#allocation6 + $0x200] sm:$0xff]  ;;  %v175_v41 = vld [vmem:[#allocation6 + $0x210] sm:$0xff] }
  0x86   :  { %v757_v30 = vunpack.c.h.s8.bf16 %v173_v40 }
  0x88   :  { %1734 = vmatpush1.bf16.msra.mxu0 %v669_v44  ;;  %2062 = vmatpush1.bf16.msra.mxu1 %v671_v45  ;;  %v749_v44 = vunpack.c.l.s8.bf16 %v173_v40  ;;  %v751_v45 = vunpack.c.l.s8.bf16 %v175_v41  ;;  %v213_v40 = vld [vmem:[#allocation6 + $0x340] sm:$0xff] }
  0x89   :  { %1735 = vmatprep.subr.bf16.mxu0 %v678_v46  ;;  %2063 = vmatprep.subr.bf16.mxu1 %v680_v47  ;;  %v758_v46 = vunpack.c.h.s8.bf16 %v174_v33  ;;  %v760_v47 = vunpack.c.h.s8.bf16 %v176_v34  ;;  %v214_v33 = vld [vmem:[#allocation6 + $0x348] sm:$0xff]  ;;  %v216_v34 = vld [vmem:[#allocation6 + $0x358] sm:$0xff] }
  0x8c   :  { %1736 = vmatpush1.bf16.msra.mxu0 %v677_v50  ;;  %2064 = vmatpush1.bf16.msra.mxu1 %v679_v51  ;;  %v3954_v50 = vcombine.high %v3950_v43, %v3950_v43  ;;  %v759_v51 = vunpack.c.h.s8.bf16 %v175_v41  ;;  %v215_v41 = vld [vmem:[#allocation6 + $0x350] sm:$0xff] }
  0x8d   :  { %1737 = vmatprep.subr.bf16.mxu0 %v686_v52  ;;  %2065 = vmatprep.subr.bf16.mxu1 %v688_v53  ;;  %v766_v52 = vunpack.c.l.s8.bf16 %v182_v48  ;;  %v768_v53 = vunpack.c.l.s8.bf16 %v184_v49 }
  0x90   :  { %1738 = vmatpush1.bf16.msra.mxu0 %v685_v56  ;;  %2066 = vmatpush1.bf16.msra.mxu1 %v687_v57  ;;  %v765_v56 = vunpack.c.l.s8.bf16 %v181_v54  ;;  %v767_v57 = vunpack.c.l.s8.bf16 %v183_v55 }
  0x91   :  { %1739 = vmatprep.subr.bf16.mxu0 %v694_v58  ;;  %2067 = vmatprep.subr.bf16.mxu1 %v696_v59  ;;  %v774_v58 = vunpack.c.h.s8.bf16 %v182_v48  ;;  %v776_v59 = vunpack.c.h.s8.bf16 %v184_v49  ;;  %v222_v48 = vld [vmem:[#allocation6 + $0x388] sm:$0xff]  ;;  %v224_v49 = vld [vmem:[#allocation6 + $0x398] sm:$0xff] }
  0x94   :  { %1740 = vmatpush1.bf16.msra.mxu0 %v693_v62  ;;  %2068 = vmatpush1.bf16.msra.mxu1 %v695_v63  ;;  %v773_v62 = vunpack.c.h.s8.bf16 %v181_v54  ;;  %v775_v63 = vunpack.c.h.s8.bf16 %v183_v55  ;;  %v221_v54 = vld [vmem:[#allocation6 + $0x380] sm:$0xff]  ;;  %v223_v55 = vld [vmem:[#allocation6 + $0x390] sm:$0xff] }
  0x95   :  { %1741 = vmatprep.subr.bf16.mxu0 %v702_v0  ;;  %2069 = vmatprep.subr.bf16.mxu1 %v704_v1  ;;  %v782_v0 = vunpack.c.l.s8.bf16 %v190_v60  ;;  %v784_v1 = vunpack.c.l.s8.bf16 %v192_v61 }
  0x98   :  { %1742 = vmatpush1.bf16.msra.mxu0 %v701_v4  ;;  %2070 = vmatpush1.bf16.msra.mxu1 %v703_v5  ;;  %v781_v4 = vunpack.c.l.s8.bf16 %v189_v2  ;;  %v783_v5 = vunpack.c.l.s8.bf16 %v191_v3 }
  0x99   :  { %1743 = vmatprep.subr.bf16.mxu0 %v710_v6  ;;  %2071 = vmatprep.subr.bf16.mxu1 %v712_v7  ;;  %v790_v6 = vunpack.c.h.s8.bf16 %v190_v60  ;;  %v792_v7 = vunpack.c.h.s8.bf16 %v192_v61  ;;  %v230_v60 = vld [vmem:[#allocation6 + $0x3c8] sm:$0xff]  ;;  %v232_v61 = vld [vmem:[#allocation6 + $0x3d8] sm:$0xff] }
  0x9c   :  { %1744 = vmatpush1.bf16.msra.mxu0 %v709_v10  ;;  %2072 = vmatpush1.bf16.msra.mxu1 %v711_v11  ;;  %v789_v10 = vunpack.c.h.s8.bf16 %v189_v2  ;;  %v791_v11 = vunpack.c.h.s8.bf16 %v191_v3  ;;  %v229_v2 = vld [vmem:[#allocation6 + $0x3c0] sm:$0xff]  ;;  %v231_v3 = vld [vmem:[#allocation6 + $0x3d0] sm:$0xff] }
  0x9d   :  { %1745 = vmatprep.subr.bf16.mxu0 %v718_v12  ;;  %2073 = vmatprep.subr.bf16.mxu1 %v720_v13  ;;  %v798_v12 = vunpack.c.l.s8.bf16 %v198_v8  ;;  %v800_v13 = vunpack.c.l.s8.bf16 %v200_v9 }
  0xa0   :  { %1746 = vmatpush1.bf16.msra.mxu0 %v717_v16  ;;  %2074 = vmatpush1.bf16.msra.mxu1 %v719_v17  ;;  %v797_v16 = vunpack.c.l.s8.bf16 %v197_v14  ;;  %v799_v17 = vunpack.c.l.s8.bf16 %v199_v15 }
  0xa1   :  { %1747 = vmatprep.subr.bf16.mxu0 %v726_v18  ;;  %2075 = vmatprep.subr.bf16.mxu1 %v728_v19  ;;  %v806_v18 = vunpack.c.h.s8.bf16 %v198_v8  ;;  %v808_v19 = vunpack.c.h.s8.bf16 %v200_v9  ;;  %v238_v8 = vld [vmem:[#allocation6 + $0x408] sm:$0xff]  ;;  %v240_v9 = vld [vmem:[#allocation6 + $0x418] sm:$0xff] }
  0xa4   :  { %1748 = vmatpush1.bf16.msra.mxu0 %v725_v22  ;;  %2076 = vmatpush1.bf16.msra.mxu1 %v727_v23  ;;  %v805_v22 = vunpack.c.h.s8.bf16 %v197_v14  ;;  %v807_v23 = vunpack.c.h.s8.bf16 %v199_v15  ;;  %v237_v14 = vld [vmem:[#allocation6 + $0x400] sm:$0xff]  ;;  %v239_v15 = vld [vmem:[#allocation6 + $0x410] sm:$0xff] }
  0xa5   :  { %1749 = vmatprep.subr.bf16.mxu0 %v734_v24  ;;  %2077 = vmatprep.subr.bf16.mxu1 %v736_v25  ;;  %v814_v24 = vunpack.c.l.s8.bf16 %v206_v20  ;;  %v816_v25 = vunpack.c.l.s8.bf16 %v208_v21 }
  0xa8   :  { %1750 = vmatpush1.bf16.msra.mxu0 %v733_v28  ;;  %2078 = vmatpush1.bf16.msra.mxu1 %v735_v29  ;;  %v813_v28 = vunpack.c.l.s8.bf16 %v205_v26  ;;  %v815_v29 = vunpack.c.l.s8.bf16 %v207_v27 }
  0xa9   :  { %1751 = vmatprep.subr.bf16.mxu0 %v742_v31  ;;  %2079 = vmatprep.subr.bf16.mxu1 %v744_v32  ;;  %v822_v31 = vunpack.c.h.s8.bf16 %v206_v20  ;;  %v824_v32 = vunpack.c.h.s8.bf16 %v208_v21  ;;  %v886_v20 = vunpack.c.h.s8.bf16 %v238_v8  ;;  %v888_v21 = vunpack.c.h.s8.bf16 %v240_v9 }
  0xac   :  { %1752 = vmatpush1.bf16.msra.mxu0 %v741_v36  ;;  %2080 = vmatpush1.bf16.msra.mxu1 %v743_v37  ;;  %v821_v36 = vunpack.c.h.s8.bf16 %v205_v26  ;;  %v823_v37 = vunpack.c.h.s8.bf16 %v207_v27 }
  0xad   :  { %1762 = vmatprep.subr.bf16.mxu0 %v750_v38  ;;  %2090 = vmatprep.subr.bf16.mxu1 %v752_v39  ;;  %v830_v38 = vunpack.c.l.s8.bf16 %v214_v33  ;;  %v832_v39 = vunpack.c.l.s8.bf16 %v216_v34 }
  0xaf   :  { %1754 = vmatmul.mubr.bf16.vlgmr.msra.gmra.mrb[0].mxu0 %v3948_v42  ;;  %2082 = vmatmul.mubr.bf16.vlgmr.msra.gmra.mrb[0].mxu1 %v3948_v42 }
  0xb0   :  { %1763 = vmatpush1.bf16.msra.mxu0 %v749_v44  ;;  %2091 = vmatpush1.bf16.msra.mxu1 %v751_v45  ;;  %v829_v44 = vunpack.c.l.s8.bf16 %v213_v40  ;;  %v831_v45 = vunpack.c.l.s8.bf16 %v215_v41 }
  0xb1   :  { %1764 = vmatprep.subr.bf16.mxu0 %v758_v46  ;;  %2092 = vmatprep.subr.bf16.mxu1 %v760_v47  ;;  %v838_v46 = vunpack.c.h.s8.bf16 %v214_v33  ;;  %v840_v47 = vunpack.c.h.s8.bf16 %v216_v34 }
  0xb2   :  { %1794 = vmatprep.mubr.bf16.mxu0 %v3954_v50  ;;  %2122 = vmatprep.mubr.bf16.mxu1 %v3954_v50 }
  0xb4   :  { %1765 = vmatpush1.bf16.msra.mxu0 %v757_v30  ;;  %2093 = vmatpush1.bf16.msra.mxu1 %v759_v51  ;;  %v837_v30 = vunpack.c.h.s8.bf16 %v213_v40  ;;  %v839_v51 = vunpack.c.h.s8.bf16 %v215_v41 }
  0xb5   :  { %1766 = vmatprep.subr.bf16.mxu0 %v766_v52  ;;  %2094 = vmatprep.subr.bf16.mxu1 %v768_v53  ;;  %v846_v52 = vunpack.c.l.s8.bf16 %v222_v48  ;;  %v848_v53 = vunpack.c.l.s8.bf16 %v224_v49 }
  0xb8   :  { %1767 = vmatpush1.bf16.msra.mxu0 %v765_v56  ;;  %2095 = vmatpush1.bf16.msra.mxu1 %v767_v57  ;;  %v845_v56 = vunpack.c.l.s8.bf16 %v221_v54  ;;  %v847_v57 = vunpack.c.l.s8.bf16 %v223_v55 }
  0xb9   :  { %1768 = vmatprep.subr.bf16.mxu0 %v774_v58  ;;  %2096 = vmatprep.subr.bf16.mxu1 %v776_v59  ;;  %v854_v58 = vunpack.c.h.s8.bf16 %v222_v48  ;;  %v856_v59 = vunpack.c.h.s8.bf16 %v224_v49 }
  0xbc   :  { %1769 = vmatpush1.bf16.msra.mxu0 %v773_v62  ;;  %2097 = vmatpush1.bf16.msra.mxu1 %v775_v63  ;;  %v853_v62 = vunpack.c.h.s8.bf16 %v221_v54  ;;  %v855_v63 = vunpack.c.h.s8.bf16 %v223_v55 }
  0xbd   :  { %1770 = vmatprep.subr.bf16.mxu0 %v782_v0  ;;  %2098 = vmatprep.subr.bf16.mxu1 %v784_v1  ;;  %v862_v0 = vunpack.c.l.s8.bf16 %v230_v60  ;;  %v864_v1 = vunpack.c.l.s8.bf16 %v232_v61 }
  0xc0   :  { %1771 = vmatpush1.bf16.msra.mxu0 %v781_v4  ;;  %2099 = vmatpush1.bf16.msra.mxu1 %v783_v5  ;;  %v861_v4 = vunpack.c.l.s8.bf16 %v229_v2  ;;  %v863_v5 = vunpack.c.l.s8.bf16 %v231_v3 }
  0xc1   :  { %1772 = vmatprep.subr.bf16.mxu0 %v790_v6  ;;  %2100 = vmatprep.subr.bf16.mxu1 %v792_v7  ;;  %v870_v6 = vunpack.c.h.s8.bf16 %v230_v60  ;;  %v872_v7 = vunpack.c.h.s8.bf16 %v232_v61 }
  0xc4   :  { %1773 = vmatpush1.bf16.msra.mxu0 %v789_v10  ;;  %2101 = vmatpush1.bf16.msra.mxu1 %v791_v11  ;;  %v869_v10 = vunpack.c.h.s8.bf16 %v229_v2  ;;  %v871_v11 = vunpack.c.h.s8.bf16 %v231_v3 }
  0xc5   :  { %1774 = vmatprep.subr.bf16.mxu0 %v798_v12  ;;  %2102 = vmatprep.subr.bf16.mxu1 %v800_v13  ;;  %v878_v12 = vunpack.c.l.s8.bf16 %v238_v8  ;;  %v880_v13 = vunpack.c.l.s8.bf16 %v240_v9 }
  0xc8   :  { %1775 = vmatpush1.bf16.msra.mxu0 %v797_v16  ;;  %2103 = vmatpush1.bf16.msra.mxu1 %v799_v17  ;;  %v3962_v16 = vcombine.low %v3950_v43, %v3950_v43  ;;  %v3964_v17 = vld [vmem:[#allocation3 + $0x10] sm:$0xff]  ;;  %v885_v43 = vunpack.c.h.s8.bf16 %v237_v14 }
  0xc9   :  { %1776 = vmatprep.subr.bf16.mxu0 %v806_v18  ;;  %2104 = vmatprep.subr.bf16.mxu1 %v808_v19  ;;  %v877_v18 = vunpack.c.l.s8.bf16 %v237_v14  ;;  %v879_v19 = vunpack.c.l.s8.bf16 %v239_v15 }
  0xcc   :  { %1777 = vmatpush1.bf16.msra.mxu0 %v805_v22  ;;  %2105 = vmatpush1.bf16.msra.mxu1 %v807_v23  ;;  %v246_v22 = vld [vmem:[#allocation6 + $0x448] sm:$0xff]  ;;  %v248_v23 = vld [vmem:[#allocation6 + $0x458] sm:$0xff] }
  0xcd   :  { %1778 = vmatprep.subr.bf16.mxu0 %v814_v24  ;;  %2106 = vmatprep.subr.bf16.mxu1 %v816_v25  ;;  %v3968_v24 = vcombine.high %v3964_v17, %v3964_v17  ;;  %v887_v25 = vunpack.c.h.s8.bf16 %v239_v15  ;;  %v894_v26 = vunpack.c.l.s8.bf16 %v246_v22  ;;  %v896_v27 = vunpack.c.l.s8.bf16 %v248_v23 }
  0xce   :  { %v902_v33 = vunpack.c.h.s8.bf16 %v246_v22  ;;  %v904_v34 = vunpack.c.h.s8.bf16 %v248_v23 }
  0xd0   :  { %1779 = vmatpush1.bf16.msra.mxu0 %v813_v28  ;;  %2107 = vmatpush1.bf16.msra.mxu1 %v815_v29  ;;  %v245_v28 = vld [vmem:[#allocation6 + $0x440] sm:$0xff]  ;;  %v247_v29 = vld [vmem:[#allocation6 + $0x450] sm:$0xff] }
  0xd1   :  { %1780 = vmatprep.subr.bf16.mxu0 %v822_v31  ;;  %2108 = vmatprep.subr.bf16.mxu1 %v824_v32  ;;  %v893_v31 = vunpack.c.l.s8.bf16 %v245_v28  ;;  %v895_v32 = vunpack.c.l.s8.bf16 %v247_v29 }
  0xd4   :  { %1781 = vmatpush1.bf16.msra.mxu0 %v821_v36  ;;  %2109 = vmatpush1.bf16.msra.mxu1 %v823_v37  ;;  %v254_v36 = vld [vmem:[#allocation6 + $0x488] sm:$0xff]  ;;  %v256_v37 = vld [vmem:[#allocation6 + $0x498] sm:$0xff] }
  0xd5   :  { %1782 = vmatprep.subr.bf16.mxu0 %v830_v38  ;;  %2110 = vmatprep.subr.bf16.mxu1 %v832_v39  ;;  %v901_v38 = vunpack.c.h.s8.bf16 %v245_v28  ;;  %v903_v39 = vunpack.c.h.s8.bf16 %v247_v29  ;;  %v910_v40 = vunpack.c.l.s8.bf16 %v254_v36  ;;  %v912_v41 = vunpack.c.l.s8.bf16 %v256_v37 }
  0xd6   :  { %v918_v48 = vunpack.c.h.s8.bf16 %v254_v36  ;;  %v920_v49 = vunpack.c.h.s8.bf16 %v256_v37 }
  0xd8   :  { %1783 = vmatpush1.bf16.msra.mxu0 %v829_v44  ;;  %2111 = vmatpush1.bf16.msra.mxu1 %v831_v45  ;;  %v253_v44 = vld [vmem:[#allocation6 + $0x480] sm:$0xff]  ;;  %v255_v45 = vld [vmem:[#allocation6 + $0x490] sm:$0xff] }
  0xd9   :  { %1784 = vmatprep.subr.bf16.mxu0 %v838_v46  ;;  %2112 = vmatprep.subr.bf16.mxu1 %v840_v47  ;;  %v909_v46 = vunpack.c.l.s8.bf16 %v253_v44  ;;  %v911_v47 = vunpack.c.l.s8.bf16 %v255_v45 }
  0xdc   :  { %1785 = vmatpush1.bf16.msra.mxu0 %v837_v30  ;;  %2113 = vmatpush1.bf16.msra.mxu1 %v839_v51  ;;  %v262_v30 = vld [vmem:[#allocation6 + $0x4c8] sm:$0xff]  ;;  %v264_v51 = vld [vmem:[#allocation6 + $0x4d8] sm:$0xff] }
  0xdd   :  { %1786 = vmatprep.subr.bf16.mxu0 %v846_v52  ;;  %2114 = vmatprep.subr.bf16.mxu1 %v848_v53  ;;  %v917_v52 = vunpack.c.h.s8.bf16 %v253_v44  ;;  %v919_v53 = vunpack.c.h.s8.bf16 %v255_v45  ;;  %v926_v54 = vunpack.c.l.s8.bf16 %v262_v30  ;;  %v928_v55 = vunpack.c.l.s8.bf16 %v264_v51 }
  0xde   :  { %v934_v60 = vunpack.c.h.s8.bf16 %v262_v30  ;;  %v936_v61 = vunpack.c.h.s8.bf16 %v264_v51 }
  0xe0   :  { %1787 = vmatpush1.bf16.msra.mxu0 %v845_v56  ;;  %2115 = vmatpush1.bf16.msra.mxu1 %v847_v57  ;;  %v261_v56 = vld [vmem:[#allocation6 + $0x4c0] sm:$0xff]  ;;  %v263_v57 = vld [vmem:[#allocation6 + $0x4d0] sm:$0xff] }
  0xe1   :  { %1788 = vmatprep.subr.bf16.mxu0 %v854_v58  ;;  %2116 = vmatprep.subr.bf16.mxu1 %v856_v59  ;;  %v925_v58 = vunpack.c.l.s8.bf16 %v261_v56  ;;  %v927_v59 = vunpack.c.l.s8.bf16 %v263_v57 }
  0xe4   :  { %1789 = vmatpush1.bf16.msra.mxu0 %v853_v62  ;;  %2117 = vmatpush1.bf16.msra.mxu1 %v855_v63  ;;  %v270_v62 = vld [vmem:[#allocation6 + $0x508] sm:$0xff]  ;;  %v272_v63 = vld [vmem:[#allocation6 + $0x518] sm:$0xff] }
  0xe5   :  { %1790 = vmatprep.subr.bf16.mxu0 %v862_v0  ;;  %2118 = vmatprep.subr.bf16.mxu1 %v864_v1  ;;  %v933_v0 = vunpack.c.h.s8.bf16 %v261_v56  ;;  %v935_v1 = vunpack.c.h.s8.bf16 %v263_v57  ;;  %v942_v2 = vunpack.c.l.s8.bf16 %v270_v62  ;;  %v944_v3 = vunpack.c.l.s8.bf16 %v272_v63 }
  0xe6   :  { %v950_v8 = vunpack.c.h.s8.bf16 %v270_v62  ;;  %v952_v9 = vunpack.c.h.s8.bf16 %v272_v63 }
  0xe8   :  { %1791 = vmatpush1.bf16.msra.mxu0 %v861_v4  ;;  %2119 = vmatpush1.bf16.msra.mxu1 %v863_v5  ;;  %v269_v4 = vld [vmem:[#allocation6 + $0x500] sm:$0xff]  ;;  %v271_v5 = vld [vmem:[#allocation6 + $0x510] sm:$0xff] }
  0xe9   :  { %1792 = vmatprep.subr.bf16.mxu0 %v870_v6  ;;  %2120 = vmatprep.subr.bf16.mxu1 %v872_v7  ;;  %v941_v6 = vunpack.c.l.s8.bf16 %v269_v4  ;;  %v943_v7 = vunpack.c.l.s8.bf16 %v271_v5 }
  0xec   :  { %1793 = vmatpush1.bf16.msra.mxu0 %v869_v10  ;;  %2121 = vmatpush1.bf16.msra.mxu1 %v871_v11  ;;  %v278_v10 = vld [vmem:[#allocation6 + $0x548] sm:$0xff]  ;;  %v280_v11 = vld [vmem:[#allocation6 + $0x558] sm:$0xff] }
  0xed   :  { %1803 = vmatprep.subr.bf16.mxu0 %v878_v12  ;;  %2131 = vmatprep.subr.bf16.mxu1 %v880_v13  ;;  %v949_v12 = vunpack.c.h.s8.bf16 %v269_v4  ;;  %v951_v13 = vunpack.c.h.s8.bf16 %v271_v5  ;;  %v958_v14 = vunpack.c.l.s8.bf16 %v278_v10  ;;  %v960_v15 = vunpack.c.l.s8.bf16 %v280_v11 }
  0xee   :  { %v966_v22 = vunpack.c.h.s8.bf16 %v278_v10  ;;  %v968_v23 = vunpack.c.h.s8.bf16 %v280_v11 }
  0xef   :  { %1795 = vmatmul.mubr.bf16.vlgmr.msra.gmra.mrb[0].mxu0 %v3962_v16  ;;  %2123 = vmatmul.mubr.bf16.vlgmr.msra.gmra.mrb[0].mxu1 %v3962_v16 }
  0xf0   :  { %1804 = vmatpush1.bf16.msra.mxu0 %v877_v18  ;;  %2132 = vmatpush1.bf16.msra.mxu1 %v879_v19  ;;  %v277_v18 = vld [vmem:[#allocation6 + $0x540] sm:$0xff]  ;;  %v279_v19 = vld [vmem:[#allocation6 + $0x550] sm:$0xff] }
  0xf1   :  { %1805 = vmatprep.subr.bf16.mxu0 %v886_v20  ;;  %2133 = vmatprep.subr.bf16.mxu1 %v888_v21  ;;  %v957_v20 = vunpack.c.l.s8.bf16 %v277_v18  ;;  %v959_v21 = vunpack.c.l.s8.bf16 %v279_v19 }
  0xf2   :  { %1835 = vmatprep.mubr.bf16.mxu0 %v3968_v24  ;;  %2163 = vmatprep.mubr.bf16.mxu1 %v3968_v24 }
  0xf4   :  { %1806 = vmatpush1.bf16.msra.mxu0 %v885_v43  ;;  %2134 = vmatpush1.bf16.msra.mxu1 %v887_v25  ;;  %v286_v43 = vld [vmem:[#allocation6 + $0x588] sm:$0xff]  ;;  %v288_v25 = vld [vmem:[#allocation6 + $0x598] sm:$0xff] }
  0xf5   :  { %1807 = vmatprep.subr.bf16.mxu0 %v894_v26  ;;  %2135 = vmatprep.subr.bf16.mxu1 %v896_v27  ;;  %v965_v26 = vunpack.c.h.s8.bf16 %v277_v18  ;;  %v967_v27 = vunpack.c.h.s8.bf16 %v279_v19  ;;  %v974_v28 = vunpack.c.l.s8.bf16 %v286_v43  ;;  %v976_v29 = vunpack.c.l.s8.bf16 %v288_v25 }
  0xf6   :  { %v982_v36 = vunpack.c.h.s8.bf16 %v286_v43  ;;  %v984_v37 = vunpack.c.h.s8.bf16 %v288_v25 }
  0xf8   :  { %1808 = vmatpush1.bf16.msra.mxu0 %v893_v31  ;;  %2136 = vmatpush1.bf16.msra.mxu1 %v895_v32  ;;  %v285_v31 = vld [vmem:[#allocation6 + $0x580] sm:$0xff]  ;;  %v287_v32 = vld [vmem:[#allocation6 + $0x590] sm:$0xff] }
  0xf9   :  { %1809 = vmatprep.subr.bf16.mxu0 %v902_v33  ;;  %2137 = vmatprep.subr.bf16.mxu1 %v904_v34  ;;  %v973_v33 = vunpack.c.l.s8.bf16 %v285_v31  ;;  %v975_v34 = vunpack.c.l.s8.bf16 %v287_v32 }
  0xfc   :  { %1810 = vmatpush1.bf16.msra.mxu0 %v901_v38  ;;  %2138 = vmatpush1.bf16.msra.mxu1 %v903_v39  ;;  %v294_v38 = vld [vmem:[#allocation6 + $0x5c8] sm:$0xff]  ;;  %v296_v39 = vld [vmem:[#allocation6 + $0x5d8] sm:$0xff] }
  0xfd   :  { %1811 = vmatprep.subr.bf16.mxu0 %v910_v40  ;;  %2139 = vmatprep.subr.bf16.mxu1 %v912_v41  ;;  %v981_v40 = vunpack.c.h.s8.bf16 %v285_v31  ;;  %v983_v41 = vunpack.c.h.s8.bf16 %v287_v32  ;;  %v990_v44 = vunpack.c.l.s8.bf16 %v294_v38  ;;  %v992_v45 = vunpack.c.l.s8.bf16 %v296_v39 }
  0xfe   :  { %v998_v30 = vunpack.c.h.s8.bf16 %v294_v38  ;;  %v1000_v51 = vunpack.c.h.s8.bf16 %v296_v39 }
 0x100   :  { %1812 = vmatpush1.bf16.msra.mxu0 %v909_v46  ;;  %2140 = vmatpush1.bf16.msra.mxu1 %v911_v47  ;;  %v293_v46 = vld [vmem:[#allocation6 + $0x5c0] sm:$0xff]  ;;  %v295_v47 = vld [vmem:[#allocation6 + $0x5d0] sm:$0xff] }
 0x101   :  { %1813 = vmatprep.subr.bf16.mxu0 %v918_v48  ;;  %2141 = vmatprep.subr.bf16.mxu1 %v920_v49  ;;  %v989_v48 = vunpack.c.l.s8.bf16 %v293_v46  ;;  %v991_v49 = vunpack.c.l.s8.bf16 %v295_v47 }
 0x104   :  { %1814 = vmatpush1.bf16.msra.mxu0 %v917_v52  ;;  %2142 = vmatpush1.bf16.msra.mxu1 %v919_v53  ;;  %v302_v52 = vld [vmem:[#allocation6 + $0x608] sm:$0xff]  ;;  %v304_v53 = vld [vmem:[#allocation6 + $0x618] sm:$0xff] }
 0x105   :  { %1815 = vmatprep.subr.bf16.mxu0 %v926_v54  ;;  %2143 = vmatprep.subr.bf16.mxu1 %v928_v55  ;;  %v997_v54 = vunpack.c.h.s8.bf16 %v293_v46  ;;  %v999_v55 = vunpack.c.h.s8.bf16 %v295_v47  ;;  %v1006_v56 = vunpack.c.l.s8.bf16 %v302_v52  ;;  %v1008_v57 = vunpack.c.l.s8.bf16 %v304_v53 }
 0x108   :  { %1816 = vmatpush1.bf16.msra.mxu0 %v925_v58  ;;  %2144 = vmatpush1.bf16.msra.mxu1 %v927_v59  ;;  %v301_v58 = vld [vmem:[#allocation6 + $0x600] sm:$0xff]  ;;  %v303_v59 = vld [vmem:[#allocation6 + $0x610] sm:$0xff] }
 0x109   :  { %1817 = vmatprep.subr.bf16.mxu0 %v934_v60  ;;  %2145 = vmatprep.subr.bf16.mxu1 %v936_v61  ;;  %v3976_v60 = vcombine.low %v3964_v17, %v3964_v17  ;;  %v3978_v61 = vld [vmem:[#allocation3 + $0x18] sm:$0xff]  ;;  %v1005_v62 = vunpack.c.l.s8.bf16 %v301_v58  ;;  %v1007_v63 = vunpack.c.l.s8.bf16 %v303_v59  ;;  %v1013_v17 = vunpack.c.h.s8.bf16 %v301_v58 }
 0x10a   :  { %v3982_v4 = vcombine.high %v3978_v61, %v3978_v61  ;;  %v1015_v5 = vunpack.c.h.s8.bf16 %v303_v59 }
 0x10c   :  { %1818 = vmatpush1.bf16.msra.mxu0 %v933_v0  ;;  %2146 = vmatpush1.bf16.msra.mxu1 %v935_v1  ;;  %v1014_v0 = vunpack.c.h.s8.bf16 %v302_v52  ;;  %v1016_v1 = vunpack.c.h.s8.bf16 %v304_v53 }
 0x10d   :  { %1819 = vmatprep.subr.bf16.mxu0 %v942_v2  ;;  %2147 = vmatprep.subr.bf16.mxu1 %v944_v3  ;;  %v310_v2 = vld [vmem:[#allocation6 + $0x648] sm:$0xff]  ;;  %v312_v3 = vld [vmem:[#allocation6 + $0x658] sm:$0xff] }
 0x110   :  { %1820 = vmatpush1.bf16.msra.mxu0 %v941_v6  ;;  %2148 = vmatpush1.bf16.msra.mxu1 %v943_v7  ;;  %v1022_v6 = vunpack.c.l.s8.bf16 %v310_v2  ;;  %v1024_v7 = vunpack.c.l.s8.bf16 %v312_v3 }
 0x111   :  { %1821 = vmatprep.subr.bf16.mxu0 %v950_v8  ;;  %2149 = vmatprep.subr.bf16.mxu1 %v952_v9  ;;  %v309_v8 = vld [vmem:[#allocation6 + $0x640] sm:$0xff]  ;;  %v311_v9 = vld [vmem:[#allocation6 + $0x650] sm:$0xff] }
 0x112   :  { %v1021_v10 = vunpack.c.l.s8.bf16 %v309_v8  ;;  %v1023_v11 = vunpack.c.l.s8.bf16 %v311_v9  ;;  %v1029_v18 = vunpack.c.h.s8.bf16 %v309_v8  ;;  %v1031_v19 = vunpack.c.h.s8.bf16 %v311_v9 }
 0x114   :  { %1822 = vmatpush1.bf16.msra.mxu0 %v949_v12  ;;  %2150 = vmatpush1.bf16.msra.mxu1 %v951_v13  ;;  %v1030_v12 = vunpack.c.h.s8.bf16 %v310_v2  ;;  %v1032_v13 = vunpack.c.h.s8.bf16 %v312_v3 }
 0x115   :  { %1823 = vmatprep.subr.bf16.mxu0 %v958_v14  ;;  %2151 = vmatprep.subr.bf16.mxu1 %v960_v15  ;;  %v318_v14 = vld [vmem:[#allocation6 + $0x688] sm:$0xff]  ;;  %v320_v15 = vld [vmem:[#allocation6 + $0x698] sm:$0xff] }
 0x118   :  { %1824 = vmatpush1.bf16.msra.mxu0 %v957_v20  ;;  %2152 = vmatpush1.bf16.msra.mxu1 %v959_v21  ;;  %v1038_v20 = vunpack.c.l.s8.bf16 %v318_v14  ;;  %v1040_v21 = vunpack.c.l.s8.bf16 %v320_v15 }
 0x119   :  { %1825 = vmatprep.subr.bf16.mxu0 %v966_v22  ;;  %2153 = vmatprep.subr.bf16.mxu1 %v968_v23  ;;  %v317_v22 = vld [vmem:[#allocation6 + $0x680] sm:$0xff]  ;;  %v319_v23 = vld [vmem:[#allocation6 + $0x690] sm:$0xff] }
 0x11a   :  { %v1037_v43 = vunpack.c.l.s8.bf16 %v317_v22  ;;  %v1039_v25 = vunpack.c.l.s8.bf16 %v319_v23  ;;  %v1045_v31 = vunpack.c.h.s8.bf16 %v317_v22  ;;  %v1047_v32 = vunpack.c.h.s8.bf16 %v319_v23 }
 0x11c   :  { %1826 = vmatpush1.bf16.msra.mxu0 %v965_v26  ;;  %2154 = vmatpush1.bf16.msra.mxu1 %v967_v27  ;;  %v1046_v26 = vunpack.c.h.s8.bf16 %v318_v14  ;;  %v1048_v27 = vunpack.c.h.s8.bf16 %v320_v15 }
 0x11d   :  { %1827 = vmatprep.subr.bf16.mxu0 %v974_v28  ;;  %2155 = vmatprep.subr.bf16.mxu1 %v976_v29  ;;  %v326_v28 = vld [vmem:[#allocation6 + $0x6c8] sm:$0xff]  ;;  %v328_v29 = vld [vmem:[#allocation6 + $0x6d8] sm:$0xff] }
 0x120   :  { %1828 = vmatpush1.bf16.msra.mxu0 %v973_v33  ;;  %2156 = vmatpush1.bf16.msra.mxu1 %v975_v34  ;;  %v1054_v33 = vunpack.c.l.s8.bf16 %v326_v28  ;;  %v1056_v34 = vunpack.c.l.s8.bf16 %v328_v29 }
 0x121   :  { %1829 = vmatprep.subr.bf16.mxu0 %v982_v36  ;;  %2157 = vmatprep.subr.bf16.mxu1 %v984_v37  ;;  %v325_v36 = vld [vmem:[#allocation6 + $0x6c0] sm:$0xff]  ;;  %v327_v37 = vld [vmem:[#allocation6 + $0x6d0] sm:$0xff] }
 0x122   :  { %v1053_v38 = vunpack.c.l.s8.bf16 %v325_v36  ;;  %v1055_v39 = vunpack.c.l.s8.bf16 %v327_v37  ;;  %v1061_v46 = vunpack.c.h.s8.bf16 %v325_v36  ;;  %v1063_v47 = vunpack.c.h.s8.bf16 %v327_v37 }
 0x124   :  { %1830 = vmatpush1.bf16.msra.mxu0 %v981_v40  ;;  %2158 = vmatpush1.bf16.msra.mxu1 %v983_v41  ;;  %v1062_v40 = vunpack.c.h.s8.bf16 %v326_v28  ;;  %v1064_v41 = vunpack.c.h.s8.bf16 %v328_v29 }
 0x125   :  { %1831 = vmatprep.subr.bf16.mxu0 %v990_v44  ;;  %2159 = vmatprep.subr.bf16.mxu1 %v992_v45  ;;  %v334_v44 = vld [vmem:[#allocation6 + $0x708] sm:$0xff]  ;;  %v336_v45 = vld [vmem:[#allocation6 + $0x718] sm:$0xff] }
 0x128   :  { %1832 = vmatpush1.bf16.msra.mxu0 %v989_v48  ;;  %2160 = vmatpush1.bf16.msra.mxu1 %v991_v49  ;;  %v1070_v48 = vunpack.c.l.s8.bf16 %v334_v44  ;;  %v1072_v49 = vunpack.c.l.s8.bf16 %v336_v45 }
 0x129   :  { %1833 = vmatprep.subr.bf16.mxu0 %v998_v30  ;;  %2161 = vmatprep.subr.bf16.mxu1 %v1000_v51  ;;  %v333_v30 = vld [vmem:[#allocation6 + $0x700] sm:$0xff]  ;;  %v335_v51 = vld [vmem:[#allocation6 + $0x710] sm:$0xff] }
 0x12a   :  { %v1069_v52 = vunpack.c.l.s8.bf16 %v333_v30  ;;  %v1071_v53 = vunpack.c.l.s8.bf16 %v335_v51  ;;  %v1077_v58 = vunpack.c.h.s8.bf16 %v333_v30  ;;  %v1079_v59 = vunpack.c.h.s8.bf16 %v335_v51  ;;  %v374_v30 = vld [vmem:[#allocation6 + $0x848] sm:$0xff]  ;;  %v376_v51 = vld [vmem:[#allocation6 + $0x858] sm:$0xff] }
 0x12c   :  { %1834 = vmatpush1.bf16.msra.mxu0 %v997_v54  ;;  %2162 = vmatpush1.bf16.msra.mxu1 %v999_v55  ;;  %v1078_v54 = vunpack.c.h.s8.bf16 %v334_v44  ;;  %v1080_v55 = vunpack.c.h.s8.bf16 %v336_v45  ;;  %v3990_v44 = vcombine.low %v3978_v61, %v3978_v61  ;;  %v3992_v45 = vld [vmem:[#allocation3 + $0x20] sm:$0xff] }
 0x12d   :  { %1844 = vmatprep.subr.bf16.mxu0 %v1006_v56  ;;  %2172 = vmatprep.subr.bf16.mxu1 %v1008_v57  ;;  %v342_v56 = vld [vmem:[#allocation6 + $0x748] sm:$0xff]  ;;  %v344_v57 = vld [vmem:[#allocation6 + $0x758] sm:$0xff] }
 0x12f   :  { %1836 = vmatmul.mubr.bf16.vlgmr.msra.gmra.mrb[0].mxu0 %v3976_v60  ;;  %2164 = vmatmul.mubr.bf16.vlgmr.msra.gmra.mrb[0].mxu1 %v3976_v60 }
 0x130   :  { %1845 = vmatpush1.bf16.msra.mxu0 %v1005_v62  ;;  %2173 = vmatpush1.bf16.msra.mxu1 %v1007_v63  ;;  %v1086_v62 = vunpack.c.l.s8.bf16 %v342_v56  ;;  %v1088_v63 = vunpack.c.l.s8.bf16 %v344_v57 }
 0x131   :  { %1846 = vmatprep.subr.bf16.mxu0 %v1014_v0  ;;  %2174 = vmatprep.subr.bf16.mxu1 %v1016_v1  ;;  %v341_v0 = vld [vmem:[#allocation6 + $0x740] sm:$0xff]  ;;  %v343_v1 = vld [vmem:[#allocation6 + $0x750] sm:$0xff] }
 0x132   :  { %1876 = vmatprep.mubr.bf16.mxu0 %v3982_v4  ;;  %2204 = vmatprep.mubr.bf16.mxu1 %v3982_v4  ;;  %v1085_v2 = vunpack.c.l.s8.bf16 %v341_v0  ;;  %v1087_v3 = vunpack.c.l.s8.bf16 %v343_v1  ;;  %v1093_v8 = vunpack.c.h.s8.bf16 %v341_v0  ;;  %v1095_v9 = vunpack.c.h.s8.bf16 %v343_v1  ;;  %v382_v0 = vld [vmem:[#allocation6 + $0x888] sm:$0xff]  ;;  %v384_v1 = vld [vmem:[#allocation6 + $0x898] sm:$0xff] }
 0x134   :  { %1847 = vmatpush1.bf16.msra.mxu0 %v1013_v17  ;;  %2175 = vmatpush1.bf16.msra.mxu1 %v1015_v5  ;;  %v1094_v17 = vunpack.c.h.s8.bf16 %v342_v56  ;;  %v1096_v5 = vunpack.c.h.s8.bf16 %v344_v57  ;;  %v373_v56 = vld [vmem:[#allocation6 + $0x840] sm:$0xff]  ;;  %v375_v57 = vld [vmem:[#allocation6 + $0x850] sm:$0xff] }
 0x135   :  { %1848 = vmatprep.subr.bf16.mxu0 %v1022_v6  ;;  %2176 = vmatprep.subr.bf16.mxu1 %v1024_v7  ;;  %v350_v6 = vld [vmem:[#allocation6 + $0x788] sm:$0xff]  ;;  %v352_v7 = vld [vmem:[#allocation6 + $0x798] sm:$0xff] }
 0x138   :  { %1849 = vmatpush1.bf16.msra.mxu0 %v1021_v10  ;;  %2177 = vmatpush1.bf16.msra.mxu1 %v1023_v11  ;;  %v1102_v10 = vunpack.c.l.s8.bf16 %v350_v6  ;;  %v1104_v11 = vunpack.c.l.s8.bf16 %v352_v7 }
 0x139   :  { %1850 = vmatprep.subr.bf16.mxu0 %v1030_v12  ;;  %2178 = vmatprep.subr.bf16.mxu1 %v1032_v13  ;;  %v349_v12 = vld [vmem:[#allocation6 + $0x780] sm:$0xff]  ;;  %v351_v13 = vld [vmem:[#allocation6 + $0x790] sm:$0xff] }
 0x13a   :  { %v1101_v14 = vunpack.c.l.s8.bf16 %v349_v12  ;;  %v1103_v15 = vunpack.c.l.s8.bf16 %v351_v13  ;;  %v1109_v22 = vunpack.c.h.s8.bf16 %v349_v12  ;;  %v1111_v23 = vunpack.c.h.s8.bf16 %v351_v13  ;;  %v390_v12 = vld [vmem:[#allocation6 + $0x8c8] sm:$0xff]  ;;  %v392_v13 = vld [vmem:[#allocation6 + $0x8d8] sm:$0xff] }
 0x13c   :  { %1851 = vmatpush1.bf16.msra.mxu0 %v1029_v18  ;;  %2179 = vmatpush1.bf16.msra.mxu1 %v1031_v19  ;;  %v1110_v18 = vunpack.c.h.s8.bf16 %v350_v6  ;;  %v1112_v19 = vunpack.c.h.s8.bf16 %v352_v7  ;;  %v381_v6 = vld [vmem:[#allocation6 + $0x880] sm:$0xff]  ;;  %v383_v7 = vld [vmem:[#allocation6 + $0x890] sm:$0xff] }
 0x13d   :  { %1852 = vmatprep.subr.bf16.mxu0 %v1038_v20  ;;  %2180 = vmatprep.subr.bf16.mxu1 %v1040_v21  ;;  %v358_v20 = vld [vmem:[#allocation6 + $0x7c8] sm:$0xff]  ;;  %v360_v21 = vld [vmem:[#allocation6 + $0x7d8] sm:$0xff] }
 0x140   :  { %1853 = vmatpush1.bf16.msra.mxu0 %v1037_v43  ;;  %2181 = vmatpush1.bf16.msra.mxu1 %v1039_v25  ;;  %v1118_v43 = vunpack.c.l.s8.bf16 %v358_v20  ;;  %v1120_v25 = vunpack.c.l.s8.bf16 %v360_v21 }
 0x141   :  { %1854 = vmatprep.subr.bf16.mxu0 %v1046_v26  ;;  %2182 = vmatprep.subr.bf16.mxu1 %v1048_v27  ;;  %v357_v26 = vld [vmem:[#allocation6 + $0x7c0] sm:$0xff]  ;;  %v359_v27 = vld [vmem:[#allocation6 + $0x7d0] sm:$0xff] }
 0x142   :  { %v1117_v28 = vunpack.c.l.s8.bf16 %v357_v26  ;;  %v1119_v29 = vunpack.c.l.s8.bf16 %v359_v27  ;;  %v1125_v36 = vunpack.c.h.s8.bf16 %v357_v26  ;;  %v1127_v37 = vunpack.c.h.s8.bf16 %v359_v27  ;;  %v398_v26 = vld [vmem:[#allocation6 + $0x908] sm:$0xff]  ;;  %v400_v27 = vld [vmem:[#allocation6 + $0x918] sm:$0xff] }
 0x144   :  { %1855 = vmatpush1.bf16.msra.mxu0 %v1045_v31  ;;  %2183 = vmatpush1.bf16.msra.mxu1 %v1047_v32  ;;  %v1126_v31 = vunpack.c.h.s8.bf16 %v358_v20  ;;  %v1128_v32 = vunpack.c.h.s8.bf16 %v360_v21  ;;  %v389_v20 = vld [vmem:[#allocation6 + $0x8c0] sm:$0xff]  ;;  %v391_v21 = vld [vmem:[#allocation6 + $0x8d0] sm:$0xff] }
 0x145   :  { %1856 = vmatprep.subr.bf16.mxu0 %v1054_v33  ;;  %2184 = vmatprep.subr.bf16.mxu1 %v1056_v34  ;;  %v366_v33 = vld [vmem:[#allocation6 + $0x808] sm:$0xff]  ;;  %v368_v34 = vld [vmem:[#allocation6 + $0x818] sm:$0xff] }
 0x148   :  { %1857 = vmatpush1.bf16.msra.mxu0 %v1053_v38  ;;  %2185 = vmatpush1.bf16.msra.mxu1 %v1055_v39  ;;  %v1134_v38 = vunpack.c.l.s8.bf16 %v366_v33  ;;  %v1136_v39 = vunpack.c.l.s8.bf16 %v368_v34 }
 0x149   :  { %1858 = vmatprep.subr.bf16.mxu0 %v1062_v40  ;;  %2186 = vmatprep.subr.bf16.mxu1 %v1064_v41  ;;  %v365_v40 = vld [vmem:[#allocation6 + $0x800] sm:$0xff]  ;;  %v367_v41 = vld [vmem:[#allocation6 + $0x810] sm:$0xff] }
 0x14a   :  { %v1141_v61 = vunpack.c.h.s8.bf16 %v365_v40 }
 0x14c   :  { %1859 = vmatpush1.bf16.msra.mxu0 %v1061_v46  ;;  %2187 = vmatpush1.bf16.msra.mxu1 %v1063_v47  ;;  %v1133_v46 = vunpack.c.l.s8.bf16 %v365_v40  ;;  %v1135_v47 = vunpack.c.l.s8.bf16 %v367_v41  ;;  %v406_v40 = vld [vmem:[#allocation6 + $0x948] sm:$0xff] }
 0x14d   :  { %1860 = vmatprep.subr.bf16.mxu0 %v1070_v48  ;;  %2188 = vmatprep.subr.bf16.mxu1 %v1072_v49  ;;  %v1142_v48 = vunpack.c.h.s8.bf16 %v366_v33  ;;  %v1144_v49 = vunpack.c.h.s8.bf16 %v368_v34  ;;  %v397_v33 = vld [vmem:[#allocation6 + $0x900] sm:$0xff]  ;;  %v399_v34 = vld [vmem:[#allocation6 + $0x910] sm:$0xff] }
 0x150   :  { %1861 = vmatpush1.bf16.msra.mxu0 %v1069_v52  ;;  %2189 = vmatpush1.bf16.msra.mxu1 %v1071_v53  ;;  %v3996_v52 = vcombine.high %v3992_v45, %v3992_v45  ;;  %v1143_v53 = vunpack.c.h.s8.bf16 %v367_v41  ;;  %v408_v41 = vld [vmem:[#allocation6 + $0x958] sm:$0xff] }
 0x151   :  { %1862 = vmatprep.subr.bf16.mxu0 %v1078_v54  ;;  %2190 = vmatprep.subr.bf16.mxu1 %v1080_v55  ;;  %v1150_v54 = vunpack.c.l.s8.bf16 %v374_v30  ;;  %v1152_v55 = vunpack.c.l.s8.bf16 %v376_v51 }
 0x154   :  { %1863 = vmatpush1.bf16.msra.mxu0 %v1077_v58  ;;  %2191 = vmatpush1.bf16.msra.mxu1 %v1079_v59  ;;  %v1149_v58 = vunpack.c.l.s8.bf16 %v373_v56  ;;  %v1151_v59 = vunpack.c.l.s8.bf16 %v375_v57 }
 0x155   :  { %1864 = vmatprep.subr.bf16.mxu0 %v1086_v62  ;;  %2192 = vmatprep.subr.bf16.mxu1 %v1088_v63  ;;  %v1158_v62 = vunpack.c.h.s8.bf16 %v374_v30  ;;  %v1160_v63 = vunpack.c.h.s8.bf16 %v376_v51  ;;  %v405_v30 = vld [vmem:[#allocation6 + $0x940] sm:$0xff]  ;;  %v407_v51 = vld [vmem:[#allocation6 + $0x950] sm:$0xff] }
 0x158   :  { %1865 = vmatpush1.bf16.msra.mxu0 %v1085_v2  ;;  %2193 = vmatpush1.bf16.msra.mxu1 %v1087_v3  ;;  %v1157_v2 = vunpack.c.h.s8.bf16 %v373_v56  ;;  %v1159_v3 = vunpack.c.h.s8.bf16 %v375_v57  ;;  %v414_v56 = vld [vmem:[#allocation6 + $0x988] sm:$0xff]  ;;  %v416_v57 = vld [vmem:[#allocation6 + $0x998] sm:$0xff] }
 0x159   :  { %1866 = vmatprep.subr.bf16.mxu0 %v1094_v17  ;;  %2194 = vmatprep.subr.bf16.mxu1 %v1096_v5  ;;  %v1166_v17 = vunpack.c.l.s8.bf16 %v382_v0  ;;  %v1168_v5 = vunpack.c.l.s8.bf16 %v384_v1 }
 0x15c   :  { %1867 = vmatpush1.bf16.msra.mxu0 %v1093_v8  ;;  %2195 = vmatpush1.bf16.msra.mxu1 %v1095_v9  ;;  %v1165_v8 = vunpack.c.l.s8.bf16 %v381_v6  ;;  %v1167_v9 = vunpack.c.l.s8.bf16 %v383_v7 }
 0x15d   :  { %1868 = vmatprep.subr.bf16.mxu0 %v1102_v10  ;;  %2196 = vmatprep.subr.bf16.mxu1 %v1104_v11  ;;  %v1174_v10 = vunpack.c.h.s8.bf16 %v382_v0  ;;  %v1176_v11 = vunpack.c.h.s8.bf16 %v384_v1  ;;  %v413_v0 = vld [vmem:[#allocation6 + $0x980] sm:$0xff]  ;;  %v415_v1 = vld [vmem:[#allocation6 + $0x990] sm:$0xff] }
 0x160   :  { %1869 = vmatpush1.bf16.msra.mxu0 %v1101_v14  ;;  %2197 = vmatpush1.bf16.msra.mxu1 %v1103_v15  ;;  %v1173_v14 = vunpack.c.h.s8.bf16 %v381_v6  ;;  %v1175_v15 = vunpack.c.h.s8.bf16 %v383_v7  ;;  %v422_v6 = vld [vmem:[#allocation6 + $0x9c8] sm:$0xff]  ;;  %v424_v7 = vld [vmem:[#allocation6 + $0x9d8] sm:$0xff] }
 0x161   :  { %1870 = vmatprep.subr.bf16.mxu0 %v1110_v18  ;;  %2198 = vmatprep.subr.bf16.mxu1 %v1112_v19  ;;  %v1182_v18 = vunpack.c.l.s8.bf16 %v390_v12  ;;  %v1184_v19 = vunpack.c.l.s8.bf16 %v392_v13 }
 0x164   :  { %1871 = vmatpush1.bf16.msra.mxu0 %v1109_v22  ;;  %2199 = vmatpush1.bf16.msra.mxu1 %v1111_v23  ;;  %v1181_v22 = vunpack.c.l.s8.bf16 %v389_v20  ;;  %v1183_v23 = vunpack.c.l.s8.bf16 %v391_v21 }
 0x165   :  { %1872 = vmatprep.subr.bf16.mxu0 %v1118_v43  ;;  %2200 = vmatprep.subr.bf16.mxu1 %v1120_v25  ;;  %v1190_v43 = vunpack.c.h.s8.bf16 %v390_v12  ;;  %v1192_v25 = vunpack.c.h.s8.bf16 %v392_v13  ;;  %v421_v12 = vld [vmem:[#allocation6 + $0x9c0] sm:$0xff]  ;;  %v423_v13 = vld [vmem:[#allocation6 + $0x9d0] sm:$0xff] }
 0x168   :  { %1873 = vmatpush1.bf16.msra.mxu0 %v1117_v28  ;;  %2201 = vmatpush1.bf16.msra.mxu1 %v1119_v29  ;;  %v1189_v28 = vunpack.c.h.s8.bf16 %v389_v20  ;;  %v1191_v29 = vunpack.c.h.s8.bf16 %v391_v21  ;;  %v430_v20 = vld [vmem:[#allocation6 + $0xa08] sm:$0xff]  ;;  %v432_v21 = vld [vmem:[#allocation6 + $0xa18] sm:$0xff] }
 0x169   :  { %1874 = vmatprep.subr.bf16.mxu0 %v1126_v31  ;;  %2202 = vmatprep.subr.bf16.mxu1 %v1128_v32  ;;  %v1198_v31 = vunpack.c.l.s8.bf16 %v398_v26  ;;  %v1200_v32 = vunpack.c.l.s8.bf16 %v400_v27 }
 0x16c   :  { %1875 = vmatpush1.bf16.msra.mxu0 %v1125_v36  ;;  %2203 = vmatpush1.bf16.msra.mxu1 %v1127_v37  ;;  %v1197_v36 = vunpack.c.l.s8.bf16 %v397_v33  ;;  %v1199_v37 = vunpack.c.l.s8.bf16 %v399_v34 }
 0x16d   :  { %1885 = vmatprep.subr.bf16.mxu0 %v1134_v38  ;;  %2213 = vmatprep.subr.bf16.mxu1 %v1136_v39  ;;  %v1206_v38 = vunpack.c.h.s8.bf16 %v398_v26  ;;  %v1208_v39 = vunpack.c.h.s8.bf16 %v400_v27  ;;  %v429_v26 = vld [vmem:[#allocation6 + $0xa00] sm:$0xff]  ;;  %v431_v27 = vld [vmem:[#allocation6 + $0xa10] sm:$0xff] }
 0x16f   :  { %1877 = vmatmul.mubr.bf16.vlgmr.msra.gmra.mrb[0].mxu0 %v3990_v44  ;;  %2205 = vmatmul.mubr.bf16.vlgmr.msra.gmra.mrb[0].mxu1 %v3990_v44 }
 0x170   :  { %1886 = vmatpush1.bf16.msra.mxu0 %v1133_v46  ;;  %2214 = vmatpush1.bf16.msra.mxu1 %v1135_v47  ;;  %v1205_v46 = vunpack.c.h.s8.bf16 %v397_v33  ;;  %v1207_v47 = vunpack.c.h.s8.bf16 %v399_v34  ;;  %v1270_v33 = vunpack.c.h.s8.bf16 %v430_v20  ;;  %v1272_v34 = vunpack.c.h.s8.bf16 %v432_v21 }
 0x171   :  { %1887 = vmatprep.subr.bf16.mxu0 %v1142_v48  ;;  %2215 = vmatprep.subr.bf16.mxu1 %v1144_v49  ;;  %v1214_v48 = vunpack.c.l.s8.bf16 %v406_v40  ;;  %v1216_v49 = vunpack.c.l.s8.bf16 %v408_v41 }
 0x172   :  { %1917 = vmatprep.mubr.bf16.mxu0 %v3996_v52  ;;  %2245 = vmatprep.mubr.bf16.mxu1 %v3996_v52 }
 0x174   :  { %1888 = vmatpush1.bf16.msra.mxu0 %v1141_v61  ;;  %2216 = vmatpush1.bf16.msra.mxu1 %v1143_v53  ;;  %v1213_v61 = vunpack.c.l.s8.bf16 %v405_v30  ;;  %v1215_v53 = vunpack.c.l.s8.bf16 %v407_v51 }
 0x175   :  { %1889 = vmatprep.subr.bf16.mxu0 %v1150_v54  ;;  %2217 = vmatprep.subr.bf16.mxu1 %v1152_v55  ;;  %v1222_v54 = vunpack.c.h.s8.bf16 %v406_v40  ;;  %v1224_v55 = vunpack.c.h.s8.bf16 %v408_v41 }
 0x178   :  { %1890 = vmatpush1.bf16.msra.mxu0 %v1149_v58  ;;  %2218 = vmatpush1.bf16.msra.mxu1 %v1151_v59  ;;  %v1221_v58 = vunpack.c.h.s8.bf16 %v405_v30  ;;  %v1223_v59 = vunpack.c.h.s8.bf16 %v407_v51 }
 0x179   :  { %1891 = vmatprep.subr.bf16.mxu0 %v1158_v62  ;;  %2219 = vmatprep.subr.bf16.mxu1 %v1160_v63  ;;  %v1230_v62 = vunpack.c.l.s8.bf16 %v414_v56  ;;  %v1232_v63 = vunpack.c.l.s8.bf16 %v416_v57 }
 0x17c   :  { %1892 = vmatpush1.bf16.msra.mxu0 %v1157_v2  ;;  %2220 = vmatpush1.bf16.msra.mxu1 %v1159_v3  ;;  %v1229_v2 = vunpack.c.l.s8.bf16 %v413_v0  ;;  %v1231_v3 = vunpack.c.l.s8.bf16 %v415_v1 }
 0x17d   :  { %1893 = vmatprep.subr.bf16.mxu0 %v1166_v17  ;;  %2221 = vmatprep.subr.bf16.mxu1 %v1168_v5  ;;  %v1238_v17 = vunpack.c.h.s8.bf16 %v414_v56  ;;  %v1240_v5 = vunpack.c.h.s8.bf16 %v416_v57 }
 0x180   :  { %1894 = vmatpush1.bf16.msra.mxu0 %v1165_v8  ;;  %2222 = vmatpush1.bf16.msra.mxu1 %v1167_v9  ;;  %v1237_v8 = vunpack.c.h.s8.bf16 %v413_v0  ;;  %v1239_v9 = vunpack.c.h.s8.bf16 %v415_v1 }
 0x181   :  { %1895 = vmatprep.subr.bf16.mxu0 %v1174_v10  ;;  %2223 = vmatprep.subr.bf16.mxu1 %v1176_v11  ;;  %v1246_v10 = vunpack.c.l.s8.bf16 %v422_v6  ;;  %v1248_v11 = vunpack.c.l.s8.bf16 %v424_v7 }
 0x184   :  { %1896 = vmatpush1.bf16.msra.mxu0 %v1173_v14  ;;  %2224 = vmatpush1.bf16.msra.mxu1 %v1175_v15  ;;  %v1245_v14 = vunpack.c.l.s8.bf16 %v421_v12  ;;  %v1247_v15 = vunpack.c.l.s8.bf16 %v423_v13 }
 0x185   :  { %1897 = vmatprep.subr.bf16.mxu0 %v1182_v18  ;;  %2225 = vmatprep.subr.bf16.mxu1 %v1184_v19  ;;  %v1254_v18 = vunpack.c.h.s8.bf16 %v422_v6  ;;  %v1256_v19 = vunpack.c.h.s8.bf16 %v424_v7 }
 0x188   :  { %1898 = vmatpush1.bf16.msra.mxu0 %v1181_v22  ;;  %2226 = vmatpush1.bf16.msra.mxu1 %v1183_v23  ;;  %v1253_v22 = vunpack.c.h.s8.bf16 %v421_v12  ;;  %v1255_v23 = vunpack.c.h.s8.bf16 %v423_v13 }
 0x189   :  { %1899 = vmatprep.subr.bf16.mxu0 %v1190_v43  ;;  %2227 = vmatprep.subr.bf16.mxu1 %v1192_v25  ;;  %v1262_v43 = vunpack.c.l.s8.bf16 %v430_v20  ;;  %v1264_v25 = vunpack.c.l.s8.bf16 %v432_v21 }
 0x18c   :  { %1900 = vmatpush1.bf16.msra.mxu0 %v1189_v28  ;;  %2228 = vmatpush1.bf16.msra.mxu1 %v1191_v29  ;;  %v4004_v28 = vcombine.low %v3992_v45, %v3992_v45  ;;  %v4006_v29 = vld [vmem:[#allocation3 + $0x28] sm:$0xff]  ;;  %v1269_v45 = vunpack.c.h.s8.bf16 %v429_v26 }
 0x18d   :  { %1901 = vmatprep.subr.bf16.mxu0 %v1198_v31  ;;  %2229 = vmatprep.subr.bf16.mxu1 %v1200_v32  ;;  %v1261_v31 = vunpack.c.l.s8.bf16 %v429_v26  ;;  %v1263_v32 = vunpack.c.l.s8.bf16 %v431_v27 }
 0x190   :  { %1902 = vmatpush1.bf16.msra.mxu0 %v1197_v36  ;;  %2230 = vmatpush1.bf16.msra.mxu1 %v1199_v37  ;;  %v438_v36 = vld [vmem:[#allocation6 + $0xa48] sm:$0xff]  ;;  %v440_v37 = vld [vmem:[#allocation6 + $0xa58] sm:$0xff] }
 0x191   :  { %1903 = vmatprep.subr.bf16.mxu0 %v1206_v38  ;;  %2231 = vmatprep.subr.bf16.mxu1 %v1208_v39  ;;  %v4010_v38 = vcombine.high %v4006_v29, %v4006_v29  ;;  %v1271_v39 = vunpack.c.h.s8.bf16 %v431_v27  ;;  %v1278_v40 = vunpack.c.l.s8.bf16 %v438_v36  ;;  %v1280_v41 = vunpack.c.l.s8.bf16 %v440_v37 }
 0x192   :  { %v1286_v30 = vunpack.c.h.s8.bf16 %v438_v36  ;;  %v1288_v51 = vunpack.c.h.s8.bf16 %v440_v37 }
 0x194   :  { %1904 = vmatpush1.bf16.msra.mxu0 %v1205_v46  ;;  %2232 = vmatpush1.bf16.msra.mxu1 %v1207_v47  ;;  %v437_v46 = vld [vmem:[#allocation6 + $0xa40] sm:$0xff]  ;;  %v439_v47 = vld [vmem:[#allocation6 + $0xa50] sm:$0xff] }
 0x195   :  { %1905 = vmatprep.subr.bf16.mxu0 %v1214_v48  ;;  %2233 = vmatprep.subr.bf16.mxu1 %v1216_v49  ;;  %v1277_v48 = vunpack.c.l.s8.bf16 %v437_v46  ;;  %v1279_v49 = vunpack.c.l.s8.bf16 %v439_v47 }
 0x198   :  { %1906 = vmatpush1.bf16.msra.mxu0 %v1213_v61  ;;  %2234 = vmatpush1.bf16.msra.mxu1 %v1215_v53  ;;  %v446_v61 = vld [vmem:[#allocation6 + $0xa88] sm:$0xff]  ;;  %v448_v53 = vld [vmem:[#allocation6 + $0xa98] sm:$0xff] }
 0x199   :  { %1907 = vmatprep.subr.bf16.mxu0 %v1222_v54  ;;  %2235 = vmatprep.subr.bf16.mxu1 %v1224_v55  ;;  %v1285_v54 = vunpack.c.h.s8.bf16 %v437_v46  ;;  %v1287_v55 = vunpack.c.h.s8.bf16 %v439_v47  ;;  %v1294_v56 = vunpack.c.l.s8.bf16 %v446_v61  ;;  %v1296_v57 = vunpack.c.l.s8.bf16 %v448_v53 }
 0x19a   :  { %v1302_v0 = vunpack.c.h.s8.bf16 %v446_v61  ;;  %v1304_v1 = vunpack.c.h.s8.bf16 %v448_v53 }
 0x19c   :  { %1908 = vmatpush1.bf16.msra.mxu0 %v1221_v58  ;;  %2236 = vmatpush1.bf16.msra.mxu1 %v1223_v59  ;;  %v445_v58 = vld [vmem:[#allocation6 + $0xa80] sm:$0xff]  ;;  %v447_v59 = vld [vmem:[#allocation6 + $0xa90] sm:$0xff] }
 0x19d   :  { %1909 = vmatprep.subr.bf16.mxu0 %v1230_v62  ;;  %2237 = vmatprep.subr.bf16.mxu1 %v1232_v63  ;;  %v1293_v62 = vunpack.c.l.s8.bf16 %v445_v58  ;;  %v1295_v63 = vunpack.c.l.s8.bf16 %v447_v59 }
 0x1a0   :  { %1910 = vmatpush1.bf16.msra.mxu0 %v1229_v2  ;;  %2238 = vmatpush1.bf16.msra.mxu1 %v1231_v3  ;;  %v454_v2 = vld [vmem:[#allocation6 + $0xac8] sm:$0xff]  ;;  %v456_v3 = vld [vmem:[#allocation6 + $0xad8] sm:$0xff] }
 0x1a1   :  { %1911 = vmatprep.subr.bf16.mxu0 %v1238_v17  ;;  %2239 = vmatprep.subr.bf16.mxu1 %v1240_v5  ;;  %v1301_v17 = vunpack.c.h.s8.bf16 %v445_v58  ;;  %v1303_v5 = vunpack.c.h.s8.bf16 %v447_v59  ;;  %v1310_v6 = vunpack.c.l.s8.bf16 %v454_v2  ;;  %v1312_v7 = vunpack.c.l.s8.bf16 %v456_v3 }
 0x1a2   :  { %v1318_v12 = vunpack.c.h.s8.bf16 %v454_v2  ;;  %v1320_v13 = vunpack.c.h.s8.bf16 %v456_v3 }
 0x1a4   :  { %1912 = vmatpush1.bf16.msra.mxu0 %v1237_v8  ;;  %2240 = vmatpush1.bf16.msra.mxu1 %v1239_v9  ;;  %v453_v8 = vld [vmem:[#allocation6 + $0xac0] sm:$0xff]  ;;  %v455_v9 = vld [vmem:[#allocation6 + $0xad0] sm:$0xff] }
 0x1a5   :  { %1913 = vmatprep.subr.bf16.mxu0 %v1246_v10  ;;  %2241 = vmatprep.subr.bf16.mxu1 %v1248_v11  ;;  %v1309_v10 = vunpack.c.l.s8.bf16 %v453_v8  ;;  %v1311_v11 = vunpack.c.l.s8.bf16 %v455_v9 }
 0x1a8   :  { %1914 = vmatpush1.bf16.msra.mxu0 %v1245_v14  ;;  %2242 = vmatpush1.bf16.msra.mxu1 %v1247_v15  ;;  %v462_v14 = vld [vmem:[#allocation6 + $0xb08] sm:$0xff]  ;;  %v464_v15 = vld [vmem:[#allocation6 + $0xb18] sm:$0xff] }
 0x1a9   :  { %1915 = vmatprep.subr.bf16.mxu0 %v1254_v18  ;;  %2243 = vmatprep.subr.bf16.mxu1 %v1256_v19  ;;  %v1317_v18 = vunpack.c.h.s8.bf16 %v453_v8  ;;  %v1319_v19 = vunpack.c.h.s8.bf16 %v455_v9  ;;  %v1326_v20 = vunpack.c.l.s8.bf16 %v462_v14  ;;  %v1328_v21 = vunpack.c.l.s8.bf16 %v464_v15 }
 0x1aa   :  { %v1334_v26 = vunpack.c.h.s8.bf16 %v462_v14  ;;  %v1336_v27 = vunpack.c.h.s8.bf16 %v464_v15 }
 0x1ac   :  { %1916 = vmatpush1.bf16.msra.mxu0 %v1253_v22  ;;  %2244 = vmatpush1.bf16.msra.mxu1 %v1255_v23  ;;  %v461_v22 = vld [vmem:[#allocation6 + $0xb00] sm:$0xff]  ;;  %v463_v23 = vld [vmem:[#allocation6 + $0xb10] sm:$0xff] }
 0x1ad   :  { %1926 = vmatprep.subr.bf16.mxu0 %v1262_v43  ;;  %2254 = vmatprep.subr.bf16.mxu1 %v1264_v25  ;;  %v1325_v43 = vunpack.c.l.s8.bf16 %v461_v22  ;;  %v1327_v25 = vunpack.c.l.s8.bf16 %v463_v23 }
 0x1af   :  { %1918 = vmatmul.mubr.bf16.vlgmr.msra.gmra.mrb[0].mxu0 %v4004_v28  ;;  %2246 = vmatmul.mubr.bf16.vlgmr.msra.gmra.mrb[0].mxu1 %v4004_v28 }
 0x1b0   :  { %1927 = vmatpush1.bf16.msra.mxu0 %v1261_v31  ;;  %2255 = vmatpush1.bf16.msra.mxu1 %v1263_v32  ;;  %v470_v31 = vld [vmem:[#allocation6 + $0xb48] sm:$0xff]  ;;  %v472_v32 = vld [vmem:[#allocation6 + $0xb58] sm:$0xff] }
 0x1b1   :  { %1928 = vmatprep.subr.bf16.mxu0 %v1270_v33  ;;  %2256 = vmatprep.subr.bf16.mxu1 %v1272_v34  ;;  %v1333_v33 = vunpack.c.h.s8.bf16 %v461_v22  ;;  %v1335_v34 = vunpack.c.h.s8.bf16 %v463_v23  ;;  %v1342_v36 = vunpack.c.l.s8.bf16 %v470_v31  ;;  %v1344_v37 = vunpack.c.l.s8.bf16 %v472_v32 }
 0x1b2   :  { %1958 = vmatprep.mubr.bf16.mxu0 %v4010_v38  ;;  %2286 = vmatprep.mubr.bf16.mxu1 %v4010_v38  ;;  %v1350_v46 = vunpack.c.h.s8.bf16 %v470_v31  ;;  %v1352_v47 = vunpack.c.h.s8.bf16 %v472_v32 }
 0x1b4   :  { %1929 = vmatpush1.bf16.msra.mxu0 %v1269_v45  ;;  %2257 = vmatpush1.bf16.msra.mxu1 %v1271_v39  ;;  %v469_v45 = vld [vmem:[#allocation6 + $0xb40] sm:$0xff]  ;;  %v471_v39 = vld [vmem:[#allocation6 + $0xb50] sm:$0xff] }
 0x1b5   :  { %1930 = vmatprep.subr.bf16.mxu0 %v1278_v40  ;;  %2258 = vmatprep.subr.bf16.mxu1 %v1280_v41  ;;  %v1341_v40 = vunpack.c.l.s8.bf16 %v469_v45  ;;  %v1343_v41 = vunpack.c.l.s8.bf16 %v471_v39 }
 0x1b8   :  { %1931 = vmatpush1.bf16.msra.mxu0 %v1277_v48  ;;  %2259 = vmatpush1.bf16.msra.mxu1 %v1279_v49  ;;  %v478_v48 = vld [vmem:[#allocation6 + $0xb88] sm:$0xff]  ;;  %v480_v49 = vld [vmem:[#allocation6 + $0xb98] sm:$0xff] }
 0x1b9   :  { %1932 = vmatprep.subr.bf16.mxu0 %v1286_v30  ;;  %2260 = vmatprep.subr.bf16.mxu1 %v1288_v51  ;;  %v1349_v30 = vunpack.c.h.s8.bf16 %v469_v45  ;;  %v1351_v51 = vunpack.c.h.s8.bf16 %v471_v39  ;;  %v1358_v61 = vunpack.c.l.s8.bf16 %v478_v48  ;;  %v1360_v53 = vunpack.c.l.s8.bf16 %v480_v49 }
 0x1ba   :  { %v1366_v58 = vunpack.c.h.s8.bf16 %v478_v48  ;;  %v1368_v59 = vunpack.c.h.s8.bf16 %v480_v49 }
 0x1bc   :  { %1933 = vmatpush1.bf16.msra.mxu0 %v1285_v54  ;;  %2261 = vmatpush1.bf16.msra.mxu1 %v1287_v55  ;;  %v477_v54 = vld [vmem:[#allocation6 + $0xb80] sm:$0xff]  ;;  %v479_v55 = vld [vmem:[#allocation6 + $0xb90] sm:$0xff] }
 0x1bd   :  { %1934 = vmatprep.subr.bf16.mxu0 %v1294_v56  ;;  %2262 = vmatprep.subr.bf16.mxu1 %v1296_v57  ;;  %v1357_v56 = vunpack.c.l.s8.bf16 %v477_v54  ;;  %v1359_v57 = vunpack.c.l.s8.bf16 %v479_v55 }
 0x1c0   :  { %1935 = vmatpush1.bf16.msra.mxu0 %v1293_v62  ;;  %2263 = vmatpush1.bf16.msra.mxu1 %v1295_v63  ;;  %v486_v62 = vld [vmem:[#allocation6 + $0xbc8] sm:$0xff]  ;;  %v488_v63 = vld [vmem:[#allocation6 + $0xbd8] sm:$0xff] }
 0x1c1   :  { %1936 = vmatprep.subr.bf16.mxu0 %v1302_v0  ;;  %2264 = vmatprep.subr.bf16.mxu1 %v1304_v1  ;;  %v1365_v0 = vunpack.c.h.s8.bf16 %v477_v54  ;;  %v1367_v1 = vunpack.c.h.s8.bf16 %v479_v55  ;;  %v1374_v2 = vunpack.c.l.s8.bf16 %v486_v62  ;;  %v1376_v3 = vunpack.c.l.s8.bf16 %v488_v63 }
 0x1c2   :  { %v1382_v8 = vunpack.c.h.s8.bf16 %v486_v62  ;;  %v1384_v9 = vunpack.c.h.s8.bf16 %v488_v63 }
 0x1c4   :  { %1937 = vmatpush1.bf16.msra.mxu0 %v1301_v17  ;;  %2265 = vmatpush1.bf16.msra.mxu1 %v1303_v5  ;;  %v485_v17 = vld [vmem:[#allocation6 + $0xbc0] sm:$0xff]  ;;  %v487_v5 = vld [vmem:[#allocation6 + $0xbd0] sm:$0xff] }
 0x1c5   :  { %1938 = vmatprep.subr.bf16.mxu0 %v1310_v6  ;;  %2266 = vmatprep.subr.bf16.mxu1 %v1312_v7  ;;  %v1373_v6 = vunpack.c.l.s8.bf16 %v485_v17  ;;  %v1375_v7 = vunpack.c.l.s8.bf16 %v487_v5 }
 0x1c8   :  { %1939 = vmatpush1.bf16.msra.mxu0 %v1309_v10  ;;  %2267 = vmatpush1.bf16.msra.mxu1 %v1311_v11  ;;  %v494_v10 = vld [vmem:[#allocation6 + $0xc08] sm:$0xff]  ;;  %v496_v11 = vld [vmem:[#allocation6 + $0xc18] sm:$0xff] }
 0x1c9   :  { %1940 = vmatprep.subr.bf16.mxu0 %v1318_v12  ;;  %2268 = vmatprep.subr.bf16.mxu1 %v1320_v13  ;;  %v1381_v12 = vunpack.c.h.s8.bf16 %v485_v17  ;;  %v1383_v13 = vunpack.c.h.s8.bf16 %v487_v5  ;;  %v1390_v14 = vunpack.c.l.s8.bf16 %v494_v10  ;;  %v1392_v15 = vunpack.c.l.s8.bf16 %v496_v11 }
 0x1cc   :  { %1941 = vmatpush1.bf16.msra.mxu0 %v1317_v18  ;;  %2269 = vmatpush1.bf16.msra.mxu1 %v1319_v19  ;;  %v493_v18 = vld [vmem:[#allocation6 + $0xc00] sm:$0xff]  ;;  %v495_v19 = vld [vmem:[#allocation6 + $0xc10] sm:$0xff] }
 0x1cd   :  { %1942 = vmatprep.subr.bf16.mxu0 %v1326_v20  ;;  %2270 = vmatprep.subr.bf16.mxu1 %v1328_v21  ;;  %v4018_v20 = vcombine.low %v4006_v29, %v4006_v29  ;;  %v4020_v21 = vld [vmem:[#allocation3 + $0x30] sm:$0xff]  ;;  %v1389_v22 = vunpack.c.l.s8.bf16 %v493_v18  ;;  %v1391_v23 = vunpack.c.l.s8.bf16 %v495_v19  ;;  %v1397_v29 = vunpack.c.h.s8.bf16 %v493_v18 }
 0x1ce   :  { %v4024_v31 = vcombine.high %v4020_v21, %v4020_v21  ;;  %v1399_v32 = vunpack.c.h.s8.bf16 %v495_v19 }
 0x1d0   :  { %1943 = vmatpush1.bf16.msra.mxu0 %v1325_v43  ;;  %2271 = vmatpush1.bf16.msra.mxu1 %v1327_v25  ;;  %v1398_v43 = vunpack.c.h.s8.bf16 %v494_v10  ;;  %v1400_v25 = vunpack.c.h.s8.bf16 %v496_v11 }
 0x1d1   :  { %1944 = vmatprep.subr.bf16.mxu0 %v1334_v26  ;;  %2272 = vmatprep.subr.bf16.mxu1 %v1336_v27  ;;  %v502_v26 = vld [vmem:[#allocation6 + $0xc48] sm:$0xff]  ;;  %v504_v27 = vld [vmem:[#allocation6 + $0xc58] sm:$0xff] }
 0x1d4   :  { %1945 = vmatpush1.bf16.msra.mxu0 %v1333_v33  ;;  %2273 = vmatpush1.bf16.msra.mxu1 %v1335_v34  ;;  %v1406_v33 = vunpack.c.l.s8.bf16 %v502_v26  ;;  %v1408_v34 = vunpack.c.l.s8.bf16 %v504_v27 }
 0x1d5   :  { %1946 = vmatprep.subr.bf16.mxu0 %v1342_v36  ;;  %2274 = vmatprep.subr.bf16.mxu1 %v1344_v37  ;;  %v501_v36 = vld [vmem:[#allocation6 + $0xc40] sm:$0xff]  ;;  %v503_v37 = vld [vmem:[#allocation6 + $0xc50] sm:$0xff] }
 0x1d6   :  { %v1405_v45 = vunpack.c.l.s8.bf16 %v501_v36  ;;  %v1407_v39 = vunpack.c.l.s8.bf16 %v503_v37  ;;  %v1413_v48 = vunpack.c.h.s8.bf16 %v501_v36  ;;  %v1415_v49 = vunpack.c.h.s8.bf16 %v503_v37 }
 0x1d8   :  { %1947 = vmatpush1.bf16.msra.mxu0 %v1341_v40  ;;  %2275 = vmatpush1.bf16.msra.mxu1 %v1343_v41  ;;  %v1414_v40 = vunpack.c.h.s8.bf16 %v502_v26  ;;  %v1416_v41 = vunpack.c.h.s8.bf16 %v504_v27 }
 0x1d9   :  { %1948 = vmatprep.subr.bf16.mxu0 %v1350_v46  ;;  %2276 = vmatprep.subr.bf16.mxu1 %v1352_v47  ;;  %v510_v46 = vld [vmem:[#allocation6 + $0xc88] sm:$0xff]  ;;  %v512_v47 = vld [vmem:[#allocation6 + $0xc98] sm:$0xff] }
 0x1dc   :  { %1949 = vmatpush1.bf16.msra.mxu0 %v1349_v30  ;;  %2277 = vmatpush1.bf16.msra.mxu1 %v1351_v51  ;;  %v1422_v30 = vunpack.c.l.s8.bf16 %v510_v46  ;;  %v1424_v51 = vunpack.c.l.s8.bf16 %v512_v47 }
 0x1dd   :  { %1950 = vmatprep.subr.bf16.mxu0 %v1358_v61  ;;  %2278 = vmatprep.subr.bf16.mxu1 %v1360_v53  ;;  %v509_v61 = vld [vmem:[#allocation6 + $0xc80] sm:$0xff]  ;;  %v511_v53 = vld [vmem:[#allocation6 + $0xc90] sm:$0xff] }
 0x1de   :  { %v1421_v54 = vunpack.c.l.s8.bf16 %v509_v61  ;;  %v1423_v55 = vunpack.c.l.s8.bf16 %v511_v53  ;;  %v1429_v62 = vunpack.c.h.s8.bf16 %v509_v61  ;;  %v1431_v63 = vunpack.c.h.s8.bf16 %v511_v53 }
 0x1e0   :  { %1951 = vmatpush1.bf16.msra.mxu0 %v1357_v56  ;;  %2279 = vmatpush1.bf16.msra.mxu1 %v1359_v57  ;;  %v1430_v56 = vunpack.c.h.s8.bf16 %v510_v46  ;;  %v1432_v57 = vunpack.c.h.s8.bf16 %v512_v47 }
 0x1e1   :  { %1952 = vmatprep.subr.bf16.mxu0 %v1366_v58  ;;  %2280 = vmatprep.subr.bf16.mxu1 %v1368_v59  ;;  %v518_v58 = vld [vmem:[#allocation6 + $0xcc8] sm:$0xff]  ;;  %v520_v59 = vld [vmem:[#allocation6 + $0xcd8] sm:$0xff] }
 0x1e4   :  { %1953 = vmatpush1.bf16.msra.mxu0 %v1365_v0  ;;  %2281 = vmatpush1.bf16.msra.mxu1 %v1367_v1  ;;  %v1438_v0 = vunpack.c.l.s8.bf16 %v518_v58  ;;  %v1440_v1 = vunpack.c.l.s8.bf16 %v520_v59 }
 0x1e5   :  { %1954 = vmatprep.subr.bf16.mxu0 %v1374_v2  ;;  %2282 = vmatprep.subr.bf16.mxu1 %v1376_v3  ;;  %v517_v2 = vld [vmem:[#allocation6 + $0xcc0] sm:$0xff]  ;;  %v519_v3 = vld [vmem:[#allocation6 + $0xcd0] sm:$0xff] }
 0x1e6   :  { %v1437_v17 = vunpack.c.l.s8.bf16 %v517_v2  ;;  %v1439_v5 = vunpack.c.l.s8.bf16 %v519_v3  ;;  %v1445_v10 = vunpack.c.h.s8.bf16 %v517_v2  ;;  %v1447_v11 = vunpack.c.h.s8.bf16 %v519_v3 }
 0x1e8   :  { %1955 = vmatpush1.bf16.msra.mxu0 %v1373_v6  ;;  %2283 = vmatpush1.bf16.msra.mxu1 %v1375_v7  ;;  %v1446_v6 = vunpack.c.h.s8.bf16 %v518_v58  ;;  %v1448_v7 = vunpack.c.h.s8.bf16 %v520_v59 }
 0x1e9   :  { %1956 = vmatprep.subr.bf16.mxu0 %v1382_v8  ;;  %2284 = vmatprep.subr.bf16.mxu1 %v1384_v9  ;;  %v526_v8 = vld [vmem:[#allocation6 + $0xd08] sm:$0xff]  ;;  %v528_v9 = vld [vmem:[#allocation6 + $0xd18] sm:$0xff] }
 0x1ec   :  { %1957 = vmatpush1.bf16.msra.mxu0 %v1381_v12  ;;  %2285 = vmatpush1.bf16.msra.mxu1 %v1383_v13  ;;  %v1454_v12 = vunpack.c.l.s8.bf16 %v526_v8  ;;  %v1456_v13 = vunpack.c.l.s8.bf16 %v528_v9 }
 0x1ed   :  { %1967 = vmatprep.subr.bf16.mxu0 %v1390_v14  ;;  %2295 = vmatprep.subr.bf16.mxu1 %v1392_v15  ;;  %v525_v14 = vld [vmem:[#allocation6 + $0xd00] sm:$0xff]  ;;  %v527_v15 = vld [vmem:[#allocation6 + $0xd10] sm:$0xff] }
 0x1ee   :  { %v1453_v18 = vunpack.c.l.s8.bf16 %v525_v14  ;;  %v1455_v19 = vunpack.c.l.s8.bf16 %v527_v15  ;;  %v1461_v26 = vunpack.c.h.s8.bf16 %v525_v14  ;;  %v1463_v27 = vunpack.c.h.s8.bf16 %v527_v15  ;;  %v4034_v15 = vld [vmem:[#allocation3 + $0x38] sm:$0xff] }
 0x1ef   :  { %1959 = vmatmul.mubr.bf16.vlgmr.msra.gmra.mrb[0].mxu0 %v4018_v20  ;;  %2287 = vmatmul.mubr.bf16.vlgmr.msra.gmra.mrb[0].mxu1 %v4018_v20  ;;  %v4032_v14 = vcombine.low %v4020_v21, %v4020_v21 }
 0x1f0   :  { %1968 = vmatpush1.bf16.msra.mxu0 %v1389_v22  ;;  %2296 = vmatpush1.bf16.msra.mxu1 %v1391_v23  ;;  %v1462_v22 = vunpack.c.h.s8.bf16 %v526_v8  ;;  %v1464_v23 = vunpack.c.h.s8.bf16 %v528_v9 }
 0x1f1   :  { %1969 = vmatprep.subr.bf16.mxu0 %v1398_v43  ;;  %2297 = vmatprep.subr.bf16.mxu1 %v1400_v25  ;;  %v534_v43 = vld [vmem:[#allocation6 + $0xd48] sm:$0xff]  ;;  %v536_v25 = vld [vmem:[#allocation6 + $0xd58] sm:$0xff] }
 0x1f2   :  { %1999 = vmatprep.mubr.bf16.mxu0 %v4024_v31  ;;  %2327 = vmatprep.mubr.bf16.mxu1 %v4024_v31 }
 0x1f4   :  { %1970 = vmatpush1.bf16.msra.mxu0 %v1397_v29  ;;  %2298 = vmatpush1.bf16.msra.mxu1 %v1399_v32  ;;  %v1470_v29 = vunpack.c.l.s8.bf16 %v534_v43  ;;  %v1472_v32 = vunpack.c.l.s8.bf16 %v536_v25 }
 0x1f5   :  { %1971 = vmatprep.subr.bf16.mxu0 %v1406_v33  ;;  %2299 = vmatprep.subr.bf16.mxu1 %v1408_v34  ;;  %v533_v33 = vld [vmem:[#allocation6 + $0xd40] sm:$0xff]  ;;  %v535_v34 = vld [vmem:[#allocation6 + $0xd50] sm:$0xff] }
 0x1f6   :  { %v1469_v36 = vunpack.c.l.s8.bf16 %v533_v33  ;;  %v1471_v37 = vunpack.c.l.s8.bf16 %v535_v34  ;;  %v1477_v46 = vunpack.c.h.s8.bf16 %v533_v33  ;;  %v1479_v47 = vunpack.c.h.s8.bf16 %v535_v34  ;;  %v565_v33 = vld [vmem:[#allocation6 + $0xe40] sm:$0xff]  ;;  %v567_v34 = vld [vmem:[#allocation6 + $0xe50] sm:$0xff] }
 0x1f8   :  { %1972 = vmatpush1.bf16.msra.mxu0 %v1405_v45  ;;  %2300 = vmatpush1.bf16.msra.mxu1 %v1407_v39  ;;  %v1478_v45 = vunpack.c.h.s8.bf16 %v534_v43  ;;  %v1480_v39 = vunpack.c.h.s8.bf16 %v536_v25  ;;  %v566_v43 = vld [vmem:[#allocation6 + $0xe48] sm:$0xff]  ;;  %v568_v25 = vld [vmem:[#allocation6 + $0xe58] sm:$0xff] }
 0x1f9   :  { %1973 = vmatprep.subr.bf16.mxu0 %v1414_v40  ;;  %2301 = vmatprep.subr.bf16.mxu1 %v1416_v41  ;;  %v542_v40 = vld [vmem:[#allocation6 + $0xd88] sm:$0xff]  ;;  %v544_v41 = vld [vmem:[#allocation6 + $0xd98] sm:$0xff] }
 0x1fc   :  { %1974 = vmatpush1.bf16.msra.mxu0 %v1413_v48  ;;  %2302 = vmatpush1.bf16.msra.mxu1 %v1415_v49  ;;  %v1486_v48 = vunpack.c.l.s8.bf16 %v542_v40  ;;  %v1488_v49 = vunpack.c.l.s8.bf16 %v544_v41 }
 0x1fd   :  { %1975 = vmatprep.subr.bf16.mxu0 %v1422_v30  ;;  %2303 = vmatprep.subr.bf16.mxu1 %v1424_v51  ;;  %v541_v30 = vld [vmem:[#allocation6 + $0xd80] sm:$0xff]  ;;  %v543_v51 = vld [vmem:[#allocation6 + $0xd90] sm:$0xff] }
 0x1fe   :  { %v1485_v61 = vunpack.c.l.s8.bf16 %v541_v30  ;;  %v1487_v53 = vunpack.c.l.s8.bf16 %v543_v51  ;;  %v1493_v58 = vunpack.c.h.s8.bf16 %v541_v30  ;;  %v1495_v59 = vunpack.c.h.s8.bf16 %v543_v51  ;;  %v573_v30 = vld [vmem:[#allocation6 + $0xe80] sm:$0xff]  ;;  %v575_v51 = vld [vmem:[#allocation6 + $0xe90] sm:$0xff] }
 0x200   :  { %1976 = vmatpush1.bf16.msra.mxu0 %v1421_v54  ;;  %2304 = vmatpush1.bf16.msra.mxu1 %v1423_v55  ;;  %v1494_v54 = vunpack.c.h.s8.bf16 %v542_v40  ;;  %v1496_v55 = vunpack.c.h.s8.bf16 %v544_v41  ;;  %v574_v40 = vld [vmem:[#allocation6 + $0xe88] sm:$0xff]  ;;  %v576_v41 = vld [vmem:[#allocation6 + $0xe98] sm:$0xff] }
 0x201   :  { %1977 = vmatprep.subr.bf16.mxu0 %v1430_v56  ;;  %2305 = vmatprep.subr.bf16.mxu1 %v1432_v57  ;;  %v550_v56 = vld [vmem:[#allocation6 + $0xdc8] sm:$0xff]  ;;  %v552_v57 = vld [vmem:[#allocation6 + $0xdd8] sm:$0xff] }
 0x204   :  { %1978 = vmatpush1.bf16.msra.mxu0 %v1429_v62  ;;  %2306 = vmatpush1.bf16.msra.mxu1 %v1431_v63  ;;  %v1502_v62 = vunpack.c.l.s8.bf16 %v550_v56  ;;  %v1504_v63 = vunpack.c.l.s8.bf16 %v552_v57 }
 0x205   :  { %1979 = vmatprep.subr.bf16.mxu0 %v1438_v0  ;;  %2307 = vmatprep.subr.bf16.mxu1 %v1440_v1  ;;  %v549_v0 = vld [vmem:[#allocation6 + $0xdc0] sm:$0xff]  ;;  %v551_v1 = vld [vmem:[#allocation6 + $0xdd0] sm:$0xff] }
 0x206   :  { %v1501_v2 = vunpack.c.l.s8.bf16 %v549_v0  ;;  %v1503_v3 = vunpack.c.l.s8.bf16 %v551_v1  ;;  %v1509_v8 = vunpack.c.h.s8.bf16 %v549_v0  ;;  %v1511_v9 = vunpack.c.h.s8.bf16 %v551_v1  ;;  %v581_v0 = vld [vmem:[#allocation6 + $0xec0] sm:$0xff]  ;;  %v583_v1 = vld [vmem:[#allocation6 + $0xed0] sm:$0xff] }
 0x208   :  { %1980 = vmatpush1.bf16.msra.mxu0 %v1437_v17  ;;  %2308 = vmatpush1.bf16.msra.mxu1 %v1439_v5  ;;  %v1510_v17 = vunpack.c.h.s8.bf16 %v550_v56  ;;  %v1512_v5 = vunpack.c.h.s8.bf16 %v552_v57  ;;  %v582_v56 = vld [vmem:[#allocation6 + $0xec8] sm:$0xff]  ;;  %v584_v57 = vld [vmem:[#allocation6 + $0xed8] sm:$0xff] }
 0x209   :  { %1981 = vmatprep.subr.bf16.mxu0 %v1446_v6  ;;  %2309 = vmatprep.subr.bf16.mxu1 %v1448_v7  ;;  %v558_v6 = vld [vmem:[#allocation6 + $0xe08] sm:$0xff]  ;;  %v560_v7 = vld [vmem:[#allocation6 + $0xe18] sm:$0xff] }
 0x20c   :  { %1982 = vmatpush1.bf16.msra.mxu0 %v1445_v10  ;;  %2310 = vmatpush1.bf16.msra.mxu1 %v1447_v11  ;;  %v1518_v10 = vunpack.c.l.s8.bf16 %v558_v6  ;;  %v1520_v11 = vunpack.c.l.s8.bf16 %v560_v7 }
 0x20d   :  { %1983 = vmatprep.subr.bf16.mxu0 %v1454_v12  ;;  %2311 = vmatprep.subr.bf16.mxu1 %v1456_v13  ;;  %v557_v12 = vld [vmem:[#allocation6 + $0xe00] sm:$0xff]  ;;  %v559_v13 = vld [vmem:[#allocation6 + $0xe10] sm:$0xff] }
 0x20e   :  { %v1525_v21 = vunpack.c.h.s8.bf16 %v557_v12 }
 0x210   :  { %1984 = vmatpush1.bf16.msra.mxu0 %v1453_v18  ;;  %2312 = vmatpush1.bf16.msra.mxu1 %v1455_v19  ;;  %v1517_v18 = vunpack.c.l.s8.bf16 %v557_v12  ;;  %v1519_v19 = vunpack.c.l.s8.bf16 %v559_v13  ;;  %v589_v12 = vld [vmem:[#allocation6 + $0xf00] sm:$0xff] }
 0x211   :  { %1985 = vmatprep.subr.bf16.mxu0 %v1462_v22  ;;  %2313 = vmatprep.subr.bf16.mxu1 %v1464_v23  ;;  %v1526_v22 = vunpack.c.h.s8.bf16 %v558_v6  ;;  %v1528_v23 = vunpack.c.h.s8.bf16 %v560_v7  ;;  %v590_v6 = vld [vmem:[#allocation6 + $0xf08] sm:$0xff]  ;;  %v592_v7 = vld [vmem:[#allocation6 + $0xf18] sm:$0xff] }
 0x214   :  { %1986 = vmatpush1.bf16.msra.mxu0 %v1461_v26  ;;  %2314 = vmatpush1.bf16.msra.mxu1 %v1463_v27  ;;  %v4038_v26 = vcombine.high %v4034_v15, %v4034_v15  ;;  %v1527_v27 = vunpack.c.h.s8.bf16 %v559_v13  ;;  %v591_v13 = vld [vmem:[#allocation6 + $0xf10] sm:$0xff] }
 0x215   :  { %1987 = vmatprep.subr.bf16.mxu0 %v1470_v29  ;;  %2315 = vmatprep.subr.bf16.mxu1 %v1472_v32  ;;  %v1534_v29 = vunpack.c.l.s8.bf16 %v566_v43  ;;  %v1536_v32 = vunpack.c.l.s8.bf16 %v568_v25 }
 0x218   :  { %1988 = vmatpush1.bf16.msra.mxu0 %v1469_v36  ;;  %2316 = vmatpush1.bf16.msra.mxu1 %v1471_v37  ;;  %v1533_v36 = vunpack.c.l.s8.bf16 %v565_v33  ;;  %v1535_v37 = vunpack.c.l.s8.bf16 %v567_v34 }
 0x219   :  { %1989 = vmatprep.subr.bf16.mxu0 %v1478_v45  ;;  %2317 = vmatprep.subr.bf16.mxu1 %v1480_v39  ;;  %v1542_v45 = vunpack.c.h.s8.bf16 %v566_v43  ;;  %v1544_v39 = vunpack.c.h.s8.bf16 %v568_v25  ;;  %v598_v43 = vld [vmem:[#allocation6 + $0xf48] sm:$0xff]  ;;  %v600_v25 = vld [vmem:[#allocation6 + $0xf58] sm:$0xff] }
 0x21c   :  { %1990 = vmatpush1.bf16.msra.mxu0 %v1477_v46  ;;  %2318 = vmatpush1.bf16.msra.mxu1 %v1479_v47  ;;  %v1541_v46 = vunpack.c.h.s8.bf16 %v565_v33  ;;  %v1543_v47 = vunpack.c.h.s8.bf16 %v567_v34  ;;  %v597_v33 = vld [vmem:[#allocation6 + $0xf40] sm:$0xff]  ;;  %v599_v34 = vld [vmem:[#allocation6 + $0xf50] sm:$0xff] }
 0x21d   :  { %1991 = vmatprep.subr.bf16.mxu0 %v1486_v48  ;;  %2319 = vmatprep.subr.bf16.mxu1 %v1488_v49  ;;  %v1550_v48 = vunpack.c.l.s8.bf16 %v574_v40  ;;  %v1552_v49 = vunpack.c.l.s8.bf16 %v576_v41 }
 0x220   :  { %1992 = vmatpush1.bf16.msra.mxu0 %v1485_v61  ;;  %2320 = vmatpush1.bf16.msra.mxu1 %v1487_v53  ;;  %v1549_v61 = vunpack.c.l.s8.bf16 %v573_v30  ;;  %v1551_v53 = vunpack.c.l.s8.bf16 %v575_v51 }
 0x221   :  { %1993 = vmatprep.subr.bf16.mxu0 %v1494_v54  ;;  %2321 = vmatprep.subr.bf16.mxu1 %v1496_v55  ;;  %v1558_v54 = vunpack.c.h.s8.bf16 %v574_v40  ;;  %v1560_v55 = vunpack.c.h.s8.bf16 %v576_v41  ;;  %v606_v40 = vld [vmem:[#allocation6 + $0xf88] sm:$0xff]  ;;  %v608_v41 = vld [vmem:[#allocation6 + $0xf98] sm:$0xff] }
 0x224   :  { %1994 = vmatpush1.bf16.msra.mxu0 %v1493_v58  ;;  %2322 = vmatpush1.bf16.msra.mxu1 %v1495_v59  ;;  %v1557_v58 = vunpack.c.h.s8.bf16 %v573_v30  ;;  %v1559_v59 = vunpack.c.h.s8.bf16 %v575_v51  ;;  %v605_v30 = vld [vmem:[#allocation6 + $0xf80] sm:$0xff]  ;;  %v607_v51 = vld [vmem:[#allocation6 + $0xf90] sm:$0xff] }
 0x225   :  { %1995 = vmatprep.subr.bf16.mxu0 %v1502_v62  ;;  %2323 = vmatprep.subr.bf16.mxu1 %v1504_v63  ;;  %v1566_v62 = vunpack.c.l.s8.bf16 %v582_v56  ;;  %v1568_v63 = vunpack.c.l.s8.bf16 %v584_v57 }
 0x228   :  { %1996 = vmatpush1.bf16.msra.mxu0 %v1501_v2  ;;  %2324 = vmatpush1.bf16.msra.mxu1 %v1503_v3  ;;  %v1565_v2 = vunpack.c.l.s8.bf16 %v581_v0  ;;  %v1567_v3 = vunpack.c.l.s8.bf16 %v583_v1 }
 0x229   :  { %1997 = vmatprep.subr.bf16.mxu0 %v1510_v17  ;;  %2325 = vmatprep.subr.bf16.mxu1 %v1512_v5  ;;  %v1574_v17 = vunpack.c.h.s8.bf16 %v582_v56  ;;  %v1576_v5 = vunpack.c.h.s8.bf16 %v584_v57  ;;  %v614_v56 = vld [vmem:[#allocation6 + $0xfc8] sm:$0xff]  ;;  %v616_v57 = vld [vmem:[#allocation6 + $0xfd8] sm:$0xff] }
 0x22c   :  { %1998 = vmatpush1.bf16.msra.mxu0 %v1509_v8  ;;  %2326 = vmatpush1.bf16.msra.mxu1 %v1511_v9  ;;  %v1573_v8 = vunpack.c.h.s8.bf16 %v581_v0  ;;  %v1575_v9 = vunpack.c.h.s8.bf16 %v583_v1  ;;  %v613_v0 = vld [vmem:[#allocation6 + $0xfc0] sm:$0xff]  ;;  %v615_v1 = vld [vmem:[#allocation6 + $0xfd0] sm:$0xff] }
 0x22d   :  { %2008 = vmatprep.subr.bf16.mxu0 %v1518_v10  ;;  %2336 = vmatprep.subr.bf16.mxu1 %v1520_v11  ;;  %v1582_v10 = vunpack.c.l.s8.bf16 %v590_v6  ;;  %v1584_v11 = vunpack.c.l.s8.bf16 %v592_v7 }
 0x22f   :  { %2000 = vmatmul.mubr.bf16.vlgmr.msra.gmra.mrb[0].mxu0 %v4032_v14  ;;  %2328 = vmatmul.mubr.bf16.vlgmr.msra.gmra.mrb[0].mxu1 %v4032_v14 }
 0x230   :  { %2009 = vmatpush1.bf16.msra.mxu0 %v1517_v18  ;;  %2337 = vmatpush1.bf16.msra.mxu1 %v1519_v19  ;;  %v1581_v18 = vunpack.c.l.s8.bf16 %v589_v12  ;;  %v1583_v19 = vunpack.c.l.s8.bf16 %v591_v13 }
 0x231   :  { %2010 = vmatprep.subr.bf16.mxu0 %v1526_v22  ;;  %2338 = vmatprep.subr.bf16.mxu1 %v1528_v23  ;;  %v1590_v22 = vunpack.c.h.s8.bf16 %v590_v6  ;;  %v1592_v23 = vunpack.c.h.s8.bf16 %v592_v7  ;;  %v114_v6 = vld [vmem:[#allocation6 + $0x28] sm:$0xff]  ;;  %v116_v7 = vld [vmem:[#allocation6 + $0x38] sm:$0xff] }
 0x232   :  { %2040 = vmatprep.mubr.bf16.mxu0 %v4038_v26  ;;  %2368 = vmatprep.mubr.bf16.mxu1 %v4038_v26 }
 0x234   :  { %2011 = vmatpush1.bf16.msra.mxu0 %v1525_v21  ;;  %2339 = vmatpush1.bf16.msra.mxu1 %v1527_v27  ;;  %v1589_v21 = vunpack.c.h.s8.bf16 %v589_v12  ;;  %v1591_v27 = vunpack.c.h.s8.bf16 %v591_v13  ;;  %v113_v12 = vld [vmem:[#allocation6 + $0x20] sm:$0xff]  ;;  %v115_v13 = vld [vmem:[#allocation6 + $0x30] sm:$0xff] }
 0x235   :  { %2012 = vmatprep.subr.bf16.mxu0 %v1534_v29  ;;  %2340 = vmatprep.subr.bf16.mxu1 %v1536_v32  ;;  %v1598_v29 = vunpack.c.l.s8.bf16 %v598_v43  ;;  %v1600_v32 = vunpack.c.l.s8.bf16 %v600_v25 }
 0x238   :  { %2013 = vmatpush1.bf16.msra.mxu0 %v1533_v36  ;;  %2341 = vmatpush1.bf16.msra.mxu1 %v1535_v37  ;;  %v1597_v36 = vunpack.c.l.s8.bf16 %v597_v33  ;;  %v1599_v37 = vunpack.c.l.s8.bf16 %v599_v34 }
 0x239   :  { %2014 = vmatprep.subr.bf16.mxu0 %v1542_v45  ;;  %2342 = vmatprep.subr.bf16.mxu1 %v1544_v39  ;;  %v1606_v45 = vunpack.c.h.s8.bf16 %v598_v43  ;;  %v1608_v39 = vunpack.c.h.s8.bf16 %v600_v25  ;;  %v636_v43 = vunpack.c.h.s8.bf16 %v116_v7  ;;  %v122_v25 = vld [vmem:[#allocation6 + $0x68] sm:$0xff] }
 0x23c   :  { %2015 = vmatpush1.bf16.msra.mxu0 %v1541_v46  ;;  %2343 = vmatpush1.bf16.msra.mxu1 %v1543_v47  ;;  %v1605_v46 = vunpack.c.h.s8.bf16 %v597_v33  ;;  %v1607_v47 = vunpack.c.h.s8.bf16 %v599_v34  ;;  %v121_v33 = vld [vmem:[#allocation6 + $0x60] sm:$0xff]  ;;  %v123_v34 = vld [vmem:[#allocation6 + $0x70] sm:$0xff] }
 0x23d   :  { %2016 = vmatprep.subr.bf16.mxu0 %v1550_v48  ;;  %2344 = vmatprep.subr.bf16.mxu1 %v1552_v49  ;;  %v1614_v48 = vunpack.c.l.s8.bf16 %v606_v40  ;;  %v1616_v49 = vunpack.c.l.s8.bf16 %v608_v41 }
 0x240   :  { %2017 = vmatpush1.bf16.msra.mxu0 %v1549_v61  ;;  %2345 = vmatpush1.bf16.msra.mxu1 %v1551_v53  ;;  %v1613_v61 = vunpack.c.l.s8.bf16 %v605_v30  ;;  %v1615_v53 = vunpack.c.l.s8.bf16 %v607_v51 }
 0x241   :  { %2018 = vmatprep.subr.bf16.mxu0 %v1558_v54  ;;  %2346 = vmatprep.subr.bf16.mxu1 %v1560_v55  ;;  %v1622_v54 = vunpack.c.h.s8.bf16 %v606_v40  ;;  %v1624_v55 = vunpack.c.h.s8.bf16 %v608_v41  ;;  %v130_v40 = vld [vmem:[#allocation6 + $0xa8] sm:$0xff]  ;;  %v132_v41 = vld [vmem:[#allocation6 + $0xb8] sm:$0xff] }
 0x244   :  { %2019 = vmatpush1.bf16.msra.mxu0 %v1557_v58  ;;  %2347 = vmatpush1.bf16.msra.mxu1 %v1559_v59  ;;  %v1621_v58 = vunpack.c.h.s8.bf16 %v605_v30  ;;  %v1623_v59 = vunpack.c.h.s8.bf16 %v607_v51  ;;  %v129_v30 = vld [vmem:[#allocation6 + $0xa0] sm:$0xff] }
 0x245   :  { %2020 = vmatprep.subr.bf16.mxu0 %v1566_v62  ;;  %2348 = vmatprep.subr.bf16.mxu1 %v1568_v63  ;;  %v1630_v62 = vunpack.c.l.s8.bf16 %v614_v56  ;;  %v1632_v63 = vunpack.c.l.s8.bf16 %v616_v57  ;;  %v657_v51 = vunpack.c.l.s8.bf16 %v129_v30 }
 0x248   :  { %2021 = vmatpush1.bf16.msra.mxu0 %v1565_v2  ;;  %2349 = vmatpush1.bf16.msra.mxu1 %v1567_v3  ;;  %v1629_v2 = vunpack.c.l.s8.bf16 %v613_v0  ;;  %v1631_v3 = vunpack.c.l.s8.bf16 %v615_v1 }
 0x249   :  { %2022 = vmatprep.subr.bf16.mxu0 %v1574_v17  ;;  %2350 = vmatprep.subr.bf16.mxu1 %v1576_v5  ;;  %v1638_v17 = vunpack.c.h.s8.bf16 %v614_v56  ;;  %v1640_v5 = vunpack.c.h.s8.bf16 %v616_v57  ;;  %v140_v56 = vld [vmem:[#allocation6 + $0xf8] sm:$0xff]  ;;  %v665_v57 = vunpack.c.h.s8.bf16 %v129_v30  ;;  %v163_v30 = vld [vmem:[#allocation6 + $0x1b0] sm:$0xff] }
 0x24c   :  { %2023 = vmatpush1.bf16.msra.mxu0 %v1573_v8  ;;  %2351 = vmatpush1.bf16.msra.mxu1 %v1575_v9  ;;  %v1637_v8 = vunpack.c.h.s8.bf16 %v613_v0  ;;  %v1639_v9 = vunpack.c.h.s8.bf16 %v615_v1  ;;  %v139_v0 = vld [vmem:[#allocation6 + $0xf0] sm:$0xff] }
 0x24d   :  { %2024 = vmatprep.subr.bf16.mxu0 %v1582_v10  ;;  %2352 = vmatprep.subr.bf16.mxu1 %v1584_v11  ;;  %v626_v10 = vunpack.c.l.s8.bf16 %v114_v6  ;;  %v628_v11 = vunpack.c.l.s8.bf16 %v116_v7 }
 0x250   :  { %2025 = vmatpush1.bf16.msra.mxu0 %v1581_v18  ;;  %2353 = vmatpush1.bf16.msra.mxu1 %v1583_v19  ;;  %v4046_v18 = vcombine.low %v4034_v15, %v4034_v15  ;;  %v625_v19 = vunpack.c.l.s8.bf16 %v113_v12  ;;  %v642_v15 = vunpack.c.l.s8.bf16 %v122_v25 }
 0x251   :  { %2026 = vmatprep.subr.bf16.mxu0 %v1590_v22  ;;  %2354 = vmatprep.subr.bf16.mxu1 %v1592_v23  ;;  %v627_v22 = vunpack.c.l.s8.bf16 %v115_v13  ;;  %v634_v23 = vunpack.c.h.s8.bf16 %v114_v6  ;;  %v148_v6 = vld [vmem:[#allocation6 + $0x138] sm:$0xff] }
 0x254   :  { %2027 = vmatpush1.bf16.msra.mxu0 %v1589_v21  ;;  %2355 = vmatpush1.bf16.msra.mxu1 %v1591_v27  ;;  %v124_v21 = vld [vmem:[#allocation6 + $0x78] sm:$0xff]  ;;  %v633_v27 = vunpack.c.h.s8.bf16 %v113_v12  ;;  %v147_v12 = vld [vmem:[#allocation6 + $0x130] sm:$0xff] }
 0x255   :  { %2028 = vmatprep.subr.bf16.mxu0 %v1598_v29  ;;  %2356 = vmatprep.subr.bf16.mxu1 %v1600_v32  ;;  %v635_v29 = vunpack.c.h.s8.bf16 %v115_v13  ;;  %v644_v32 = vunpack.c.l.s8.bf16 %v124_v21 }
 0x258   :  { %2029 = vmatpush1.bf16.msra.mxu0 %v1597_v36  ;;  %2357 = vmatpush1.bf16.msra.mxu1 %v1599_v37  ;;  %v641_v36 = vunpack.c.l.s8.bf16 %v121_v33  ;;  %v643_v37 = vunpack.c.l.s8.bf16 %v123_v34 }
 0x259   :  { %2030 = vmatprep.subr.bf16.mxu0 %v1606_v45  ;;  %2358 = vmatprep.subr.bf16.mxu1 %v1608_v39  ;;  %v650_v45 = vunpack.c.h.s8.bf16 %v122_v25  ;;  %v652_v39 = vunpack.c.h.s8.bf16 %v124_v21  ;;  %v156_v25 = vld [vmem:[#allocation6 + $0x178] sm:$0xff] }
 0x25c   :  { %2031 = vmatpush1.bf16.msra.mxu0 %v1605_v46  ;;  %2359 = vmatpush1.bf16.msra.mxu1 %v1607_v47  ;;  %v649_v46 = vunpack.c.h.s8.bf16 %v121_v33  ;;  %v651_v47 = vunpack.c.h.s8.bf16 %v123_v34  ;;  %v155_v33 = vld [vmem:[#allocation6 + $0x170] sm:$0xff] }
 0x25d   :  { %2032 = vmatprep.subr.bf16.mxu0 %v1614_v48  ;;  %2360 = vmatprep.subr.bf16.mxu1 %v1616_v49  ;;  %v658_v48 = vunpack.c.l.s8.bf16 %v130_v40  ;;  %v660_v49 = vunpack.c.l.s8.bf16 %v132_v41 }
 0x260   :  { %2033 = vmatpush1.bf16.msra.mxu0 %v1613_v61  ;;  %2361 = vmatpush1.bf16.msra.mxu1 %v1615_v53  ;;  %v666_v53 = vunpack.c.h.s8.bf16 %v130_v40  ;;  %v164_v40 = vld [vmem:[#allocation6 + $0x1b8] sm:$0xff] }
 0x261   :  { %2034 = vmatprep.subr.bf16.mxu0 %v1622_v54  ;;  %2362 = vmatprep.subr.bf16.mxu1 %v1624_v55  ;;  %v668_v54 = vunpack.c.h.s8.bf16 %v132_v41  ;;  %v138_v55 = vld [vmem:[#allocation6 + $0xe8] sm:$0xff] }
 0x264   :  { %2035 = vmatpush1.bf16.msra.mxu0 %v1621_v58  ;;  %2363 = vmatpush1.bf16.msra.mxu1 %v1623_v59  ;;  %v674_v59 = vunpack.c.l.s8.bf16 %v138_v55 }
 0x265   :  { %2036 = vmatprep.subr.bf16.mxu0 %v1630_v62  ;;  %2364 = vmatprep.subr.bf16.mxu1 %v1632_v63  ;;  %v676_v62 = vunpack.c.l.s8.bf16 %v140_v56  ;;  %v137_v63 = vld [vmem:[#allocation6 + $0xe0] sm:$0xff] }
 0x266   :  { %v673_v1 = vunpack.c.l.s8.bf16 %v137_v63  ;;  %v681_v7 = vunpack.c.h.s8.bf16 %v137_v63  ;;  %v171_v63 = vld [vmem:[#allocation6 + $0x1f0] sm:$0xff] }
 0x268   :  { %2037 = vmatpush1.bf16.msra.mxu0 %v1629_v2  ;;  %2365 = vmatpush1.bf16.msra.mxu1 %v1631_v3  ;;  %v675_v2 = vunpack.c.l.s8.bf16 %v139_v0  ;;  %v682_v3 = vunpack.c.h.s8.bf16 %v138_v55  ;;  %v172_v55 = vld [vmem:[#allocation6 + $0x1f8] sm:$0xff] }
 0x269   :  { %2038 = vmatprep.subr.bf16.mxu0 %v1638_v17  ;;  %2366 = vmatprep.subr.bf16.mxu1 %v1640_v5  ;;  %v684_v17 = vunpack.c.h.s8.bf16 %v140_v56  ;;  %v146_v5 = vld [vmem:[#allocation6 + $0x128] sm:$0xff] }
 0x26c   :  { %2039 = vmatpush1.bf16.msra.mxu0 %v1637_v8  ;;  %2367 = vmatpush1.bf16.msra.mxu1 %v1639_v9  ;;  %v683_v8 = vunpack.c.h.s8.bf16 %v139_v0  ;;  %v690_v9 = vunpack.c.l.s8.bf16 %v146_v5 }
 0x26d   :  { %2377 = vmatprep.subr.bf16.mxu0 %v626_v10  ;;  %2705 = vmatprep.subr.bf16.mxu1 %v628_v11  ;;  %v692_v10 = vunpack.c.l.s8.bf16 %v148_v6  ;;  %v145_v11 = vld [vmem:[#allocation6 + $0x120] sm:$0xff] }
 0x26e   :  { %v689_v13 = vunpack.c.l.s8.bf16 %v145_v11  ;;  %v697_v21 = vunpack.c.h.s8.bf16 %v145_v11  ;;  %v179_v11 = vld [vmem:[#allocation6 + $0x230] sm:$0xff] }
 0x26f   :  { %2041 = vmatmul.mubr.bf16.vlgmr.msra.gmra.mrb[0].mxu0 %v4046_v18  ;;  %2369 = vmatmul.mubr.bf16.vlgmr.msra.gmra.mrb[0].mxu1 %v4046_v18 }
 0x270   :  { %2378 = vmatpush1.bf16.msra.mxu0 %v625_v19  ;;  %2706 = vmatpush1.bf16.msra.mxu1 %v627_v22  ;;  %v691_v19 = vunpack.c.l.s8.bf16 %v147_v12  ;;  %v698_v22 = vunpack.c.h.s8.bf16 %v146_v5  ;;  %v180_v5 = vld [vmem:[#allocation6 + $0x238] sm:$0xff] }
 0x271   :  { %2379 = vmatprep.subr.bf16.mxu0 %v634_v23  ;;  %2707 = vmatprep.subr.bf16.mxu1 %v636_v43  ;;  %v700_v23 = vunpack.c.h.s8.bf16 %v148_v6  ;;  %v154_v43 = vld [vmem:[#allocation6 + $0x168] sm:$0xff] }
 0x272   :  { %2409 = vmatprep.mubr.bf16.mxu0 %v3942_v35  ;;  %2737 = vmatprep.mubr.bf16.mxu1 %v3942_v35  ;;  %v131_v35 = vld [vmem:[#allocation6 + $0xb0] sm:$0xff] }
 0x273   :  { %v659_v61 = vunpack.c.l.s8.bf16 %v131_v35  ;;  %v667_v58 = vunpack.c.h.s8.bf16 %v131_v35 }
 0x274   :  { %2380 = vmatpush1.bf16.msra.mxu0 %v633_v27  ;;  %2708 = vmatpush1.bf16.msra.mxu1 %v635_v29  ;;  %v699_v27 = vunpack.c.h.s8.bf16 %v147_v12  ;;  %v706_v29 = vunpack.c.l.s8.bf16 %v154_v43 }
 0x275   :  { %2381 = vmatprep.subr.bf16.mxu0 %v642_v15  ;;  %2709 = vmatprep.subr.bf16.mxu1 %v644_v32  ;;  %v708_v15 = vunpack.c.l.s8.bf16 %v156_v25  ;;  %v153_v32 = vld [vmem:[#allocation6 + $0x160] sm:$0xff] }
 0x276   :  { %v705_v34 = vunpack.c.l.s8.bf16 %v153_v32  ;;  %v713_v41 = vunpack.c.h.s8.bf16 %v153_v32  ;;  %v187_v32 = vld [vmem:[#allocation6 + $0x270] sm:$0xff] }
 0x278   :  { %2382 = vmatpush1.bf16.msra.mxu0 %v641_v36  ;;  %2710 = vmatpush1.bf16.msra.mxu1 %v643_v37  ;;  %v707_v36 = vunpack.c.l.s8.bf16 %v155_v33  ;;  %v714_v37 = vunpack.c.h.s8.bf16 %v154_v43  ;;  %v188_v43 = vld [vmem:[#allocation6 + $0x278] sm:$0xff] }
 0x279   :  { %2383 = vmatprep.subr.bf16.mxu0 %v650_v45  ;;  %2711 = vmatprep.subr.bf16.mxu1 %v652_v39  ;;  %v716_v45 = vunpack.c.h.s8.bf16 %v156_v25  ;;  %v162_v39 = vld [vmem:[#allocation6 + $0x1a8] sm:$0xff] }
 0x27c   :  { %2384 = vmatpush1.bf16.msra.mxu0 %v649_v46  ;;  %2712 = vmatpush1.bf16.msra.mxu1 %v651_v47  ;;  %v715_v46 = vunpack.c.h.s8.bf16 %v155_v33  ;;  %v722_v47 = vunpack.c.l.s8.bf16 %v162_v39 }
 0x27d   :  { %2385 = vmatprep.subr.bf16.mxu0 %v658_v48  ;;  %2713 = vmatprep.subr.bf16.mxu1 %v660_v49  ;;  %v724_v48 = vunpack.c.l.s8.bf16 %v164_v40  ;;  %v161_v49 = vld [vmem:[#allocation6 + $0x1a0] sm:$0xff] }
 0x27e   :  { %v721_v35 = vunpack.c.l.s8.bf16 %v161_v49  ;;  %v729_v56 = vunpack.c.h.s8.bf16 %v161_v49 }
 0x280   :  { %2386 = vmatpush1.bf16.msra.mxu0 %v657_v51  ;;  %2714 = vmatpush1.bf16.msra.mxu1 %v659_v61  ;;  %v723_v51 = vunpack.c.l.s8.bf16 %v163_v30  ;;  %v730_v61 = vunpack.c.h.s8.bf16 %v162_v39 }
 0x281   :  { %2387 = vmatprep.subr.bf16.mxu0 %v666_v53  ;;  %2715 = vmatprep.subr.bf16.mxu1 %v668_v54  ;;  %v732_v53 = vunpack.c.h.s8.bf16 %v164_v40  ;;  %v170_v54 = vld [vmem:[#allocation6 + $0x1e8] sm:$0xff]  ;;  %v779_v40 = vunpack.c.h.s8.bf16 %v187_v32 }
 0x284   :  { %2388 = vmatpush1.bf16.msra.mxu0 %v665_v57  ;;  %2716 = vmatpush1.bf16.msra.mxu1 %v667_v58  ;;  %v731_v57 = vunpack.c.h.s8.bf16 %v163_v30  ;;  %v738_v58 = vunpack.c.l.s8.bf16 %v170_v54 }
 0x285   :  { %2389 = vmatprep.subr.bf16.mxu0 %v674_v59  ;;  %2717 = vmatprep.subr.bf16.mxu1 %v676_v62  ;;  %v740_v59 = vunpack.c.l.s8.bf16 %v172_v55  ;;  %v169_v62 = vld [vmem:[#allocation6 + $0x1e0] sm:$0xff] }
 0x286   :  { %v737_v0 = vunpack.c.l.s8.bf16 %v169_v62  ;;  %v745_v6 = vunpack.c.h.s8.bf16 %v169_v62 }
 0x288   :  { %2390 = vmatpush1.bf16.msra.mxu0 %v673_v1  ;;  %2718 = vmatpush1.bf16.msra.mxu1 %v675_v2  ;;  %v739_v1 = vunpack.c.l.s8.bf16 %v171_v63  ;;  %v746_v2 = vunpack.c.h.s8.bf16 %v170_v54 }
 0x289   :  { %2391 = vmatprep.subr.bf16.mxu0 %v682_v3  ;;  %2719 = vmatprep.subr.bf16.mxu1 %v684_v17  ;;  %v748_v3 = vunpack.c.h.s8.bf16 %v172_v55  ;;  %v178_v17 = vld [vmem:[#allocation6 + $0x228] sm:$0xff] }
 0x28c   :  { %2392 = vmatpush1.bf16.msra.mxu0 %v681_v7  ;;  %2720 = vmatpush1.bf16.msra.mxu1 %v683_v8  ;;  %v747_v7 = vunpack.c.h.s8.bf16 %v171_v63  ;;  %v754_v8 = vunpack.c.l.s8.bf16 %v178_v17 }
 0x28d   :  { %2393 = vmatprep.subr.bf16.mxu0 %v690_v9  ;;  %2721 = vmatprep.subr.bf16.mxu1 %v692_v10  ;;  %v756_v9 = vunpack.c.l.s8.bf16 %v180_v5  ;;  %v177_v10 = vld [vmem:[#allocation6 + $0x220] sm:$0xff] }
 0x28e   :  { %v753_v12 = vunpack.c.l.s8.bf16 %v177_v10  ;;  %v761_v25 = vunpack.c.h.s8.bf16 %v177_v10 }
 0x290   :  { %2394 = vmatpush1.bf16.msra.mxu0 %v689_v13  ;;  %2722 = vmatpush1.bf16.msra.mxu1 %v691_v19  ;;  %v755_v13 = vunpack.c.l.s8.bf16 %v179_v11  ;;  %v762_v19 = vunpack.c.h.s8.bf16 %v178_v17 }
 0x291   :  { %2395 = vmatprep.subr.bf16.mxu0 %v698_v22  ;;  %2723 = vmatprep.subr.bf16.mxu1 %v700_v23  ;;  %v764_v22 = vunpack.c.h.s8.bf16 %v180_v5  ;;  %v186_v23 = vld [vmem:[#allocation6 + $0x268] sm:$0xff] }
 0x294   :  { %2396 = vmatpush1.bf16.msra.mxu0 %v697_v21  ;;  %2724 = vmatpush1.bf16.msra.mxu1 %v699_v27  ;;  %v763_v21 = vunpack.c.h.s8.bf16 %v179_v11  ;;  %v770_v27 = vunpack.c.l.s8.bf16 %v186_v23 }
 0x295   :  { %2397 = vmatprep.subr.bf16.mxu0 %v706_v29  ;;  %2725 = vmatprep.subr.bf16.mxu1 %v708_v15  ;;  %v772_v29 = vunpack.c.l.s8.bf16 %v188_v43  ;;  %v185_v15 = vld [vmem:[#allocation6 + $0x260] sm:$0xff] }
 0x296   :  { %v769_v33 = vunpack.c.l.s8.bf16 %v185_v15  ;;  %v777_v39 = vunpack.c.h.s8.bf16 %v185_v15 }
 0x298   :  { %2398 = vmatpush1.bf16.msra.mxu0 %v705_v34  ;;  %2726 = vmatpush1.bf16.msra.mxu1 %v707_v36  ;;  %v771_v34 = vunpack.c.l.s8.bf16 %v187_v32  ;;  %v780_v36 = vunpack.c.h.s8.bf16 %v188_v43 }
 0x299   :  { %2399 = vmatprep.subr.bf16.mxu0 %v714_v37  ;;  %2727 = vmatprep.subr.bf16.mxu1 %v716_v45  ;;  %v194_v37 = vld [vmem:[#allocation6 + $0x2a8] sm:$0xff]  ;;  %v196_v45 = vld [vmem:[#allocation6 + $0x2b8] sm:$0xff] }
 0x29a   :  { %v794_v30 = vunpack.c.h.s8.bf16 %v194_v37 }
 0x29c   :  { %2400 = vmatpush1.bf16.msra.mxu0 %v713_v41  ;;  %2728 = vmatpush1.bf16.msra.mxu1 %v715_v46  ;;  %v786_v41 = vunpack.c.l.s8.bf16 %v194_v37  ;;  %v788_v46 = vunpack.c.l.s8.bf16 %v196_v45 }
 0x29d   :  { %2401 = vmatprep.subr.bf16.mxu0 %v722_v47  ;;  %2729 = vmatprep.subr.bf16.mxu1 %v724_v48  ;;  %v193_v47 = vld [vmem:[#allocation6 + $0x2a0] sm:$0xff] }
 0x29e   :  { %v785_v48 = vunpack.c.l.s8.bf16 %v193_v47 }
 0x2a0   :  { %2402 = vmatpush1.bf16.msra.mxu0 %v721_v35  ;;  %2730 = vmatpush1.bf16.msra.mxu1 %v723_v51  ;;  %v796_v35 = vunpack.c.h.s8.bf16 %v196_v45  ;;  %v202_v51 = vld [vmem:[#allocation6 + $0x2e8] sm:$0xff] }
 0x2a1   :  { %2403 = vmatprep.subr.bf16.mxu0 %v730_v61  ;;  %2731 = vmatprep.subr.bf16.mxu1 %v732_v53  ;;  %v204_v61 = vld [vmem:[#allocation6 + $0x2f8] sm:$0xff]  ;;  %v793_v53 = vunpack.c.h.s8.bf16 %v193_v47  ;;  %v802_v55 = vunpack.c.l.s8.bf16 %v202_v51  ;;  %v810_v63 = vunpack.c.h.s8.bf16 %v202_v51 }
 0x2a4   :  { %2404 = vmatpush1.bf16.msra.mxu0 %v729_v56  ;;  %2732 = vmatpush1.bf16.msra.mxu1 %v731_v57  ;;  %v804_v56 = vunpack.c.l.s8.bf16 %v204_v61  ;;  %v201_v57 = vld [vmem:[#allocation6 + $0x2e0] sm:$0xff] }
 0x2a5   :  { %2405 = vmatprep.subr.bf16.mxu0 %v738_v58  ;;  %2733 = vmatprep.subr.bf16.mxu1 %v740_v59  ;;  %v203_v58 = vld [vmem:[#allocation6 + $0x2f0] sm:$0xff]  ;;  %v801_v59 = vunpack.c.l.s8.bf16 %v201_v57 }
 0x2a6   :  { %v803_v62 = vunpack.c.l.s8.bf16 %v203_v58  ;;  %v811_v17 = vunpack.c.h.s8.bf16 %v203_v58 }
 0x2a8   :  { %2406 = vmatpush1.bf16.msra.mxu0 %v737_v0  ;;  %2734 = vmatpush1.bf16.msra.mxu1 %v739_v1  ;;  %v812_v0 = vunpack.c.h.s8.bf16 %v204_v61  ;;  %v210_v1 = vld [vmem:[#allocation6 + $0x328] sm:$0xff] }
 0x2a9   :  { %2407 = vmatprep.subr.bf16.mxu0 %v746_v2  ;;  %2735 = vmatprep.subr.bf16.mxu1 %v748_v3  ;;  %v212_v2 = vld [vmem:[#allocation6 + $0x338] sm:$0xff]  ;;  %v809_v3 = vunpack.c.h.s8.bf16 %v201_v57  ;;  %v818_v5 = vunpack.c.l.s8.bf16 %v210_v1  ;;  %v826_v11 = vunpack.c.h.s8.bf16 %v210_v1 }
 0x2ac   :  { %2408 = vmatpush1.bf16.msra.mxu0 %v745_v6  ;;  %2736 = vmatpush1.bf16.msra.mxu1 %v747_v7  ;;  %v820_v6 = vunpack.c.l.s8.bf16 %v212_v2  ;;  %v209_v7 = vld [vmem:[#allocation6 + $0x320] sm:$0xff] }
 0x2ad   :  { %2418 = vmatprep.subr.bf16.mxu0 %v754_v8  ;;  %2746 = vmatprep.subr.bf16.mxu1 %v756_v9  ;;  %v211_v8 = vld [vmem:[#allocation6 + $0x330] sm:$0xff]  ;;  %v817_v9 = vunpack.c.l.s8.bf16 %v209_v7 }
 0x2ae   :  { %v819_v10 = vunpack.c.l.s8.bf16 %v211_v8 }
 0x2af   :  { %2410 = vmatmul.mubr.bf16.vlgmr.msra.gmra.mrb[4].mxu0 %v3948_v42  ;;  %2738 = vmatmul.mubr.bf16.vlgmr.msra.gmra.mrb[4].mxu1 %v3948_v42  ;;  %v778_v42 = vunpack.c.h.s8.bf16 %v186_v23  ;;  %v827_v23 = vunpack.c.h.s8.bf16 %v211_v8 }
 0x2b0   :  { %2419 = vmatpush1.bf16.msra.mxu0 %v753_v12  ;;  %2747 = vmatpush1.bf16.msra.mxu1 %v755_v13  ;;  %v828_v12 = vunpack.c.h.s8.bf16 %v212_v2  ;;  %v218_v13 = vld [vmem:[#allocation6 + $0x368] sm:$0xff] }
 0x2b1   :  { %2420 = vmatprep.subr.bf16.mxu0 %v762_v19  ;;  %2748 = vmatprep.subr.bf16.mxu1 %v764_v22  ;;  %v220_v19 = vld [vmem:[#allocation6 + $0x378] sm:$0xff]  ;;  %v825_v22 = vunpack.c.h.s8.bf16 %v209_v7  ;;  %v834_v43 = vunpack.c.l.s8.bf16 %v218_v13  ;;  %v842_v32 = vunpack.c.h.s8.bf16 %v218_v13 }
 0x2b2   :  { %2450 = vmatprep.mubr.bf16.mxu0 %v3954_v50  ;;  %2778 = vmatprep.mubr.bf16.mxu1 %v3954_v50  ;;  %v195_v50 = vld [vmem:[#allocation6 + $0x2b0] sm:$0xff] }
 0x2b3   :  { %v787_v49 = vunpack.c.l.s8.bf16 %v195_v50  ;;  %v795_v54 = vunpack.c.h.s8.bf16 %v195_v50 }
 0x2b4   :  { %2421 = vmatpush1.bf16.msra.mxu0 %v761_v25  ;;  %2749 = vmatpush1.bf16.msra.mxu1 %v763_v21  ;;  %v836_v25 = vunpack.c.l.s8.bf16 %v220_v19  ;;  %v217_v21 = vld [vmem:[#allocation6 + $0x360] sm:$0xff] }
 0x2b5   :  { %2422 = vmatprep.subr.bf16.mxu0 %v770_v27  ;;  %2750 = vmatprep.subr.bf16.mxu1 %v772_v29  ;;  %v219_v27 = vld [vmem:[#allocation6 + $0x370] sm:$0xff]  ;;  %v833_v29 = vunpack.c.l.s8.bf16 %v217_v21 }
 0x2b6   :  { %v835_v15 = vunpack.c.l.s8.bf16 %v219_v27  ;;  %v843_v37 = vunpack.c.h.s8.bf16 %v219_v27 }
 0x2b8   :  { %2423 = vmatpush1.bf16.msra.mxu0 %v769_v33  ;;  %2751 = vmatpush1.bf16.msra.mxu1 %v771_v34  ;;  %v844_v33 = vunpack.c.h.s8.bf16 %v220_v19  ;;  %v226_v34 = vld [vmem:[#allocation6 + $0x3a8] sm:$0xff] }
 0x2b9   :  { %2424 = vmatprep.subr.bf16.mxu0 %v778_v42  ;;  %2752 = vmatprep.subr.bf16.mxu1 %v780_v36  ;;  %v228_v42 = vld [vmem:[#allocation6 + $0x3b8] sm:$0xff]  ;;  %v841_v36 = vunpack.c.h.s8.bf16 %v217_v21  ;;  %v850_v45 = vunpack.c.l.s8.bf16 %v226_v34  ;;  %v858_v50 = vunpack.c.h.s8.bf16 %v226_v34 }
 0x2bc   :  { %2425 = vmatpush1.bf16.msra.mxu0 %v777_v39  ;;  %2753 = vmatpush1.bf16.msra.mxu1 %v779_v40  ;;  %v852_v39 = vunpack.c.l.s8.bf16 %v228_v42  ;;  %v225_v40 = vld [vmem:[#allocation6 + $0x3a0] sm:$0xff] }
 0x2bd   :  { %2426 = vmatprep.subr.bf16.mxu0 %v786_v41  ;;  %2754 = vmatprep.subr.bf16.mxu1 %v788_v46  ;;  %v227_v41 = vld [vmem:[#allocation6 + $0x3b0] sm:$0xff]  ;;  %v849_v46 = vunpack.c.l.s8.bf16 %v225_v40 }
 0x2be   :  { %v851_v47 = vunpack.c.l.s8.bf16 %v227_v41  ;;  %v859_v51 = vunpack.c.h.s8.bf16 %v227_v41  ;;  %v266_v41 = vld [vmem:[#allocation6 + $0x4e8] sm:$0xff] }
 0x2c0   :  { %2427 = vmatpush1.bf16.msra.mxu0 %v785_v48  ;;  %2755 = vmatpush1.bf16.msra.mxu1 %v787_v49  ;;  %v860_v48 = vunpack.c.h.s8.bf16 %v228_v42  ;;  %v234_v49 = vld [vmem:[#allocation6 + $0x3e8] sm:$0xff] }
 0x2c1   :  { %2428 = vmatprep.subr.bf16.mxu0 %v794_v30  ;;  %2756 = vmatprep.subr.bf16.mxu1 %v796_v35  ;;  %v236_v30 = vld [vmem:[#allocation6 + $0x3f8] sm:$0xff]  ;;  %v857_v35 = vunpack.c.h.s8.bf16 %v225_v40  ;;  %v866_v61 = vunpack.c.l.s8.bf16 %v234_v49  ;;  %v874_v58 = vunpack.c.h.s8.bf16 %v234_v49 }
 0x2c4   :  { %2429 = vmatpush1.bf16.msra.mxu0 %v793_v53  ;;  %2757 = vmatpush1.bf16.msra.mxu1 %v795_v54  ;;  %v868_v53 = vunpack.c.l.s8.bf16 %v236_v30  ;;  %v233_v54 = vld [vmem:[#allocation6 + $0x3e0] sm:$0xff] }
 0x2c5   :  { %2430 = vmatprep.subr.bf16.mxu0 %v802_v55  ;;  %2758 = vmatprep.subr.bf16.mxu1 %v804_v56  ;;  %v235_v55 = vld [vmem:[#allocation6 + $0x3f0] sm:$0xff]  ;;  %v865_v56 = vunpack.c.l.s8.bf16 %v233_v54 }
 0x2c6   :  { %v867_v57 = vunpack.c.l.s8.bf16 %v235_v55  ;;  %v875_v1 = vunpack.c.h.s8.bf16 %v235_v55  ;;  %v274_v55 = vld [vmem:[#allocation6 + $0x528] sm:$0xff] }
 0x2c8   :  { %2431 = vmatpush1.bf16.msra.mxu0 %v801_v59  ;;  %2759 = vmatpush1.bf16.msra.mxu1 %v803_v62  ;;  %v876_v59 = vunpack.c.h.s8.bf16 %v236_v30  ;;  %v242_v62 = vld [vmem:[#allocation6 + $0x428] sm:$0xff]  ;;  %v265_v30 = vld [vmem:[#allocation6 + $0x4e0] sm:$0xff] }
 0x2c9   :  { %2432 = vmatprep.subr.bf16.mxu0 %v810_v63  ;;  %2760 = vmatprep.subr.bf16.mxu1 %v812_v0  ;;  %v244_v63 = vld [vmem:[#allocation6 + $0x438] sm:$0xff]  ;;  %v873_v0 = vunpack.c.h.s8.bf16 %v233_v54  ;;  %v882_v2 = vunpack.c.l.s8.bf16 %v242_v62  ;;  %v890_v8 = vunpack.c.h.s8.bf16 %v242_v62 }
 0x2cc   :  { %2433 = vmatpush1.bf16.msra.mxu0 %v809_v3  ;;  %2761 = vmatpush1.bf16.msra.mxu1 %v811_v17  ;;  %v884_v3 = vunpack.c.l.s8.bf16 %v244_v63  ;;  %v241_v17 = vld [vmem:[#allocation6 + $0x420] sm:$0xff] }
 0x2cd   :  { %2434 = vmatprep.subr.bf16.mxu0 %v818_v5  ;;  %2762 = vmatprep.subr.bf16.mxu1 %v820_v6  ;;  %v243_v5 = vld [vmem:[#allocation6 + $0x430] sm:$0xff]  ;;  %v881_v6 = vunpack.c.l.s8.bf16 %v241_v17 }
 0x2ce   :  { %v883_v7 = vunpack.c.l.s8.bf16 %v243_v5  ;;  %v891_v13 = vunpack.c.h.s8.bf16 %v243_v5  ;;  %v282_v5 = vld [vmem:[#allocation6 + $0x568] sm:$0xff] }
 0x2d0   :  { %2435 = vmatpush1.bf16.msra.mxu0 %v817_v9  ;;  %2763 = vmatpush1.bf16.msra.mxu1 %v819_v10  ;;  %v892_v9 = vunpack.c.h.s8.bf16 %v244_v63  ;;  %v250_v10 = vld [vmem:[#allocation6 + $0x468] sm:$0xff]  ;;  %v273_v63 = vld [vmem:[#allocation6 + $0x520] sm:$0xff] }
 0x2d1   :  { %2436 = vmatprep.subr.bf16.mxu0 %v826_v11  ;;  %2764 = vmatprep.subr.bf16.mxu1 %v828_v12  ;;  %v252_v11 = vld [vmem:[#allocation6 + $0x478] sm:$0xff]  ;;  %v889_v12 = vunpack.c.h.s8.bf16 %v241_v17  ;;  %v898_v19 = vunpack.c.l.s8.bf16 %v250_v10 }
 0x2d2   :  { %v908_v27 = vunpack.c.h.s8.bf16 %v252_v11 }
 0x2d4   :  { %2437 = vmatpush1.bf16.msra.mxu0 %v825_v22  ;;  %2765 = vmatpush1.bf16.msra.mxu1 %v827_v23  ;;  %v900_v22 = vunpack.c.l.s8.bf16 %v252_v11  ;;  %v249_v23 = vld [vmem:[#allocation6 + $0x460] sm:$0xff] }
 0x2d5   :  { %2438 = vmatprep.subr.bf16.mxu0 %v834_v43  ;;  %2766 = vmatprep.subr.bf16.mxu1 %v836_v25  ;;  %v251_v43 = vld [vmem:[#allocation6 + $0x470] sm:$0xff]  ;;  %v897_v25 = vunpack.c.l.s8.bf16 %v249_v23  ;;  %v281_v11 = vld [vmem:[#allocation6 + $0x560] sm:$0xff] }
 0x2d6   :  { %v899_v21 = vunpack.c.l.s8.bf16 %v251_v43 }
 0x2d8   :  { %2439 = vmatpush1.bf16.msra.mxu0 %v833_v29  ;;  %2767 = vmatpush1.bf16.msra.mxu1 %v835_v15  ;;  %v258_v29 = vld [vmem:[#allocation6 + $0x4a8] sm:$0xff]  ;;  %v260_v15 = vld [vmem:[#allocation6 + $0x4b8] sm:$0xff] }
 0x2d9   :  { %2440 = vmatprep.subr.bf16.mxu0 %v842_v32  ;;  %2768 = vmatprep.subr.bf16.mxu1 %v844_v33  ;;  %v905_v32 = vunpack.c.h.s8.bf16 %v249_v23  ;;  %v907_v33 = vunpack.c.h.s8.bf16 %v251_v43  ;;  %v914_v34 = vunpack.c.l.s8.bf16 %v258_v29  ;;  %v916_v42 = vunpack.c.l.s8.bf16 %v260_v15  ;;  %v290_v43 = vld [vmem:[#allocation6 + $0x5a8] sm:$0xff] }
 0x2da   :  { %v924_v40 = vunpack.c.h.s8.bf16 %v260_v15  ;;  %v289_v15 = vld [vmem:[#allocation6 + $0x5a0] sm:$0xff] }
 0x2dc   :  { %2441 = vmatpush1.bf16.msra.mxu0 %v841_v36  ;;  %2769 = vmatpush1.bf16.msra.mxu1 %v843_v37  ;;  %v257_v36 = vld [vmem:[#allocation6 + $0x4a0] sm:$0xff] }
 0x2dd   :  { %2442 = vmatprep.subr.bf16.mxu0 %v850_v45  ;;  %2770 = vmatprep.subr.bf16.mxu1 %v852_v39  ;;  %v913_v37 = vunpack.c.l.s8.bf16 %v257_v36  ;;  %v922_v39 = vunpack.c.h.s8.bf16 %v258_v29 }
 0x2e0   :  { %2443 = vmatpush1.bf16.msra.mxu0 %v849_v46  ;;  %2771 = vmatpush1.bf16.msra.mxu1 %v851_v47  ;;  %v268_v46 = vld [vmem:[#allocation6 + $0x4f8] sm:$0xff]  ;;  %v921_v47 = vunpack.c.h.s8.bf16 %v257_v36 }
 0x2e1   :  { %2444 = vmatprep.subr.bf16.mxu0 %v858_v50  ;;  %2772 = vmatprep.subr.bf16.mxu1 %v860_v48  ;;  %v930_v48 = vunpack.c.l.s8.bf16 %v266_v41  ;;  %v932_v49 = vunpack.c.l.s8.bf16 %v268_v46  ;;  %v940_v54 = vunpack.c.h.s8.bf16 %v268_v46  ;;  %v297_v46 = vld [vmem:[#allocation6 + $0x5e0] sm:$0xff] }
 0x2e4   :  { %2445 = vmatpush1.bf16.msra.mxu0 %v857_v35  ;;  %2773 = vmatpush1.bf16.msra.mxu1 %v859_v51  ;;  %v267_v35 = vld [vmem:[#allocation6 + $0x4f0] sm:$0xff]  ;;  %v929_v51 = vunpack.c.l.s8.bf16 %v265_v30 }
 0x2e5   :  { %2446 = vmatprep.subr.bf16.mxu0 %v866_v61  ;;  %2774 = vmatprep.subr.bf16.mxu1 %v868_v53  ;;  %v931_v61 = vunpack.c.l.s8.bf16 %v267_v35  ;;  %v938_v53 = vunpack.c.h.s8.bf16 %v266_v41 }
 0x2e8   :  { %2447 = vmatpush1.bf16.msra.mxu0 %v865_v56  ;;  %2775 = vmatpush1.bf16.msra.mxu1 %v867_v57  ;;  %v276_v56 = vld [vmem:[#allocation6 + $0x538] sm:$0xff]  ;;  %v937_v57 = vunpack.c.h.s8.bf16 %v265_v30 }
 0x2e9   :  { %2448 = vmatprep.subr.bf16.mxu0 %v874_v58  ;;  %2776 = vmatprep.subr.bf16.mxu1 %v876_v59  ;;  %v939_v58 = vunpack.c.h.s8.bf16 %v267_v35  ;;  %v946_v59 = vunpack.c.l.s8.bf16 %v274_v55  ;;  %v948_v62 = vunpack.c.l.s8.bf16 %v276_v56  ;;  %v956_v17 = vunpack.c.h.s8.bf16 %v276_v56  ;;  %v306_v35 = vld [vmem:[#allocation6 + $0x628] sm:$0xff]  ;;  %v305_v56 = vld [vmem:[#allocation6 + $0x620] sm:$0xff] }
 0x2ec   :  { %2449 = vmatpush1.bf16.msra.mxu0 %v873_v0  ;;  %2777 = vmatpush1.bf16.msra.mxu1 %v875_v1  ;;  %v275_v0 = vld [vmem:[#allocation6 + $0x530] sm:$0xff]  ;;  %v945_v1 = vunpack.c.l.s8.bf16 %v273_v63 }
 0x2ed   :  { %2459 = vmatprep.subr.bf16.mxu0 %v882_v2  ;;  %2787 = vmatprep.subr.bf16.mxu1 %v884_v3  ;;  %v947_v2 = vunpack.c.l.s8.bf16 %v275_v0  ;;  %v954_v3 = vunpack.c.h.s8.bf16 %v274_v55 }
 0x2ef   :  { %2451 = vmatmul.mubr.bf16.vlgmr.msra.gmra.mrb[4].mxu0 %v3962_v16  ;;  %2779 = vmatmul.mubr.bf16.vlgmr.msra.gmra.mrb[4].mxu1 %v3962_v16  ;;  %v906_v16 = vunpack.c.h.s8.bf16 %v250_v10 }
 0x2f0   :  { %2460 = vmatpush1.bf16.msra.mxu0 %v881_v6  ;;  %2788 = vmatpush1.bf16.msra.mxu1 %v883_v7  ;;  %v284_v6 = vld [vmem:[#allocation6 + $0x578] sm:$0xff]  ;;  %v953_v7 = vunpack.c.h.s8.bf16 %v273_v63 }
 0x2f1   :  { %2461 = vmatprep.subr.bf16.mxu0 %v890_v8  ;;  %2789 = vmatprep.subr.bf16.mxu1 %v892_v9  ;;  %v955_v8 = vunpack.c.h.s8.bf16 %v275_v0  ;;  %v962_v9 = vunpack.c.l.s8.bf16 %v282_v5  ;;  %v964_v10 = vunpack.c.l.s8.bf16 %v284_v6  ;;  %v972_v23 = vunpack.c.h.s8.bf16 %v284_v6  ;;  %v314_v0 = vld [vmem:[#allocation6 + $0x668] sm:$0xff]  ;;  %v313_v6 = vld [vmem:[#allocation6 + $0x660] sm:$0xff] }
 0x2f2   :  { %2491 = vmatprep.mubr.bf16.mxu0 %v3968_v24  ;;  %2819 = vmatprep.mubr.bf16.mxu1 %v3968_v24  ;;  %v259_v24 = vld [vmem:[#allocation6 + $0x4b0] sm:$0xff] }
 0x2f3   :  { %v915_v45 = vunpack.c.l.s8.bf16 %v259_v24  ;;  %v923_v50 = vunpack.c.h.s8.bf16 %v259_v24  ;;  %v298_v24 = vld [vmem:[#allocation6 + $0x5e8] sm:$0xff] }
 0x2f4   :  { %2462 = vmatpush1.bf16.msra.mxu0 %v889_v12  ;;  %2790 = vmatpush1.bf16.msra.mxu1 %v891_v13  ;;  %v283_v12 = vld [vmem:[#allocation6 + $0x570] sm:$0xff]  ;;  %v961_v13 = vunpack.c.l.s8.bf16 %v281_v11 }
 0x2f5   :  { %2463 = vmatprep.subr.bf16.mxu0 %v898_v19  ;;  %2791 = vmatprep.subr.bf16.mxu1 %v900_v22  ;;  %v963_v19 = vunpack.c.l.s8.bf16 %v283_v12  ;;  %v970_v22 = vunpack.c.h.s8.bf16 %v282_v5 }
 0x2f8   :  { %2464 = vmatpush1.bf16.msra.mxu0 %v897_v25  ;;  %2792 = vmatpush1.bf16.msra.mxu1 %v899_v21  ;;  %v292_v25 = vld [vmem:[#allocation6 + $0x5b8] sm:$0xff]  ;;  %v969_v21 = vunpack.c.h.s8.bf16 %v281_v11 }
 0x2f9   :  { %2465 = vmatprep.subr.bf16.mxu0 %v906_v16  ;;  %2793 = vmatprep.subr.bf16.mxu1 %v908_v27  ;;  %v971_v16 = vunpack.c.h.s8.bf16 %v283_v12  ;;  %v978_v27 = vunpack.c.l.s8.bf16 %v290_v43  ;;  %v980_v29 = vunpack.c.l.s8.bf16 %v292_v25  ;;  %v988_v36 = vunpack.c.h.s8.bf16 %v292_v25  ;;  %v322_v12 = vld [vmem:[#allocation6 + $0x6a8] sm:$0xff]  ;;  %v321_v25 = vld [vmem:[#allocation6 + $0x6a0] sm:$0xff] }
 0x2fc   :  { %2466 = vmatpush1.bf16.msra.mxu0 %v905_v32  ;;  %2794 = vmatpush1.bf16.msra.mxu1 %v907_v33  ;;  %v291_v32 = vld [vmem:[#allocation6 + $0x5b0] sm:$0xff]  ;;  %v977_v33 = vunpack.c.l.s8.bf16 %v289_v15 }
 0x2fd   :  { %2467 = vmatprep.subr.bf16.mxu0 %v914_v34  ;;  %2795 = vmatprep.subr.bf16.mxu1 %v916_v42  ;;  %v979_v34 = vunpack.c.l.s8.bf16 %v291_v32  ;;  %v986_v42 = vunpack.c.h.s8.bf16 %v290_v43 }
 0x300   :  { %2468 = vmatpush1.bf16.msra.mxu0 %v913_v37  ;;  %2796 = vmatpush1.bf16.msra.mxu1 %v915_v45  ;;  %v300_v37 = vld [vmem:[#allocation6 + $0x5f8] sm:$0xff]  ;;  %v985_v45 = vunpack.c.h.s8.bf16 %v289_v15 }
 0x301   :  { %2469 = vmatprep.subr.bf16.mxu0 %v922_v39  ;;  %2797 = vmatprep.subr.bf16.mxu1 %v924_v40  ;;  %v987_v39 = vunpack.c.h.s8.bf16 %v291_v32  ;;  %v994_v40 = vunpack.c.l.s8.bf16 %v298_v24  ;;  %v996_v41 = vunpack.c.l.s8.bf16 %v300_v37  ;;  %v1004_v30 = vunpack.c.h.s8.bf16 %v300_v37  ;;  %v3060_v32 = vld [vmem:[#allocation8] sm:$0xff]  ;;  %v330_v37 = vld [vmem:[#allocation6 + $0x6e8] sm:$0xff] }
 0x304   :  { %2470 = vmatpush1.bf16.msra.mxu0 %v921_v47  ;;  %2798 = vmatpush1.bf16.msra.mxu1 %v923_v50  ;;  %v299_v47 = vld [vmem:[#allocation6 + $0x5f0] sm:$0xff]  ;;  %v993_v50 = vunpack.c.l.s8.bf16 %v297_v46 }
 0x305   :  { %2471 = vmatprep.subr.bf16.mxu0 %v930_v48  ;;  %2799 = vmatprep.subr.bf16.mxu1 %v932_v49  ;;  %v995_v48 = vunpack.c.l.s8.bf16 %v299_v47  ;;  %v1002_v49 = vunpack.c.h.s8.bf16 %v298_v24  ;;  %v3110_v24 = vld [vmem:[#allocation9] sm:$0xff] }
 0x308   :  { %2472 = vmatpush1.bf16.msra.mxu0 %v929_v51  ;;  %2800 = vmatpush1.bf16.msra.mxu1 %v931_v61  ;;  %v308_v51 = vld [vmem:[#allocation6 + $0x638] sm:$0xff]  ;;  %v1001_v61 = vunpack.c.h.s8.bf16 %v297_v46 }
 0x309   :  { %2473 = vmatprep.subr.bf16.mxu0 %v938_v53  ;;  %2801 = vmatprep.subr.bf16.mxu1 %v940_v54  ;;  %v1003_v53 = vunpack.c.h.s8.bf16 %v299_v47  ;;  %v1010_v54 = vunpack.c.l.s8.bf16 %v306_v35  ;;  %v1012_v55 = vunpack.c.l.s8.bf16 %v308_v51  ;;  %v1020_v63 = vunpack.c.h.s8.bf16 %v308_v51  ;;  %v329_v51 = vld [vmem:[#allocation6 + $0x6e0] sm:$0xff] }
 0x30a   :  { %v1049_v47 = vunpack.c.h.s8.bf16 %v321_v25 }
 0x30c   :  { %2474 = vmatpush1.bf16.msra.mxu0 %v937_v57  ;;  %2802 = vmatpush1.bf16.msra.mxu1 %v939_v58  ;;  %v307_v57 = vld [vmem:[#allocation6 + $0x630] sm:$0xff]  ;;  %v1009_v58 = vunpack.c.l.s8.bf16 %v305_v56 }
 0x30d   :  { %2475 = vmatprep.subr.bf16.mxu0 %v946_v59  ;;  %2803 = vmatprep.subr.bf16.mxu1 %v948_v62  ;;  %v1011_v59 = vunpack.c.l.s8.bf16 %v307_v57  ;;  %v1018_v62 = vunpack.c.h.s8.bf16 %v306_v35 }
 0x310   :  { %2476 = vmatpush1.bf16.msra.mxu0 %v945_v1  ;;  %2804 = vmatpush1.bf16.msra.mxu1 %v947_v2  ;;  %v316_v1 = vld [vmem:[#allocation6 + $0x678] sm:$0xff]  ;;  %v1017_v2 = vunpack.c.h.s8.bf16 %v305_v56 }
 0x311   :  { %2477 = vmatprep.subr.bf16.mxu0 %v954_v3  ;;  %2805 = vmatprep.subr.bf16.mxu1 %v956_v17  ;;  %v1019_v3 = vunpack.c.h.s8.bf16 %v307_v57  ;;  %v1026_v17 = vunpack.c.l.s8.bf16 %v314_v0  ;;  %v1028_v5 = vunpack.c.l.s8.bf16 %v316_v1  ;;  %v1036_v11 = vunpack.c.h.s8.bf16 %v316_v1 }
 0x314   :  { %2478 = vmatpush1.bf16.msra.mxu0 %v953_v7  ;;  %2806 = vmatpush1.bf16.msra.mxu1 %v955_v8  ;;  %v315_v7 = vld [vmem:[#allocation6 + $0x670] sm:$0xff]  ;;  %v3062_v8 = vlaneseq }
 0x315   :  { %2479 = vmatprep.subr.bf16.mxu0 %v962_v9  ;;  %2807 = vmatprep.subr.bf16.mxu1 %v964_v10  ;;  %v1025_v9 = vunpack.c.l.s8.bf16 %v313_v6  ;;  %v1027_v10 = vunpack.c.l.s8.bf16 %v315_v7 }
 0x318   :  { %2480 = vmatpush1.bf16.msra.mxu0 %v961_v13  ;;  %2808 = vmatpush1.bf16.msra.mxu1 %v963_v19  ;;  %v324_v13 = vld [vmem:[#allocation6 + $0x6b8] sm:$0xff]  ;;  %v4064_v19 = vshrl.u32 %v3062_v8, 7 }
 0x319   :  { %2481 = vmatprep.subr.bf16.mxu0 %v970_v22  ;;  %2809 = vmatprep.subr.bf16.mxu1 %v972_v23  ;;  %v1033_v22 = vunpack.c.h.s8.bf16 %v313_v6  ;;  %v1035_v23 = vunpack.c.h.s8.bf16 %v315_v7  ;;  %v1044_v43 = vunpack.c.l.s8.bf16 %v324_v13 }
 0x31c   :  { %2482 = vmatpush1.bf16.msra.mxu0 %v969_v21  ;;  %2810 = vmatpush1.bf16.msra.mxu1 %v971_v16  ;;  %v323_v21 = vld [vmem:[#allocation6 + $0x6b0] sm:$0xff]  ;;  %v4067_v16 = vsub.s32 0, %v4064_v19 }
 0x31d   :  { %2483 = vmatprep.subr.bf16.mxu0 %v978_v27  ;;  %2811 = vmatprep.subr.bf16.mxu1 %v980_v29  ;;  %v4070_v27 = vsub.s32 2, %v4064_v19  ;;  %v1041_v29 = vunpack.c.l.s8.bf16 %v321_v25  ;;  %v1043_v15 = vunpack.c.l.s8.bf16 %v323_v21  ;;  %v1065_v25 = vunpack.c.h.s8.bf16 %v329_v51 }
 0x320   :  { %2484 = vmatpush1.bf16.msra.mxu0 %v977_v33  ;;  %2812 = vmatpush1.bf16.msra.mxu1 %v979_v34  ;;  %v4073_v33 = vsub.s32 1, %v4064_v19  ;;  %v4076_v34 = vsub.s32 3, %v4064_v19 }
 0x321   :  { %2485 = vmatprep.subr.bf16.mxu0 %v986_v42  ;;  %2813 = vmatprep.subr.bf16.mxu1 %v988_v36  ;;  %v1050_v42 = vunpack.c.h.s8.bf16 %v322_v12  ;;  %v1052_v36 = vunpack.c.h.s8.bf16 %v324_v13  ;;  %v340_v13 = vld [vmem:[#allocation6 + $0x738] sm:$0xff] }
 0x322   :  { %v3077_v46 = vrot.slane %v3060_v32, %v4076_v34  ;;  %v3127_v56 = vrot.slane %v3110_v24, %v4076_v34 }
 0x324   :  { %2486 = vmatpush1.bf16.msra.mxu0 %v985_v45  ;;  %2814 = vmatpush1.bf16.msra.mxu1 %v987_v39  ;;  %v332_v45 = vld [vmem:[#allocation6 + $0x6f8] sm:$0xff]  ;;  %v3065_v39 = vrot.slane %v3060_v32, %v4067_v16 }
 0x325   :  { %2487 = vmatprep.subr.bf16.mxu0 %v994_v40  ;;  %2815 = vmatprep.subr.bf16.mxu1 %v996_v41  ;;  %v3073_v40 = vrot.slane %v3060_v32, %v4070_v27  ;;  %v3069_v41 = vrot.slane %v3060_v32, %v4073_v33  ;;  %v1060_v35 = vunpack.c.l.s8.bf16 %v332_v45 }
 0x328   :  { %2488 = vmatpush1.bf16.msra.mxu0 %v993_v50  ;;  %2816 = vmatpush1.bf16.msra.mxu1 %v995_v48  ;;  %v1051_v50 = vunpack.c.h.s8.bf16 %v323_v21  ;;  %v3115_v48 = vrot.slane %v3110_v24, %v4067_v16 }
 0x329   :  { %2489 = vmatprep.subr.bf16.mxu0 %v1002_v49  ;;  %2817 = vmatprep.subr.bf16.mxu1 %v1004_v30  ;;  %v3123_v49 = vrot.slane %v3110_v24, %v4070_v27  ;;  %v1058_v30 = vunpack.c.l.s8.bf16 %v330_v37 }
 0x32c   :  { %2490 = vmatpush1.bf16.msra.mxu0 %v1001_v61  ;;  %2818 = vmatpush1.bf16.msra.mxu1 %v1003_v53  ;;  %v331_v61 = vld [vmem:[#allocation6 + $0x6f0] sm:$0xff] }
 0x32d   :  { %2500 = vmatprep.subr.bf16.mxu0 %v1010_v54  ;;  %2828 = vmatprep.subr.bf16.mxu1 %v1012_v55  ;;  %v3119_v55 = vrot.slane %v3110_v24, %v4073_v33  ;;  %v1067_v21 = vunpack.c.h.s8.bf16 %v331_v61  ;;  %v339_v24 = vld [vmem:[#allocation6 + $0x730] sm:$0xff] }
 0x32f   :  { %2492 = vmatmul.mubr.bf16.vlgmr.msra.gmra.mrb[4].mxu0 %v3976_v60  ;;  %2820 = vmatmul.mubr.bf16.vlgmr.msra.gmra.mrb[4].mxu1 %v3976_v60  ;;  %v1034_v60 = vunpack.c.h.s8.bf16 %v314_v0 }
 0x330   :  { %2501 = vmatpush1.bf16.msra.mxu0 %v1009_v58  ;;  %2829 = vmatpush1.bf16.msra.mxu1 %v1011_v59 }
 0x331   :  { %2502 = vmatprep.subr.bf16.mxu0 %v1018_v62  ;;  %2830 = vmatprep.subr.bf16.mxu1 %v1020_v63 }
 0x332   :  { %2532 = vmatprep.mubr.bf16.mxu0 %v3982_v4  ;;  %2860 = vmatprep.mubr.bf16.mxu1 %v3982_v4  ;;  %v1042_v4 = vunpack.c.l.s8.bf16 %v322_v12  ;;  %v338_v12 = vld [vmem:[#allocation6 + $0x728] sm:$0xff] }
 0x333   :  { %v1074_v32 = vunpack.c.l.s8.bf16 %v338_v12 }
 0x334   :  { %2503 = vmatpush1.bf16.msra.mxu0 %v1017_v2  ;;  %2831 = vmatpush1.bf16.msra.mxu1 %v1019_v3  ;;  %v1057_v3 = vunpack.c.l.s8.bf16 %v329_v51 }
 0x335   :  { %2504 = vmatprep.subr.bf16.mxu0 %v1026_v17  ;;  %2832 = vmatprep.subr.bf16.mxu1 %v1028_v5  ;;  %v1059_v17 = vunpack.c.l.s8.bf16 %v331_v61 }
 0x338   :  { %2505 = vmatpush1.bf16.msra.mxu0 %v1025_v9  ;;  %2833 = vmatpush1.bf16.msra.mxu1 %v1027_v10  ;;  %v1066_v9 = vunpack.c.h.s8.bf16 %v330_v37  ;;  %v1068_v10 = vunpack.c.h.s8.bf16 %v332_v45 }
 0x339   :  { %2506 = vmatprep.subr.bf16.mxu0 %v1034_v60  ;;  %2834 = vmatprep.subr.bf16.mxu1 %v1036_v11 }
 0x33c   :  { %2507 = vmatpush1.bf16.msra.mxu0 %v1033_v22  ;;  %2835 = vmatpush1.bf16.msra.mxu1 %v1035_v23 }
 0x33d   :  { %2508 = vmatprep.subr.bf16.mxu0 %v1042_v4  ;;  %2836 = vmatprep.subr.bf16.mxu1 %v1044_v43 }
 0x340   :  { %2509 = vmatpush1.bf16.msra.mxu0 %v1041_v29  ;;  %2837 = vmatpush1.bf16.msra.mxu1 %v1043_v15 }
 0x341   :  { %2510 = vmatprep.subr.bf16.mxu0 %v1050_v42  ;;  %2838 = vmatprep.subr.bf16.mxu1 %v1052_v36  ;;  %v1076_v42 = vunpack.c.l.s8.bf16 %v340_v13  ;;  %v337_v36 = vld [vmem:[#allocation6 + $0x720] sm:$0xff] }
 0x342   :  { %v2042_v53 = vpop.f32.mrb[0].mxu0  ;;  %v2370_v54 = vpop.f32.mrb[0].mxu1 }
 0x343   :  { %v3102_v57 = vmul.f32 %v3065_v39, %v2042_v53  ;;  %v3104_v58 = vmul.f32 %v3073_v40, %v2370_v54  ;;  %v2044_v59 = vpop.f32.mrb[1].mxu0  ;;  %v2372_v62 = vpop.f32.mrb[1].mxu1  ;;  %v346_v53 = vld [vmem:[#allocation6 + $0x768] sm:$0xff]  ;;  %v348_v54 = vld [vmem:[#allocation6 + $0x778] sm:$0xff] }
 0x344   :  { %v3103_v63 = vmul.f32 %v3069_v41, %v2044_v59  ;;  %v3105_v0 = vmul.f32 %v3077_v46, %v2372_v62  ;;  %v2046_v1 = vpop.f32.mrb[2].mxu0  ;;  %v2374_v2 = vpop.f32.mrb[2].mxu1  ;;  %2511 = vmatpush1.bf16.msra.mxu0 %v1049_v47  ;;  %2839 = vmatpush1.bf16.msra.mxu1 %v1051_v50  ;;  %v1073_v47 = vunpack.c.l.s8.bf16 %v337_v36  ;;  %v1075_v50 = vunpack.c.l.s8.bf16 %v339_v24 }
 0x345   :  { %v4086_v5 = vadd.f32 %v3115_v48, %v3102_v57  ;;  %v4088_v6 = vadd.f32 %v3123_v49, %v3104_v58  ;;  %v2047_v7 = vpop.f32.mrb[3].mxu0  ;;  %v2375_v8 = vpop.f32.mrb[3].mxu1  ;;  %2512 = vmatprep.subr.bf16.mxu0 %v1058_v30  ;;  %2840 = vmatprep.subr.bf16.mxu1 %v1060_v35  ;;  %v1082_v30 = vunpack.c.h.s8.bf16 %v338_v12  ;;  %v1084_v35 = vunpack.c.h.s8.bf16 %v340_v13 }
 0x346   :  { %v4090_v60 = vadd.f32 %v3119_v55, %v3103_v63  ;;  %v4092_v11 = vadd.f32 %v3127_v56, %v3105_v0  ;;  %v1081_v59 = vunpack.c.h.s8.bf16 %v337_v36  ;;  %v1083_v62 = vunpack.c.h.s8.bf16 %v339_v24 }
 0x347   :  { %v3162_v22 = vrot.slane %v4086_v5, 4  ;;  %v3174_v23 = vrot.slane %v4088_v6, 4  ;;  %v1090_v1 = vunpack.c.l.s8.bf16 %v346_v53  ;;  %v1092_v2 = vunpack.c.l.s8.bf16 %v348_v54 }
 0x348   :  { %v3168_v4 = vrot.slane %v4090_v60, 4  ;;  %v3180_v43 = vrot.slane %v4092_v11, 4  ;;  %2513 = vmatpush1.bf16.msra.mxu0 %v1057_v3  ;;  %2841 = vmatpush1.bf16.msra.mxu1 %v1059_v17  ;;  %v345_v3 = vld [vmem:[#allocation6 + $0x760] sm:$0xff]  ;;  %v347_v17 = vld [vmem:[#allocation6 + $0x770] sm:$0xff] }
 0x349   :  { %v3163_v29 = vadd.f32 %v3162_v22, %v4086_v5  ;;  %v3175_v15 = vadd.f32 %v3174_v23, %v4088_v6  ;;  %2514 = vmatprep.subr.bf16.mxu0 %v1066_v9  ;;  %2842 = vmatprep.subr.bf16.mxu1 %v1068_v10  ;;  %v1089_v22 = vunpack.c.l.s8.bf16 %v345_v3  ;;  %v1091_v23 = vunpack.c.l.s8.bf16 %v347_v17 }
 0x34a   :  { %v3169_v37 = vadd.f32 %v3168_v4, %v4090_v60  ;;  %v3181_v45 = vadd.f32 %v3180_v43, %v4092_v11 }
 0x34b   :  { %v3164_v39 = vrot.slane %v3163_v29, 2  ;;  %v3176_v40 = vrot.slane %v3175_v15, 2 }
 0x34c   :  { %v3170_v41 = vrot.slane %v3169_v37, 2  ;;  %v3182_v46 = vrot.slane %v3181_v45, 2  ;;  %2515 = vmatpush1.bf16.msra.mxu0 %v1065_v25  ;;  %2843 = vmatpush1.bf16.msra.mxu1 %v1067_v21  ;;  %v1098_v25 = vunpack.c.h.s8.bf16 %v346_v53  ;;  %v1100_v21 = vunpack.c.h.s8.bf16 %v348_v54 }
 0x34d   :  { %v3165_v48 = vadd.f32 %v3164_v39, %v3163_v29  ;;  %v3177_v49 = vadd.f32 %v3176_v40, %v3175_v15  ;;  %2516 = vmatprep.subr.bf16.mxu0 %v1074_v32  ;;  %2844 = vmatprep.subr.bf16.mxu1 %v1076_v42  ;;  %v354_v32 = vld [vmem:[#allocation6 + $0x7a8] sm:$0xff]  ;;  %v356_v42 = vld [vmem:[#allocation6 + $0x7b8] sm:$0xff] }
 0x34e   :  { %v3171_v51 = vadd.f32 %v3170_v41, %v3169_v37  ;;  %v3183_v61 = vadd.f32 %v3182_v46, %v3181_v45  ;;  %v1099_v37 = vunpack.c.h.s8.bf16 %v347_v17  ;;  %v1106_v39 = vunpack.c.l.s8.bf16 %v354_v32  ;;  %v353_v41 = vld [vmem:[#allocation6 + $0x7a0] sm:$0xff]  ;;  %v355_v46 = vld [vmem:[#allocation6 + $0x7b0] sm:$0xff] }
 0x34f   :  { %v3166_v55 = vrot.slane %v3165_v48, 1  ;;  %v3178_v56 = vrot.slane %v3177_v49, 1  ;;  %v1108_v40 = vunpack.c.l.s8.bf16 %v356_v42  ;;  %v1115_v17 = vunpack.c.h.s8.bf16 %v355_v46 }
 0x350   :  { %v3172_v57 = vrot.slane %v3171_v51, 1  ;;  %v3184_v58 = vrot.slane %v3183_v61, 1  ;;  %2517 = vmatpush1.bf16.msra.mxu0 %v1073_v47  ;;  %2845 = vmatpush1.bf16.msra.mxu1 %v1075_v50 }
 0x351   :  { %v3167_v63 = vadd.f32 %v3166_v55, %v3165_v48  ;;  %v3179_v0 = vadd.f32 %v3178_v56, %v3177_v49  ;;  %2518 = vmatprep.subr.bf16.mxu0 %v1082_v30  ;;  %2846 = vmatprep.subr.bf16.mxu1 %v1084_v35  ;;  %v1114_v55 = vunpack.c.h.s8.bf16 %v354_v32  ;;  %v1116_v56 = vunpack.c.h.s8.bf16 %v356_v42 }
 0x352   :  { %v3173_v7 = vadd.f32 %v3172_v57, %v3171_v51  ;;  %v3185_v8 = vadd.f32 %v3184_v58, %v3183_v61  ;;  %v1105_v51 = vunpack.c.l.s8.bf16 %v353_v41  ;;  %v1107_v61 = vunpack.c.l.s8.bf16 %v355_v46 }
 0x353   :  { %v3211_v9 = vmul.f32 0.125, %v3167_v63  ;;  %v3213_v10 = vmul.f32 0.125, %v3179_v0 }
 0x354   :  { %v3212_v12 = vmul.f32 0.125, %v3173_v7  ;;  %v3214_v13 = vmul.f32 0.125, %v3185_v8  ;;  %2519 = vmatpush1.bf16.msra.mxu0 %v1081_v59  ;;  %2847 = vmatpush1.bf16.msra.mxu1 %v1083_v62  ;;  %v362_v59 = vld [vmem:[#allocation6 + $0x7e8] sm:$0xff]  ;;  %v364_v62 = vld [vmem:[#allocation6 + $0x7f8] sm:$0xff] }
 0x355   :  { %v4103_v4 = vsub.f32 %v4086_v5, %v3211_v9  ;;  %v4106_v43 = vsub.f32 %v4088_v6, %v3213_v10  ;;  %2520 = vmatprep.subr.bf16.mxu0 %v1090_v1  ;;  %2848 = vmatprep.subr.bf16.mxu1 %v1092_v2  ;;  %v1122_v9 = vunpack.c.l.s8.bf16 %v362_v59  ;;  %v1124_v10 = vunpack.c.l.s8.bf16 %v364_v62 }
 0x356   :  { %v4109_v29 = vsub.f32 %v4090_v60, %v3212_v12  ;;  %v4112_v15 = vsub.f32 %v4092_v11, %v3214_v13  ;;  %v1097_v60 = vunpack.c.h.s8.bf16 %v345_v3  ;;  %v1113_v3 = vunpack.c.h.s8.bf16 %v353_v41  ;;  %v361_v12 = vld [vmem:[#allocation6 + $0x7e0] sm:$0xff]  ;;  %v363_v13 = vld [vmem:[#allocation6 + $0x7f0] sm:$0xff] }
 0x357   :  { %v3227_v36 = vmul.f32 %v4103_v4, %v4103_v4  ;;  %v3229_v5 = vmul.f32 %v4106_v43, %v4106_v43 }
 0x358   :  { %v3228_v6 = vmul.f32 %v4109_v29, %v4109_v29  ;;  %v3230_v24 = vmul.f32 %v4112_v15, %v4112_v15  ;;  %2521 = vmatpush1.bf16.msra.mxu0 %v1089_v22  ;;  %2849 = vmatpush1.bf16.msra.mxu1 %v1091_v23 }
 0x359   :  { %v3235_v11 = vrot.slane %v3227_v36, 4  ;;  %v3247_v45 = vrot.slane %v3229_v5, 4  ;;  %2522 = vmatprep.subr.bf16.mxu0 %v1098_v25  ;;  %2850 = vmatprep.subr.bf16.mxu1 %v1100_v21 }
 0x35a   :  { %v3241_v47 = vrot.slane %v3228_v6, 4  ;;  %v3253_v50 = vrot.slane %v3230_v24, 4 }
 0x35b   :  { %v3236_v48 = vadd.f32 %v3235_v11, %v3227_v36  ;;  %v3248_v49 = vadd.f32 %v3247_v45, %v3229_v5  ;;  %v1121_v36 = vunpack.c.l.s8.bf16 %v361_v12  ;;  %v1123_v5 = vunpack.c.l.s8.bf16 %v363_v13 }
 0x35c   :  { %v3242_v30 = vadd.f32 %v3241_v47, %v3228_v6  ;;  %v3254_v35 = vadd.f32 %v3253_v50, %v3230_v24  ;;  %2523 = vmatpush1.bf16.msra.mxu0 %v1097_v60  ;;  %2851 = vmatpush1.bf16.msra.mxu1 %v1099_v37  ;;  %v1130_v60 = vunpack.c.h.s8.bf16 %v362_v59  ;;  %v1132_v37 = vunpack.c.h.s8.bf16 %v364_v62  ;;  %v3160_v59 = vld [vmem:[#allocation11] sm:$0xff] }
 0x35d   :  { %v3237_v53 = vrot.slane %v3236_v48, 2  ;;  %v3249_v54 = vrot.slane %v3248_v49, 2  ;;  %2524 = vmatprep.subr.bf16.mxu0 %v1106_v39  ;;  %2852 = vmatprep.subr.bf16.mxu1 %v1108_v40  ;;  %v370_v39 = vld [vmem:[#allocation6 + $0x828] sm:$0xff]  ;;  %v372_v40 = vld [vmem:[#allocation6 + $0x838] sm:$0xff] }
 0x35e   :  { %v3243_v57 = vrot.slane %v3242_v30, 2  ;;  %v3255_v58 = vrot.slane %v3254_v35, 2 }
 0x35f   :  { %v3238_v63 = vadd.f32 %v3237_v53, %v3236_v48  ;;  %v3250_v0 = vadd.f32 %v3249_v54, %v3248_v49  ;;  %v1129_v48 = vunpack.c.h.s8.bf16 %v361_v12  ;;  %v1131_v49 = vunpack.c.h.s8.bf16 %v363_v13 }
 0x360   :  { %v3244_v1 = vadd.f32 %v3243_v57, %v3242_v30  ;;  %v3256_v2 = vadd.f32 %v3255_v58, %v3254_v35  ;;  %2525 = vmatpush1.bf16.msra.mxu0 %v1105_v51  ;;  %2853 = vmatpush1.bf16.msra.mxu1 %v1107_v61  ;;  %v1138_v30 = vunpack.c.l.s8.bf16 %v370_v39  ;;  %v1140_v35 = vunpack.c.l.s8.bf16 %v372_v40  ;;  %v369_v51 = vld [vmem:[#allocation6 + $0x820] sm:$0xff]  ;;  %v371_v61 = vld [vmem:[#allocation6 + $0x830] sm:$0xff]  ;;  %v378_v57 = vld [vmem:[#allocation6 + $0x868] sm:$0xff] }
 0x361   :  { %v3239_v7 = vrot.slane %v3238_v63, 1  ;;  %v3251_v8 = vrot.slane %v3250_v0, 1  ;;  %2526 = vmatprep.subr.bf16.mxu0 %v1114_v55  ;;  %2854 = vmatprep.subr.bf16.mxu1 %v1116_v56  ;;  %v1137_v53 = vunpack.c.l.s8.bf16 %v369_v51  ;;  %v1139_v54 = vunpack.c.l.s8.bf16 %v371_v61  ;;  %v380_v58 = vld [vmem:[#allocation6 + $0x878] sm:$0xff] }
 0x362   :  { %v3245_v22 = vrot.slane %v3244_v1, 1  ;;  %v3257_v23 = vrot.slane %v3256_v2, 1  ;;  %v1146_v55 = vunpack.c.h.s8.bf16 %v370_v39  ;;  %v1148_v56 = vunpack.c.h.s8.bf16 %v372_v40 }
 0x363   :  { %v3240_v25 = vadd.f32 %v3239_v7, %v3238_v63  ;;  %v3252_v21 = vadd.f32 %v3251_v8, %v3250_v0  ;;  %v1145_v62 = vunpack.c.h.s8.bf16 %v369_v51  ;;  %v1147_v63 = vunpack.c.h.s8.bf16 %v371_v61 }
 0x364   :  { %v3246_v32 = vadd.f32 %v3245_v22, %v3244_v1  ;;  %v3258_v42 = vadd.f32 %v3257_v23, %v3256_v2  ;;  %2527 = vmatpush1.bf16.msra.mxu0 %v1113_v3  ;;  %2855 = vmatpush1.bf16.msra.mxu1 %v1115_v17  ;;  %v1154_v0 = vunpack.c.l.s8.bf16 %v378_v57  ;;  %v1156_v1 = vunpack.c.l.s8.bf16 %v380_v58  ;;  %v377_v2 = vld [vmem:[#allocation6 + $0x860] sm:$0xff]  ;;  %v379_v3 = vld [vmem:[#allocation6 + $0x870] sm:$0xff]  ;;  %v3161_v17 = vld [vmem:[#allocation12] sm:$0xff] }
 0x365   :  { %v3283_v6 = vmul.f32 0.125, %v3240_v25  ;;  %v3285_v24 = vmul.f32 0.125, %v3252_v21  ;;  %2528 = vmatprep.subr.bf16.mxu0 %v1122_v9  ;;  %2856 = vmatprep.subr.bf16.mxu1 %v1124_v10  ;;  %v3319_v7 = vrot.slane %v3160_v59, %v4067_v16  ;;  %v3323_v9 = vrot.slane %v3160_v59, %v4073_v33 }
 0x366   :  { %v3284_v11 = vmul.f32 0.125, %v3246_v32  ;;  %v3286_v45 = vmul.f32 0.125, %v3258_v42  ;;  %v3331_v10 = vrot.slane %v3160_v59, %v4076_v34  ;;  %v1153_v22 = vunpack.c.l.s8.bf16 %v377_v2 }
 0x367   :  { %v3291_v41 = vadd.f32 1e-05, %v3283_v6  ;;  %v3293_v46 = vadd.f32 1e-05, %v3285_v24  ;;  %v1155_v23 = vunpack.c.l.s8.bf16 %v379_v3  ;;  %v3368_v25 = vrot.slane %v3161_v17, %v4067_v16 }
 0x368   :  { %v3292_v47 = vadd.f32 1e-05, %v3284_v11  ;;  %v3294_v50 = vadd.f32 1e-05, %v3286_v45  ;;  %2529 = vmatpush1.bf16.msra.mxu0 %v1121_v36  ;;  %2857 = vmatpush1.bf16.msra.mxu1 %v1123_v5  ;;  %v1164_v42 = vunpack.c.h.s8.bf16 %v380_v58  ;;  %v3376_v36 = vrot.slane %v3161_v17, %v4070_v27 }
 0x369   :  { %3638 = vrsqrt.f32 %v3291_v41  ;;  %2530 = vmatprep.subr.bf16.mxu0 %v1130_v60  ;;  %2858 = vmatprep.subr.bf16.mxu1 %v1132_v37  ;;  %v388_v60 = vld [vmem:[#allocation6 + $0x8b8] sm:$0xff]  ;;  %v3372_v37 = vrot.slane %v3161_v17, %v4073_v33  ;;  %v3380_v45 = vrot.slane %v3161_v17, %v4076_v34  ;;  %v1161_v39 = vunpack.c.h.s8.bf16 %v377_v2  ;;  %v395_v2 = vld [vmem:[#allocation6 + $0x8f0] sm:$0xff] }
 0x36a   :  { %3640 = vrsqrt.f32 %v3293_v46  ;;  %v1163_v40 = vunpack.c.h.s8.bf16 %v379_v3  ;;  %v1187_v17 = vunpack.c.l.s8.bf16 %v395_v2 }
 0x36b   :  { %3642 = vrsqrt.f32 %v3292_v47  ;;  %v385_v47 = vld [vmem:[#allocation6 + $0x8a0] sm:$0xff] }
 0x36c   :  { %3644 = vrsqrt.f32 %v3294_v50  ;;  %2531 = vmatpush1.bf16.msra.mxu0 %v1129_v48  ;;  %2859 = vmatpush1.bf16.msra.mxu1 %v1131_v49  ;;  %v387_v50 = vld [vmem:[#allocation6 + $0x8b0] sm:$0xff]  ;;  %v1169_v34 = vunpack.c.l.s8.bf16 %v385_v47 }
 0x36d   :  { %2541 = vmatprep.subr.bf16.mxu0 %v1138_v30  ;;  %2869 = vmatprep.subr.bf16.mxu1 %v1140_v35  ;;  %v1171_v35 = vunpack.c.l.s8.bf16 %v387_v50 }
 0x36f   :  { %2533 = vmatmul.mubr.bf16.vlgmr.msra.gmra.mrb[4].mxu0 %v3990_v44  ;;  %2861 = vmatmul.mubr.bf16.vlgmr.msra.gmra.mrb[4].mxu1 %v3990_v44  ;;  %v3327_v44 = vrot.slane %v3160_v59, %v4070_v27  ;;  %v1177_v59 = vunpack.c.h.s8.bf16 %v385_v47 }
 0x370   :  { %2542 = vmatpush1.bf16.msra.mxu0 %v1137_v53  ;;  %2870 = vmatpush1.bf16.msra.mxu1 %v1139_v54  ;;  %v1180_v53 = vunpack.c.h.s8.bf16 %v388_v60 }
 0x371   :  { %2543 = vmatprep.subr.bf16.mxu0 %v1146_v55  ;;  %2871 = vmatprep.subr.bf16.mxu1 %v1148_v56  ;;  %v394_v55 = vld [vmem:[#allocation6 + $0x8e8] sm:$0xff]  ;;  %v396_v56 = vld [vmem:[#allocation6 + $0x8f8] sm:$0xff] }
 0x372   :  { %2573 = vmatprep.mubr.bf16.mxu0 %v3996_v52  ;;  %2901 = vmatprep.mubr.bf16.mxu1 %v3996_v52  ;;  %v1162_v52 = vunpack.c.h.s8.bf16 %v378_v57 }
 0x373   :  { %v3639_v8 = vpop.eup %3638 }
 0x374   :  { %v3641_v12 = vpop.eup %3640  ;;  %v3307_v13 = vmul.f32 %v3639_v8, %v4103_v4  ;;  %2544 = vmatpush1.bf16.msra.mxu0 %v1145_v62  ;;  %2872 = vmatpush1.bf16.msra.mxu1 %v1147_v63  ;;  %v386_v4 = vld [vmem:[#allocation6 + $0x8a8] sm:$0xff]  ;;  %v1179_v62 = vunpack.c.h.s8.bf16 %v387_v50  ;;  %v1186_v63 = vunpack.c.l.s8.bf16 %v394_v55  ;;  %v1196_v8 = vunpack.c.h.s8.bf16 %v396_v56  ;;  %v417_v50 = vld [vmem:[#allocation6 + $0x9a0] sm:$0xff] }
 0x375   :  { %v3643_v21 = vpop.eup %3642  ;;  %v3309_v32 = vmul.f32 %v3641_v12, %v4106_v43  ;;  %2545 = vmatprep.subr.bf16.mxu0 %v1154_v0  ;;  %2873 = vmatprep.subr.bf16.mxu1 %v1156_v1  ;;  %v1170_v46 = vunpack.c.l.s8.bf16 %v386_v4  ;;  %v1178_v61 = vunpack.c.h.s8.bf16 %v386_v4  ;;  %v1188_v0 = vunpack.c.l.s8.bf16 %v396_v56  ;;  %v393_v1 = vld [vmem:[#allocation6 + $0x8e0] sm:$0xff]  ;;  %v427_v56 = vld [vmem:[#allocation6 + $0x9f0] sm:$0xff] }
 0x376   :  { %v3645_v5 = vpop.eup %3644  ;;  %v3356_v6 = vmul.f32 %v3319_v7, %v3307_v13  ;;  %v3308_v24 = vmul.f32 %v3643_v21, %v4109_v29  ;;  %v1172_v29 = vunpack.c.l.s8.bf16 %v388_v60  ;;  %v1185_v3 = vunpack.c.l.s8.bf16 %v393_v1 }
 0x377   :  { %v3358_v11 = vmul.f32 %v3327_v44, %v3309_v32  ;;  %v3310_v16 = vmul.f32 %v3645_v5, %v4112_v15  ;;  %v1194_v7 = vunpack.c.h.s8.bf16 %v394_v55  ;;  %v402_v44 = vld [vmem:[#allocation6 + $0x928] sm:$0xff]  ;;  %v1195_v12 = vunpack.c.h.s8.bf16 %v395_v2  ;;  %v412_v5 = vld [vmem:[#allocation6 + $0x978] sm:$0xff]  ;;  %v425_v55 = vld [vmem:[#allocation6 + $0x9e0] sm:$0xff] }
 0x378   :  { %v3357_v43 = vmul.f32 %v3323_v9, %v3308_v24  ;;  %2546 = vmatpush1.bf16.msra.mxu0 %v1153_v22  ;;  %2874 = vmatpush1.bf16.msra.mxu1 %v1155_v23  ;;  %v3405_v41 = vadd.f32 %v3368_v25, %v3356_v6  ;;  %v404_v9 = vld [vmem:[#allocation6 + $0x938] sm:$0xff]  ;;  %v1202_v13 = vunpack.c.l.s8.bf16 %v402_v44  ;;  %v401_v23 = vld [vmem:[#allocation6 + $0x920] sm:$0xff]  ;;  %v403_v25 = vld [vmem:[#allocation6 + $0x930] sm:$0xff]  ;;  %v1220_v60 = vunpack.c.l.s8.bf16 %v412_v5 }
 0x379   :  { %v3359_v27 = vmul.f32 %v3331_v10, %v3310_v16  ;;  %2547 = vmatprep.subr.bf16.mxu0 %v1162_v52  ;;  %2875 = vmatprep.subr.bf16.mxu1 %v1164_v42  ;;  %v3407_v48 = vadd.f32 %v3376_v36, %v3358_v11  ;;  %v1193_v10 = vunpack.c.h.s8.bf16 %v393_v1  ;;  %v1204_v22 = vunpack.c.l.s8.bf16 %v404_v9  ;;  %v410_v36 = vld [vmem:[#allocation6 + $0x968] sm:$0xff]  ;;  %v411_v11 = vld [vmem:[#allocation6 + $0x970] sm:$0xff] }
 0x37a   :  { %v3406_v33 = vadd.f32 %v3372_v37, %v3357_v43  ;;  %v3413_v49 = vmax.f32 %v3405_v41, 0.0  ;;  %v1201_v21 = vunpack.c.l.s8.bf16 %v401_v23  ;;  %v1203_v32 = vunpack.c.l.s8.bf16 %v403_v25  ;;  %v409_v37 = vld [vmem:[#allocation6 + $0x960] sm:$0xff]  ;;  %v420_v41 = vld [vmem:[#allocation6 + $0x9b8] sm:$0xff] }
 0x37b   :  { %v3408_v30 = vadd.f32 %v3380_v45, %v3359_v27  ;;  %v3415_v15 = vmax.f32 %v3407_v48, 0.0  ;;  %v1210_v52 = vunpack.c.h.s8.bf16 %v402_v44  ;;  %v1212_v42 = vunpack.c.h.s8.bf16 %v404_v9  ;;  %v419_v48 = vld [vmem:[#allocation6 + $0x9b0] sm:$0xff] }
 0x37c   :  { %2548 = vmatpush1.bf16.msra.mxu0 %v1161_v39  ;;  %2876 = vmatpush1.bf16.msra.mxu1 %v1163_v40  ;;  %v3414_v51 = vmax.f32 %v3406_v33, 0.0  ;;  %v1209_v6 = vunpack.c.h.s8.bf16 %v401_v23  ;;  %v1211_v24 = vunpack.c.h.s8.bf16 %v403_v25  ;;  %v1218_v4 = vunpack.c.l.s8.bf16 %v410_v36  ;;  %v418_v40 = vld [vmem:[#allocation6 + $0x9a8] sm:$0xff] }
 0x37d   :  { %2549 = vmatprep.subr.bf16.mxu0 %v1170_v46  ;;  %2877 = vmatprep.subr.bf16.mxu1 %v1172_v29  ;;  %v3416_v54 = vmax.f32 %v3408_v30, 0.0  ;;  %v1217_v16 = vunpack.c.l.s8.bf16 %v409_v37  ;;  %v1219_v45 = vunpack.c.l.s8.bf16 %v411_v11  ;;  %v1226_v43 = vunpack.c.h.s8.bf16 %v410_v36 }
 0x37e   :  { %v3497_v57 = vpack.c.bf16 %v3414_v51, %v3413_v49  ;;  %v1228_v39 = vunpack.c.h.s8.bf16 %v412_v5  ;;  %v1225_v27 = vunpack.c.h.s8.bf16 %v409_v37  ;;  %v1227_v46 = vunpack.c.h.s8.bf16 %v411_v11 }
 0x37f   :  { %v3498_v58 = vpack.c.bf16 %v3416_v54, %v3415_v15  ;;  %v1234_v29 = vunpack.c.l.s8.bf16 %v418_v40  ;;  %v1236_v47 = vunpack.c.l.s8.bf16 %v420_v41  ;;  %v1233_v33 = vunpack.c.l.s8.bf16 %v417_v50 }
 0x380   :  { %2550 = vmatpush1.bf16.msra.mxu0 %v1169_v34  ;;  %2878 = vmatpush1.bf16.msra.mxu1 %v1171_v35  ;;  %3453 = vst [vmem:[#allocation14] sm:$0xff] %v3497_v57  ;;  %v1235_v49 = vunpack.c.l.s8.bf16 %v419_v48  ;;  %v1242_v30 = vunpack.c.h.s8.bf16 %v418_v40  ;;  %v1244_v15 = vunpack.c.h.s8.bf16 %v420_v41  ;;  %v426_v34 = vld [vmem:[#allocation6 + $0x9e8] sm:$0xff]  ;;  %v428_v35 = vld [vmem:[#allocation6 + $0x9f8] sm:$0xff]  ;;  %v1241_v51 = vunpack.c.h.s8.bf16 %v417_v50 }
 0x381   :  { %2551 = vmatprep.subr.bf16.mxu0 %v1178_v61  ;;  %2879 = vmatprep.subr.bf16.mxu1 %v1180_v53  ;;  %3454 = vst [vmem:[#allocation14 + $0x8] sm:$0xff] %v3498_v58  ;;  %v1243_v61 = vunpack.c.h.s8.bf16 %v419_v48  ;;  %v1250_v53 = vunpack.c.l.s8.bf16 %v426_v34  ;;  %v1252_v54 = vunpack.c.l.s8.bf16 %v428_v35  ;;  %v1249_v57 = vunpack.c.l.s8.bf16 %v425_v55 }
 0x382   :  { %v1251_v58 = vunpack.c.l.s8.bf16 %v427_v56  ;;  %v1257_v1 = vunpack.c.h.s8.bf16 %v425_v55  ;;  %v1259_v2 = vunpack.c.h.s8.bf16 %v427_v56 }
 0x384   :  { %2552 = vmatpush1.bf16.msra.mxu0 %v1177_v59  ;;  %2880 = vmatpush1.bf16.msra.mxu1 %v1179_v62  ;;  %v1258_v59 = vunpack.c.h.s8.bf16 %v426_v34  ;;  %v1260_v62 = vunpack.c.h.s8.bf16 %v428_v35 }
 0x385   :  { %2553 = vmatprep.subr.bf16.mxu0 %v1186_v63  ;;  %2881 = vmatprep.subr.bf16.mxu1 %v1188_v0  ;;  %v434_v63 = vld [vmem:[#allocation6 + $0xa28] sm:$0xff]  ;;  %v436_v0 = vld [vmem:[#allocation6 + $0xa38] sm:$0xff] }
 0x388   :  { %2554 = vmatpush1.bf16.msra.mxu0 %v1185_v3  ;;  %2882 = vmatpush1.bf16.msra.mxu1 %v1187_v17  ;;  %v1266_v3 = vunpack.c.l.s8.bf16 %v434_v63  ;;  %v1268_v17 = vunpack.c.l.s8.bf16 %v436_v0 }
 0x389   :  { %2555 = vmatprep.subr.bf16.mxu0 %v1194_v7  ;;  %2883 = vmatprep.subr.bf16.mxu1 %v1196_v8  ;;  %v433_v7 = vld [vmem:[#allocation6 + $0xa20] sm:$0xff]  ;;  %v435_v8 = vld [vmem:[#allocation6 + $0xa30] sm:$0xff] }
 0x38a   :  { %v1265_v44 = vunpack.c.l.s8.bf16 %v433_v7  ;;  %v1267_v9 = vunpack.c.l.s8.bf16 %v435_v8  ;;  %v1273_v23 = vunpack.c.h.s8.bf16 %v433_v7  ;;  %v1275_v25 = vunpack.c.h.s8.bf16 %v435_v8 }
 0x38c   :  { %2556 = vmatpush1.bf16.msra.mxu0 %v1193_v10  ;;  %2884 = vmatpush1.bf16.msra.mxu1 %v1195_v12  ;;  %v1274_v10 = vunpack.c.h.s8.bf16 %v434_v63  ;;  %v1276_v12 = vunpack.c.h.s8.bf16 %v436_v0 }
 0x38d   :  { %2557 = vmatprep.subr.bf16.mxu0 %v1202_v13  ;;  %2885 = vmatprep.subr.bf16.mxu1 %v1204_v22  ;;  %v442_v13 = vld [vmem:[#allocation6 + $0xa68] sm:$0xff]  ;;  %v444_v22 = vld [vmem:[#allocation6 + $0xa78] sm:$0xff] }
 0x390   :  { %2558 = vmatpush1.bf16.msra.mxu0 %v1201_v21  ;;  %2886 = vmatpush1.bf16.msra.mxu1 %v1203_v32  ;;  %v1282_v21 = vunpack.c.l.s8.bf16 %v442_v13  ;;  %v1284_v32 = vunpack.c.l.s8.bf16 %v444_v22 }
 0x391   :  { %2559 = vmatprep.subr.bf16.mxu0 %v1210_v52  ;;  %2887 = vmatprep.subr.bf16.mxu1 %v1212_v42  ;;  %v441_v52 = vld [vmem:[#allocation6 + $0xa60] sm:$0xff]  ;;  %v443_v42 = vld [vmem:[#allocation6 + $0xa70] sm:$0xff] }
 0x392   :  { %v1281_v36 = vunpack.c.l.s8.bf16 %v441_v52  ;;  %v1283_v5 = vunpack.c.l.s8.bf16 %v443_v42  ;;  %v1291_v37 = vunpack.c.h.s8.bf16 %v443_v42 }
 0x394   :  { %2560 = vmatpush1.bf16.msra.mxu0 %v1209_v6  ;;  %2888 = vmatpush1.bf16.msra.mxu1 %v1211_v24  ;;  %v1292_v6 = vunpack.c.h.s8.bf16 %v444_v22  ;;  %v450_v24 = vld [vmem:[#allocation6 + $0xaa8] sm:$0xff] }
 0x395   :  { %2561 = vmatprep.subr.bf16.mxu0 %v1218_v4  ;;  %2889 = vmatprep.subr.bf16.mxu1 %v1220_v60  ;;  %v452_v4 = vld [vmem:[#allocation6 + $0xab8] sm:$0xff]  ;;  %v1289_v60 = vunpack.c.h.s8.bf16 %v441_v52  ;;  %v1298_v11 = vunpack.c.l.s8.bf16 %v450_v24  ;;  %v1306_v40 = vunpack.c.h.s8.bf16 %v450_v24 }
 0x396   :  { %v1308_v41 = vunpack.c.h.s8.bf16 %v452_v4 }
 0x398   :  { %2562 = vmatpush1.bf16.msra.mxu0 %v1217_v16  ;;  %2890 = vmatpush1.bf16.msra.mxu1 %v1219_v45  ;;  %v1300_v16 = vunpack.c.l.s8.bf16 %v452_v4  ;;  %v449_v45 = vld [vmem:[#allocation6 + $0xaa0] sm:$0xff] }
 0x399   :  { %2563 = vmatprep.subr.bf16.mxu0 %v1226_v43  ;;  %2891 = vmatprep.subr.bf16.mxu1 %v1228_v39  ;;  %v1297_v43 = vunpack.c.l.s8.bf16 %v449_v45 }
 0x39c   :  { %2564 = vmatpush1.bf16.msra.mxu0 %v1225_v27  ;;  %2892 = vmatpush1.bf16.msra.mxu1 %v1227_v46  ;;  %v458_v27 = vld [vmem:[#allocation6 + $0xae8] sm:$0xff]  ;;  %v460_v46 = vld [vmem:[#allocation6 + $0xaf8] sm:$0xff] }
 0x39d   :  { %2565 = vmatprep.subr.bf16.mxu0 %v1234_v29  ;;  %2893 = vmatprep.subr.bf16.mxu1 %v1236_v47  ;;  %v1305_v29 = vunpack.c.h.s8.bf16 %v449_v45  ;;  %v1314_v50 = vunpack.c.l.s8.bf16 %v458_v27  ;;  %v1316_v48 = vunpack.c.l.s8.bf16 %v460_v46  ;;  %v1322_v34 = vunpack.c.h.s8.bf16 %v458_v27 }
 0x39e   :  { %v1324_v35 = vunpack.c.h.s8.bf16 %v460_v46 }
 0x3a0   :  { %2566 = vmatpush1.bf16.msra.mxu0 %v1233_v33  ;;  %2894 = vmatpush1.bf16.msra.mxu1 %v1235_v49  ;;  %v457_v33 = vld [vmem:[#allocation6 + $0xae0] sm:$0xff]  ;;  %v459_v49 = vld [vmem:[#allocation6 + $0xaf0] sm:$0xff] }
 0x3a1   :  { %2567 = vmatprep.subr.bf16.mxu0 %v1242_v30  ;;  %2895 = vmatprep.subr.bf16.mxu1 %v1244_v15  ;;  %v1313_v30 = vunpack.c.l.s8.bf16 %v457_v33  ;;  %v1315_v15 = vunpack.c.l.s8.bf16 %v459_v49 }
 0x3a4   :  { %2568 = vmatpush1.bf16.msra.mxu0 %v1241_v51  ;;  %2896 = vmatpush1.bf16.msra.mxu1 %v1243_v61  ;;  %v466_v51 = vld [vmem:[#allocation6 + $0xb28] sm:$0xff]  ;;  %v468_v61 = vld [vmem:[#allocation6 + $0xb38] sm:$0xff] }
 0x3a5   :  { %2569 = vmatprep.subr.bf16.mxu0 %v1250_v53  ;;  %2897 = vmatprep.subr.bf16.mxu1 %v1252_v54  ;;  %v1321_v53 = vunpack.c.h.s8.bf16 %v457_v33  ;;  %v1323_v54 = vunpack.c.h.s8.bf16 %v459_v49  ;;  %v1330_v55 = vunpack.c.l.s8.bf16 %v466_v51  ;;  %v1332_v56 = vunpack.c.l.s8.bf16 %v468_v61 }
 0x3a6   :  { %v1338_v63 = vunpack.c.h.s8.bf16 %v466_v51  ;;  %v1340_v0 = vunpack.c.h.s8.bf16 %v468_v61 }
 0x3a8   :  { %2570 = vmatpush1.bf16.msra.mxu0 %v1249_v57  ;;  %2898 = vmatpush1.bf16.msra.mxu1 %v1251_v58  ;;  %v465_v57 = vld [vmem:[#allocation6 + $0xb20] sm:$0xff]  ;;  %v467_v58 = vld [vmem:[#allocation6 + $0xb30] sm:$0xff] }
 0x3a9   :  { %2571 = vmatprep.subr.bf16.mxu0 %v1258_v59  ;;  %2899 = vmatprep.subr.bf16.mxu1 %v1260_v62  ;;  %v1329_v59 = vunpack.c.l.s8.bf16 %v465_v57  ;;  %v1331_v62 = vunpack.c.l.s8.bf16 %v467_v58 }
 0x3ac   :  { %2572 = vmatpush1.bf16.msra.mxu0 %v1257_v1  ;;  %2900 = vmatpush1.bf16.msra.mxu1 %v1259_v2  ;;  %v474_v1 = vld [vmem:[#allocation6 + $0xb68] sm:$0xff]  ;;  %v476_v2 = vld [vmem:[#allocation6 + $0xb78] sm:$0xff] }
 0x3ad   :  { %2582 = vmatprep.subr.bf16.mxu0 %v1266_v3  ;;  %2910 = vmatprep.subr.bf16.mxu1 %v1268_v17  ;;  %v1337_v3 = vunpack.c.h.s8.bf16 %v465_v57  ;;  %v1339_v17 = vunpack.c.h.s8.bf16 %v467_v58  ;;  %v1346_v7 = vunpack.c.l.s8.bf16 %v474_v1  ;;  %v1348_v8 = vunpack.c.l.s8.bf16 %v476_v2 }
 0x3ae   :  { %v1356_v22 = vunpack.c.h.s8.bf16 %v476_v2  ;;  %v514_v2 = vld [vmem:[#allocation6 + $0xca8] sm:$0xff] }
 0x3af   :  { %2574 = vmatmul.mubr.bf16.vlgmr.msra.gmra.mrb[4].mxu0 %v4004_v28  ;;  %2902 = vmatmul.mubr.bf16.vlgmr.msra.gmra.mrb[4].mxu1 %v4004_v28  ;;  %v1290_v28 = vunpack.c.h.s8.bf16 %v442_v13  ;;  %v1354_v13 = vunpack.c.h.s8.bf16 %v474_v1 }
 0x3b0   :  { %2583 = vmatpush1.bf16.msra.mxu0 %v1265_v44  ;;  %2911 = vmatpush1.bf16.msra.mxu1 %v1267_v9  ;;  %v473_v44 = vld [vmem:[#allocation6 + $0xb60] sm:$0xff]  ;;  %v475_v9 = vld [vmem:[#allocation6 + $0xb70] sm:$0xff] }
 0x3b1   :  { %2584 = vmatprep.subr.bf16.mxu0 %v1274_v10  ;;  %2912 = vmatprep.subr.bf16.mxu1 %v1276_v12  ;;  %v1345_v10 = vunpack.c.l.s8.bf16 %v473_v44  ;;  %v1347_v12 = vunpack.c.l.s8.bf16 %v475_v9 }
 0x3b2   :  { %2614 = vmatprep.mubr.bf16.mxu0 %v4010_v38  ;;  %2942 = vmatprep.mubr.bf16.mxu1 %v4010_v38  ;;  %v451_v38 = vld [vmem:[#allocation6 + $0xab0] sm:$0xff] }
 0x3b3   :  { %v1299_v39 = vunpack.c.l.s8.bf16 %v451_v38  ;;  %v1307_v47 = vunpack.c.h.s8.bf16 %v451_v38 }
 0x3b4   :  { %2585 = vmatpush1.bf16.msra.mxu0 %v1273_v23  ;;  %2913 = vmatpush1.bf16.msra.mxu1 %v1275_v25  ;;  %v482_v23 = vld [vmem:[#allocation6 + $0xba8] sm:$0xff]  ;;  %v484_v25 = vld [vmem:[#allocation6 + $0xbb8] sm:$0xff] }
 0x3b5   :  { %2586 = vmatprep.subr.bf16.mxu0 %v1282_v21  ;;  %2914 = vmatprep.subr.bf16.mxu1 %v1284_v32  ;;  %v1353_v21 = vunpack.c.h.s8.bf16 %v473_v44  ;;  %v1355_v32 = vunpack.c.h.s8.bf16 %v475_v9  ;;  %v1362_v52 = vunpack.c.l.s8.bf16 %v482_v23  ;;  %v1364_v42 = vunpack.c.l.s8.bf16 %v484_v25  ;;  %v513_v9 = vld [vmem:[#allocation6 + $0xca0] sm:$0xff] }
 0x3b6   :  { %v1370_v24 = vunpack.c.h.s8.bf16 %v482_v23  ;;  %v1372_v4 = vunpack.c.h.s8.bf16 %v484_v25  ;;  %v522_v23 = vld [vmem:[#allocation6 + $0xce8] sm:$0xff]  ;;  %v524_v25 = vld [vmem:[#allocation6 + $0xcf8] sm:$0xff] }
 0x3b8   :  { %2587 = vmatpush1.bf16.msra.mxu0 %v1281_v36  ;;  %2915 = vmatpush1.bf16.msra.mxu1 %v1283_v5  ;;  %v481_v36 = vld [vmem:[#allocation6 + $0xba0] sm:$0xff]  ;;  %v483_v5 = vld [vmem:[#allocation6 + $0xbb0] sm:$0xff] }
 0x3b9   :  { %2588 = vmatprep.subr.bf16.mxu0 %v1290_v28  ;;  %2916 = vmatprep.subr.bf16.mxu1 %v1292_v6  ;;  %v1361_v28 = vunpack.c.l.s8.bf16 %v481_v36  ;;  %v1363_v6 = vunpack.c.l.s8.bf16 %v483_v5 }
 0x3bc   :  { %2589 = vmatpush1.bf16.msra.mxu0 %v1289_v60  ;;  %2917 = vmatpush1.bf16.msra.mxu1 %v1291_v37  ;;  %v490_v60 = vld [vmem:[#allocation6 + $0xbe8] sm:$0xff]  ;;  %v492_v37 = vld [vmem:[#allocation6 + $0xbf8] sm:$0xff] }
 0x3bd   :  { %2590 = vmatprep.subr.bf16.mxu0 %v1298_v11  ;;  %2918 = vmatprep.subr.bf16.mxu1 %v1300_v16  ;;  %v1369_v11 = vunpack.c.h.s8.bf16 %v481_v36  ;;  %v1371_v16 = vunpack.c.h.s8.bf16 %v483_v5  ;;  %v1378_v45 = vunpack.c.l.s8.bf16 %v490_v60  ;;  %v1380_v38 = vunpack.c.l.s8.bf16 %v492_v37  ;;  %v521_v36 = vld [vmem:[#allocation6 + $0xce0] sm:$0xff]  ;;  %v523_v5 = vld [vmem:[#allocation6 + $0xcf0] sm:$0xff] }
 0x3be   :  { %v1386_v27 = vunpack.c.h.s8.bf16 %v490_v60  ;;  %v1388_v46 = vunpack.c.h.s8.bf16 %v492_v37  ;;  %v530_v60 = vld [vmem:[#allocation6 + $0xd28] sm:$0xff]  ;;  %v532_v37 = vld [vmem:[#allocation6 + $0xd38] sm:$0xff] }
 0x3c0   :  { %2591 = vmatpush1.bf16.msra.mxu0 %v1297_v43  ;;  %2919 = vmatpush1.bf16.msra.mxu1 %v1299_v39  ;;  %v489_v43 = vld [vmem:[#allocation6 + $0xbe0] sm:$0xff]  ;;  %v491_v39 = vld [vmem:[#allocation6 + $0xbf0] sm:$0xff] }
 0x3c1   :  { %2592 = vmatprep.subr.bf16.mxu0 %v1306_v40  ;;  %2920 = vmatprep.subr.bf16.mxu1 %v1308_v41  ;;  %v1377_v40 = vunpack.c.l.s8.bf16 %v489_v43  ;;  %v1379_v41 = vunpack.c.l.s8.bf16 %v491_v39 }
 0x3c4   :  { %2593 = vmatpush1.bf16.msra.mxu0 %v1305_v29  ;;  %2921 = vmatpush1.bf16.msra.mxu1 %v1307_v47  ;;  %v498_v29 = vld [vmem:[#allocation6 + $0xc28] sm:$0xff]  ;;  %v500_v47 = vld [vmem:[#allocation6 + $0xc38] sm:$0xff] }
 0x3c5   :  { %2594 = vmatprep.subr.bf16.mxu0 %v1314_v50  ;;  %2922 = vmatprep.subr.bf16.mxu1 %v1316_v48  ;;  %v1385_v50 = vunpack.c.h.s8.bf16 %v489_v43  ;;  %v1387_v48 = vunpack.c.h.s8.bf16 %v491_v39  ;;  %v1394_v33 = vunpack.c.l.s8.bf16 %v498_v29  ;;  %v1396_v49 = vunpack.c.l.s8.bf16 %v500_v47  ;;  %v529_v43 = vld [vmem:[#allocation6 + $0xd20] sm:$0xff]  ;;  %v531_v39 = vld [vmem:[#allocation6 + $0xd30] sm:$0xff] }
 0x3c6   :  { %v1402_v51 = vunpack.c.h.s8.bf16 %v498_v29  ;;  %v1404_v61 = vunpack.c.h.s8.bf16 %v500_v47  ;;  %v538_v29 = vld [vmem:[#allocation6 + $0xd68] sm:$0xff]  ;;  %v540_v47 = vld [vmem:[#allocation6 + $0xd78] sm:$0xff] }
 0x3c8   :  { %2595 = vmatpush1.bf16.msra.mxu0 %v1313_v30  ;;  %2923 = vmatpush1.bf16.msra.mxu1 %v1315_v15  ;;  %v497_v30 = vld [vmem:[#allocation6 + $0xc20] sm:$0xff]  ;;  %v499_v15 = vld [vmem:[#allocation6 + $0xc30] sm:$0xff] }
 0x3c9   :  { %2596 = vmatprep.subr.bf16.mxu0 %v1322_v34  ;;  %2924 = vmatprep.subr.bf16.mxu1 %v1324_v35  ;;  %v1393_v34 = vunpack.c.l.s8.bf16 %v497_v30  ;;  %v1395_v35 = vunpack.c.l.s8.bf16 %v499_v15 }
 0x3cc   :  { %2597 = vmatpush1.bf16.msra.mxu0 %v1321_v53  ;;  %2925 = vmatpush1.bf16.msra.mxu1 %v1323_v54  ;;  %v506_v53 = vld [vmem:[#allocation6 + $0xc68] sm:$0xff]  ;;  %v508_v54 = vld [vmem:[#allocation6 + $0xc78] sm:$0xff] }
 0x3cd   :  { %2598 = vmatprep.subr.bf16.mxu0 %v1330_v55  ;;  %2926 = vmatprep.subr.bf16.mxu1 %v1332_v56  ;;  %v1401_v55 = vunpack.c.h.s8.bf16 %v497_v30  ;;  %v1403_v56 = vunpack.c.h.s8.bf16 %v499_v15  ;;  %v1410_v57 = vunpack.c.l.s8.bf16 %v506_v53  ;;  %v1412_v58 = vunpack.c.l.s8.bf16 %v508_v54  ;;  %v537_v30 = vld [vmem:[#allocation6 + $0xd60] sm:$0xff]  ;;  %v539_v15 = vld [vmem:[#allocation6 + $0xd70] sm:$0xff] }
 0x3ce   :  { %v1420_v1 = vunpack.c.h.s8.bf16 %v508_v54  ;;  %v548_v54 = vld [vmem:[#allocation6 + $0xdb8] sm:$0xff] }
 0x3d0   :  { %2599 = vmatpush1.bf16.msra.mxu0 %v1329_v59  ;;  %2927 = vmatpush1.bf16.msra.mxu1 %v1331_v62  ;;  %v505_v59 = vld [vmem:[#allocation6 + $0xc60] sm:$0xff]  ;;  %v507_v62 = vld [vmem:[#allocation6 + $0xc70] sm:$0xff] }
 0x3d1   :  { %2600 = vmatprep.subr.bf16.mxu0 %v1338_v63  ;;  %2928 = vmatprep.subr.bf16.mxu1 %v1340_v0  ;;  %v1409_v63 = vunpack.c.l.s8.bf16 %v505_v59  ;;  %v1411_v0 = vunpack.c.l.s8.bf16 %v507_v62 }
 0x3d4   :  { %2601 = vmatpush1.bf16.msra.mxu0 %v1337_v3  ;;  %2929 = vmatpush1.bf16.msra.mxu1 %v1339_v17  ;;  %v516_v3 = vld [vmem:[#allocation6 + $0xcb8] sm:$0xff]  ;;  %v1417_v17 = vunpack.c.h.s8.bf16 %v505_v59  ;;  %v545_v59 = vld [vmem:[#allocation6 + $0xda0] sm:$0xff] }
 0x3d5   :  { %2602 = vmatprep.subr.bf16.mxu0 %v1346_v7  ;;  %2930 = vmatprep.subr.bf16.mxu1 %v1348_v8  ;;  %v1419_v7 = vunpack.c.h.s8.bf16 %v507_v62  ;;  %v1426_v8 = vunpack.c.l.s8.bf16 %v514_v2  ;;  %v1428_v44 = vunpack.c.l.s8.bf16 %v516_v3  ;;  %v547_v62 = vld [vmem:[#allocation6 + $0xdb0] sm:$0xff] }
 0x3d8   :  { %2603 = vmatpush1.bf16.msra.mxu0 %v1345_v10  ;;  %2931 = vmatpush1.bf16.msra.mxu1 %v1347_v12  ;;  %v1425_v10 = vunpack.c.l.s8.bf16 %v513_v9 }
 0x3d9   :  { %2604 = vmatprep.subr.bf16.mxu0 %v1354_v13  ;;  %2932 = vmatprep.subr.bf16.mxu1 %v1356_v22  ;;  %v1434_v13 = vunpack.c.h.s8.bf16 %v514_v2  ;;  %v1436_v22 = vunpack.c.h.s8.bf16 %v516_v3  ;;  %v554_v2 = vld [vmem:[#allocation6 + $0xde8] sm:$0xff]  ;;  %v556_v3 = vld [vmem:[#allocation6 + $0xdf8] sm:$0xff] }
 0x3dc   :  { %2605 = vmatpush1.bf16.msra.mxu0 %v1353_v21  ;;  %2933 = vmatpush1.bf16.msra.mxu1 %v1355_v32  ;;  %v1433_v21 = vunpack.c.h.s8.bf16 %v513_v9  ;;  %v553_v9 = vld [vmem:[#allocation6 + $0xde0] sm:$0xff] }
 0x3dd   :  { %2606 = vmatprep.subr.bf16.mxu0 %v1362_v52  ;;  %2934 = vmatprep.subr.bf16.mxu1 %v1364_v42  ;;  %v1442_v52 = vunpack.c.l.s8.bf16 %v522_v23  ;;  %v1444_v42 = vunpack.c.l.s8.bf16 %v524_v25 }
 0x3e0   :  { %2607 = vmatpush1.bf16.msra.mxu0 %v1361_v28  ;;  %2935 = vmatpush1.bf16.msra.mxu1 %v1363_v6  ;;  %v1441_v28 = vunpack.c.l.s8.bf16 %v521_v36  ;;  %v1443_v6 = vunpack.c.l.s8.bf16 %v523_v5 }
 0x3e1   :  { %2608 = vmatprep.subr.bf16.mxu0 %v1370_v24  ;;  %2936 = vmatprep.subr.bf16.mxu1 %v1372_v4  ;;  %v1450_v24 = vunpack.c.h.s8.bf16 %v522_v23  ;;  %v1452_v4 = vunpack.c.h.s8.bf16 %v524_v25  ;;  %v562_v23 = vld [vmem:[#allocation6 + $0xe28] sm:$0xff]  ;;  %v564_v25 = vld [vmem:[#allocation6 + $0xe38] sm:$0xff] }
 0x3e4   :  { %2609 = vmatpush1.bf16.msra.mxu0 %v1369_v11  ;;  %2937 = vmatpush1.bf16.msra.mxu1 %v1371_v16  ;;  %v1449_v11 = vunpack.c.h.s8.bf16 %v521_v36  ;;  %v1451_v16 = vunpack.c.h.s8.bf16 %v523_v5  ;;  %v561_v36 = vld [vmem:[#allocation6 + $0xe20] sm:$0xff]  ;;  %v563_v5 = vld [vmem:[#allocation6 + $0xe30] sm:$0xff] }
 0x3e5   :  { %2610 = vmatprep.subr.bf16.mxu0 %v1378_v45  ;;  %2938 = vmatprep.subr.bf16.mxu1 %v1380_v38  ;;  %v1458_v45 = vunpack.c.l.s8.bf16 %v530_v60  ;;  %v1460_v38 = vunpack.c.l.s8.bf16 %v532_v37 }
 0x3e8   :  { %2611 = vmatpush1.bf16.msra.mxu0 %v1377_v40  ;;  %2939 = vmatpush1.bf16.msra.mxu1 %v1379_v41  ;;  %v1457_v40 = vunpack.c.l.s8.bf16 %v529_v43  ;;  %v1459_v41 = vunpack.c.l.s8.bf16 %v531_v39 }
 0x3e9   :  { %2612 = vmatprep.subr.bf16.mxu0 %v1386_v27  ;;  %2940 = vmatprep.subr.bf16.mxu1 %v1388_v46  ;;  %v1466_v27 = vunpack.c.h.s8.bf16 %v530_v60  ;;  %v1468_v46 = vunpack.c.h.s8.bf16 %v532_v37  ;;  %v570_v60 = vld [vmem:[#allocation6 + $0xe68] sm:$0xff]  ;;  %v572_v37 = vld [vmem:[#allocation6 + $0xe78] sm:$0xff] }
 0x3ec   :  { %2613 = vmatpush1.bf16.msra.mxu0 %v1385_v50  ;;  %2941 = vmatpush1.bf16.msra.mxu1 %v1387_v48  ;;  %v1465_v50 = vunpack.c.h.s8.bf16 %v529_v43  ;;  %v1467_v48 = vunpack.c.h.s8.bf16 %v531_v39  ;;  %v569_v43 = vld [vmem:[#allocation6 + $0xe60] sm:$0xff]  ;;  %v571_v39 = vld [vmem:[#allocation6 + $0xe70] sm:$0xff] }
 0x3ed   :  { %2623 = vmatprep.subr.bf16.mxu0 %v1394_v33  ;;  %2951 = vmatprep.subr.bf16.mxu1 %v1396_v49  ;;  %v1474_v33 = vunpack.c.l.s8.bf16 %v538_v29  ;;  %v1476_v49 = vunpack.c.l.s8.bf16 %v540_v47 }
 0x3ef   :  { %2615 = vmatmul.mubr.bf16.vlgmr.msra.gmra.mrb[4].mxu0 %v4018_v20  ;;  %2943 = vmatmul.mubr.bf16.vlgmr.msra.gmra.mrb[4].mxu1 %v4018_v20  ;;  %v1418_v20 = vunpack.c.h.s8.bf16 %v506_v53  ;;  %v546_v53 = vld [vmem:[#allocation6 + $0xda8] sm:$0xff] }
 0x3f0   :  { %2624 = vmatpush1.bf16.msra.mxu0 %v1393_v34  ;;  %2952 = vmatpush1.bf16.msra.mxu1 %v1395_v35  ;;  %v1473_v34 = vunpack.c.l.s8.bf16 %v537_v30  ;;  %v1475_v35 = vunpack.c.l.s8.bf16 %v539_v15 }
 0x3f1   :  { %2625 = vmatprep.subr.bf16.mxu0 %v1402_v51  ;;  %2953 = vmatprep.subr.bf16.mxu1 %v1404_v61  ;;  %v1482_v51 = vunpack.c.h.s8.bf16 %v538_v29  ;;  %v1484_v61 = vunpack.c.h.s8.bf16 %v540_v47  ;;  %v580_v29 = vld [vmem:[#allocation6 + $0xeb8] sm:$0xff]  ;;  %v1545_v47 = vunpack.c.h.s8.bf16 %v569_v43 }
 0x3f2   :  { %2655 = vmatprep.mubr.bf16.mxu0 %v4024_v31  ;;  %2983 = vmatprep.mubr.bf16.mxu1 %v4024_v31  ;;  %v515_v31 = vld [vmem:[#allocation6 + $0xcb0] sm:$0xff] }
 0x3f3   :  { %v1427_v12 = vunpack.c.l.s8.bf16 %v515_v31  ;;  %v1435_v32 = vunpack.c.h.s8.bf16 %v515_v31  ;;  %v555_v31 = vld [vmem:[#allocation6 + $0xdf0] sm:$0xff] }
 0x3f4   :  { %2626 = vmatpush1.bf16.msra.mxu0 %v1401_v55  ;;  %2954 = vmatpush1.bf16.msra.mxu1 %v1403_v56  ;;  %v1481_v55 = vunpack.c.h.s8.bf16 %v537_v30  ;;  %v1483_v56 = vunpack.c.h.s8.bf16 %v539_v15 }
 0x3f5   :  { %2627 = vmatprep.subr.bf16.mxu0 %v1410_v57  ;;  %2955 = vmatprep.subr.bf16.mxu1 %v1412_v58  ;;  %v1490_v57 = vunpack.c.l.s8.bf16 %v546_v53  ;;  %v1492_v58 = vunpack.c.l.s8.bf16 %v548_v54 }
 0x3f8   :  { %2628 = vmatpush1.bf16.msra.mxu0 %v1409_v63  ;;  %2956 = vmatpush1.bf16.msra.mxu1 %v1411_v0  ;;  %v1489_v63 = vunpack.c.l.s8.bf16 %v545_v59  ;;  %v1491_v0 = vunpack.c.l.s8.bf16 %v547_v62 }
 0x3f9   :  { %2629 = vmatprep.subr.bf16.mxu0 %v1418_v20  ;;  %2957 = vmatprep.subr.bf16.mxu1 %v1420_v1  ;;  %v1498_v20 = vunpack.c.h.s8.bf16 %v546_v53  ;;  %v1500_v1 = vunpack.c.h.s8.bf16 %v548_v54 }
 0x3fc   :  { %2630 = vmatpush1.bf16.msra.mxu0 %v1417_v17  ;;  %2958 = vmatpush1.bf16.msra.mxu1 %v1419_v7  ;;  %v1497_v17 = vunpack.c.h.s8.bf16 %v545_v59  ;;  %v1499_v7 = vunpack.c.h.s8.bf16 %v547_v62 }
 0x3fd   :  { %2631 = vmatprep.subr.bf16.mxu0 %v1426_v8  ;;  %2959 = vmatprep.subr.bf16.mxu1 %v1428_v44  ;;  %v1506_v8 = vunpack.c.l.s8.bf16 %v554_v2  ;;  %v1508_v44 = vunpack.c.l.s8.bf16 %v556_v3 }
 0x400   :  { %2632 = vmatpush1.bf16.msra.mxu0 %v1425_v10  ;;  %2960 = vmatpush1.bf16.msra.mxu1 %v1427_v12  ;;  %v1505_v10 = vunpack.c.l.s8.bf16 %v553_v9  ;;  %v1507_v12 = vunpack.c.l.s8.bf16 %v555_v31 }
 0x401   :  { %2633 = vmatprep.subr.bf16.mxu0 %v1434_v13  ;;  %2961 = vmatprep.subr.bf16.mxu1 %v1436_v22  ;;  %v1514_v13 = vunpack.c.h.s8.bf16 %v554_v2  ;;  %v1516_v22 = vunpack.c.h.s8.bf16 %v556_v3 }
 0x404   :  { %2634 = vmatpush1.bf16.msra.mxu0 %v1433_v21  ;;  %2962 = vmatpush1.bf16.msra.mxu1 %v1435_v32  ;;  %v1513_v21 = vunpack.c.h.s8.bf16 %v553_v9  ;;  %v1515_v32 = vunpack.c.h.s8.bf16 %v555_v31 }
 0x405   :  { %2635 = vmatprep.subr.bf16.mxu0 %v1442_v52  ;;  %2963 = vmatprep.subr.bf16.mxu1 %v1444_v42  ;;  %v1522_v52 = vunpack.c.l.s8.bf16 %v562_v23  ;;  %v1524_v42 = vunpack.c.l.s8.bf16 %v564_v25 }
 0x408   :  { %2636 = vmatpush1.bf16.msra.mxu0 %v1441_v28  ;;  %2964 = vmatpush1.bf16.msra.mxu1 %v1443_v6  ;;  %v1521_v28 = vunpack.c.l.s8.bf16 %v561_v36  ;;  %v1523_v6 = vunpack.c.l.s8.bf16 %v563_v5 }
 0x409   :  { %2637 = vmatprep.subr.bf16.mxu0 %v1450_v24  ;;  %2965 = vmatprep.subr.bf16.mxu1 %v1452_v4  ;;  %v1530_v24 = vunpack.c.h.s8.bf16 %v562_v23  ;;  %v1532_v4 = vunpack.c.h.s8.bf16 %v564_v25 }
 0x40c   :  { %2638 = vmatpush1.bf16.msra.mxu0 %v1449_v11  ;;  %2966 = vmatpush1.bf16.msra.mxu1 %v1451_v16  ;;  %v1529_v11 = vunpack.c.h.s8.bf16 %v561_v36  ;;  %v1531_v16 = vunpack.c.h.s8.bf16 %v563_v5 }
 0x40d   :  { %2639 = vmatprep.subr.bf16.mxu0 %v1458_v45  ;;  %2967 = vmatprep.subr.bf16.mxu1 %v1460_v38  ;;  %v1538_v45 = vunpack.c.l.s8.bf16 %v570_v60  ;;  %v1540_v38 = vunpack.c.l.s8.bf16 %v572_v37 }
 0x410   :  { %2640 = vmatpush1.bf16.msra.mxu0 %v1457_v40  ;;  %2968 = vmatpush1.bf16.msra.mxu1 %v1459_v41  ;;  %v1537_v40 = vunpack.c.l.s8.bf16 %v569_v43  ;;  %v1539_v41 = vunpack.c.l.s8.bf16 %v571_v39 }
 0x411   :  { %2641 = vmatprep.subr.bf16.mxu0 %v1466_v27  ;;  %2969 = vmatprep.subr.bf16.mxu1 %v1468_v46  ;;  %v1548_v27 = vunpack.c.h.s8.bf16 %v572_v37  ;;  %v578_v46 = vld [vmem:[#allocation6 + $0xea8] sm:$0xff] }
 0x414   :  { %2642 = vmatpush1.bf16.msra.mxu0 %v1465_v50  ;;  %2970 = vmatpush1.bf16.msra.mxu1 %v1467_v48  ;;  %v1547_v50 = vunpack.c.h.s8.bf16 %v571_v39  ;;  %v1554_v48 = vunpack.c.l.s8.bf16 %v578_v46 }
 0x415   :  { %2643 = vmatprep.subr.bf16.mxu0 %v1474_v33  ;;  %2971 = vmatprep.subr.bf16.mxu1 %v1476_v49  ;;  %v1556_v33 = vunpack.c.l.s8.bf16 %v580_v29  ;;  %v577_v49 = vld [vmem:[#allocation6 + $0xea0] sm:$0xff] }
 0x416   :  { %v1553_v30 = vunpack.c.l.s8.bf16 %v577_v49  ;;  %v1561_v53 = vunpack.c.h.s8.bf16 %v577_v49 }
 0x418   :  { %2644 = vmatpush1.bf16.msra.mxu0 %v1473_v34  ;;  %2972 = vmatpush1.bf16.msra.mxu1 %v1475_v35  ;;  %v1562_v34 = vunpack.c.h.s8.bf16 %v578_v46  ;;  %v1564_v35 = vunpack.c.h.s8.bf16 %v580_v29 }
 0x419   :  { %2645 = vmatprep.subr.bf16.mxu0 %v1482_v51  ;;  %2973 = vmatprep.subr.bf16.mxu1 %v1484_v61  ;;  %v586_v51 = vld [vmem:[#allocation6 + $0xee8] sm:$0xff]  ;;  %v588_v61 = vld [vmem:[#allocation6 + $0xef8] sm:$0xff] }
 0x41c   :  { %2646 = vmatpush1.bf16.msra.mxu0 %v1481_v55  ;;  %2974 = vmatpush1.bf16.msra.mxu1 %v1483_v56  ;;  %v1570_v55 = vunpack.c.l.s8.bf16 %v586_v51  ;;  %v1572_v56 = vunpack.c.l.s8.bf16 %v588_v61 }
 0x41d   :  { %2647 = vmatprep.subr.bf16.mxu0 %v1490_v57  ;;  %2975 = vmatprep.subr.bf16.mxu1 %v1492_v58  ;;  %v585_v57 = vld [vmem:[#allocation6 + $0xee0] sm:$0xff]  ;;  %v587_v58 = vld [vmem:[#allocation6 + $0xef0] sm:$0xff] }
 0x41e   :  { %v1569_v59 = vunpack.c.l.s8.bf16 %v585_v57  ;;  %v1571_v62 = vunpack.c.l.s8.bf16 %v587_v58  ;;  %v1577_v2 = vunpack.c.h.s8.bf16 %v585_v57  ;;  %v1579_v3 = vunpack.c.h.s8.bf16 %v587_v58 }
 0x420   :  { %2648 = vmatpush1.bf16.msra.mxu0 %v1489_v63  ;;  %2976 = vmatpush1.bf16.msra.mxu1 %v1491_v0  ;;  %v1578_v63 = vunpack.c.h.s8.bf16 %v586_v51  ;;  %v1580_v0 = vunpack.c.h.s8.bf16 %v588_v61  ;;  %v4153_v51 = vsub.s32 4, %v4064_v19  ;;  %v4156_v61 = vsub.s32 6, %v4064_v19 }
 0x421   :  { %2649 = vmatprep.subr.bf16.mxu0 %v1498_v20  ;;  %2977 = vmatprep.subr.bf16.mxu1 %v1500_v1  ;;  %v594_v20 = vld [vmem:[#allocation6 + $0xf28] sm:$0xff]  ;;  %v596_v1 = vld [vmem:[#allocation6 + $0xf38] sm:$0xff] }
 0x424   :  { %2650 = vmatpush1.bf16.msra.mxu0 %v1497_v17  ;;  %2978 = vmatpush1.bf16.msra.mxu1 %v1499_v7  ;;  %v1586_v17 = vunpack.c.l.s8.bf16 %v594_v20  ;;  %v1588_v7 = vunpack.c.l.s8.bf16 %v596_v1 }
 0x425   :  { %2651 = vmatprep.subr.bf16.mxu0 %v1506_v8  ;;  %2979 = vmatprep.subr.bf16.mxu1 %v1508_v44  ;;  %v593_v8 = vld [vmem:[#allocation6 + $0xf20] sm:$0xff]  ;;  %v595_v44 = vld [vmem:[#allocation6 + $0xf30] sm:$0xff] }
 0x426   :  { %v1585_v9 = vunpack.c.l.s8.bf16 %v593_v8  ;;  %v1587_v31 = vunpack.c.l.s8.bf16 %v595_v44  ;;  %v1593_v23 = vunpack.c.h.s8.bf16 %v593_v8  ;;  %v1595_v25 = vunpack.c.h.s8.bf16 %v595_v44 }
 0x428   :  { %2652 = vmatpush1.bf16.msra.mxu0 %v1505_v10  ;;  %2980 = vmatpush1.bf16.msra.mxu1 %v1507_v12  ;;  %v1594_v10 = vunpack.c.h.s8.bf16 %v594_v20  ;;  %v1596_v12 = vunpack.c.h.s8.bf16 %v596_v1 }
 0x429   :  { %2653 = vmatprep.subr.bf16.mxu0 %v1514_v13  ;;  %2981 = vmatprep.subr.bf16.mxu1 %v1516_v22  ;;  %v602_v13 = vld [vmem:[#allocation6 + $0xf68] sm:$0xff]  ;;  %v604_v22 = vld [vmem:[#allocation6 + $0xf78] sm:$0xff] }
 0x42c   :  { %2654 = vmatpush1.bf16.msra.mxu0 %v1513_v21  ;;  %2982 = vmatpush1.bf16.msra.mxu1 %v1515_v32  ;;  %v1602_v21 = vunpack.c.l.s8.bf16 %v602_v13  ;;  %v1604_v32 = vunpack.c.l.s8.bf16 %v604_v22 }
 0x42d   :  { %2664 = vmatprep.subr.bf16.mxu0 %v1522_v52  ;;  %2992 = vmatprep.subr.bf16.mxu1 %v1524_v42  ;;  %v601_v52 = vld [vmem:[#allocation6 + $0xf60] sm:$0xff]  ;;  %v603_v42 = vld [vmem:[#allocation6 + $0xf70] sm:$0xff] }
 0x42e   :  { %v1601_v36 = vunpack.c.l.s8.bf16 %v601_v52  ;;  %v1603_v5 = vunpack.c.l.s8.bf16 %v603_v42  ;;  %v1611_v37 = vunpack.c.h.s8.bf16 %v603_v42 }
 0x42f   :  { %2656 = vmatmul.mubr.bf16.vlgmr.msra.gmra.mrb[4].mxu0 %v4032_v14  ;;  %2984 = vmatmul.mubr.bf16.vlgmr.msra.gmra.mrb[4].mxu1 %v4032_v14  ;;  %v1546_v14 = vunpack.c.h.s8.bf16 %v570_v60  ;;  %v1609_v60 = vunpack.c.h.s8.bf16 %v601_v52 }
 0x430   :  { %2665 = vmatpush1.bf16.msra.mxu0 %v1521_v28  ;;  %2993 = vmatpush1.bf16.msra.mxu1 %v1523_v6  ;;  %v1610_v28 = vunpack.c.h.s8.bf16 %v602_v13  ;;  %v1612_v6 = vunpack.c.h.s8.bf16 %v604_v22 }
 0x431   :  { %2666 = vmatprep.subr.bf16.mxu0 %v1530_v24  ;;  %2994 = vmatprep.subr.bf16.mxu1 %v1532_v4  ;;  %v610_v24 = vld [vmem:[#allocation6 + $0xfa8] sm:$0xff]  ;;  %v612_v4 = vld [vmem:[#allocation6 + $0xfb8] sm:$0xff] }
 0x432   :  { %2696 = vmatprep.mubr.bf16.mxu0 %v4038_v26  ;;  %3024 = vmatprep.mubr.bf16.mxu1 %v4038_v26  ;;  %v579_v26 = vld [vmem:[#allocation6 + $0xeb0] sm:$0xff] }
 0x433   :  { %v1555_v15 = vunpack.c.l.s8.bf16 %v579_v26  ;;  %v1563_v54 = vunpack.c.h.s8.bf16 %v579_v26 }
 0x434   :  { %2667 = vmatpush1.bf16.msra.mxu0 %v1529_v11  ;;  %2995 = vmatpush1.bf16.msra.mxu1 %v1531_v16  ;;  %v1618_v11 = vunpack.c.l.s8.bf16 %v610_v24  ;;  %v1620_v16 = vunpack.c.l.s8.bf16 %v612_v4 }
 0x435   :  { %2668 = vmatprep.subr.bf16.mxu0 %v1538_v45  ;;  %2996 = vmatprep.subr.bf16.mxu1 %v1540_v38  ;;  %v609_v45 = vld [vmem:[#allocation6 + $0xfa0] sm:$0xff]  ;;  %v611_v38 = vld [vmem:[#allocation6 + $0xfb0] sm:$0xff] }
 0x436   :  { %v1617_v43 = vunpack.c.l.s8.bf16 %v609_v45  ;;  %v1619_v39 = vunpack.c.l.s8.bf16 %v611_v38  ;;  %v1625_v46 = vunpack.c.h.s8.bf16 %v609_v45  ;;  %v1627_v29 = vunpack.c.h.s8.bf16 %v611_v38 }
 0x438   :  { %2669 = vmatpush1.bf16.msra.mxu0 %v1537_v40  ;;  %2997 = vmatpush1.bf16.msra.mxu1 %v1539_v41  ;;  %v1626_v40 = vunpack.c.h.s8.bf16 %v610_v24  ;;  %v1628_v41 = vunpack.c.h.s8.bf16 %v612_v4 }
 0x439   :  { %2670 = vmatprep.subr.bf16.mxu0 %v1546_v14  ;;  %2998 = vmatprep.subr.bf16.mxu1 %v1548_v27  ;;  %v618_v14 = vld [vmem:[#allocation6 + $0xfe8] sm:$0xff]  ;;  %v620_v27 = vld [vmem:[#allocation6 + $0xff8] sm:$0xff] }
 0x43c   :  { %2671 = vmatpush1.bf16.msra.mxu0 %v1545_v47  ;;  %2999 = vmatpush1.bf16.msra.mxu1 %v1547_v50  ;;  %v1634_v47 = vunpack.c.l.s8.bf16 %v618_v14  ;;  %v1636_v50 = vunpack.c.l.s8.bf16 %v620_v27 }
 0x43d   :  { %2672 = vmatprep.subr.bf16.mxu0 %v1554_v48  ;;  %3000 = vmatprep.subr.bf16.mxu1 %v1556_v33  ;;  %v617_v48 = vld [vmem:[#allocation6 + $0xfe0] sm:$0xff]  ;;  %v619_v33 = vld [vmem:[#allocation6 + $0xff0] sm:$0xff] }
 0x43e   :  { %v1633_v49 = vunpack.c.l.s8.bf16 %v617_v48  ;;  %v1635_v26 = vunpack.c.l.s8.bf16 %v619_v33 }
 0x440   :  { %2673 = vmatpush1.bf16.msra.mxu0 %v1553_v30  ;;  %3001 = vmatpush1.bf16.msra.mxu1 %v1555_v15  ;;  %v1642_v30 = vunpack.c.h.s8.bf16 %v618_v14  ;;  %v1644_v15 = vunpack.c.h.s8.bf16 %v620_v27 }
 0x441   :  { %2674 = vmatprep.subr.bf16.mxu0 %v1562_v34  ;;  %3002 = vmatprep.subr.bf16.mxu1 %v1564_v35  ;;  %v1641_v34 = vunpack.c.h.s8.bf16 %v617_v48  ;;  %v1643_v35 = vunpack.c.h.s8.bf16 %v619_v33 }
 0x444   :  { %2675 = vmatpush1.bf16.msra.mxu0 %v1561_v53  ;;  %3003 = vmatpush1.bf16.msra.mxu1 %v1563_v54  ;;  %v4159_v53 = vsub.s32 5, %v4064_v19  ;;  %v4162_v54 = vsub.s32 7, %v4064_v19 }
 0x445   :  { %2676 = vmatprep.subr.bf16.mxu0 %v1570_v55  ;;  %3004 = vmatprep.subr.bf16.mxu1 %v1572_v56  ;;  %v3654_v55 = vld [vmem:[#allocation8] sm:$0xff] }
 0x446   :  { %v3081_v56 = vrot.slane %v3654_v55, %v4153_v51  ;;  %v3089_v57 = vrot.slane %v3654_v55, %v4156_v61  ;;  %v3085_v58 = vrot.slane %v3654_v55, %v4159_v53 }
 0x448   :  { %2677 = vmatpush1.bf16.msra.mxu0 %v1569_v59  ;;  %3005 = vmatpush1.bf16.msra.mxu1 %v1571_v62  ;;  %v3655_v59 = vld [vmem:[#allocation9] sm:$0xff] }
 0x449   :  { %2678 = vmatprep.subr.bf16.mxu0 %v1578_v63  ;;  %3006 = vmatprep.subr.bf16.mxu1 %v1580_v0  ;;  %v3131_v62 = vrot.slane %v3655_v59, %v4153_v51  ;;  %v3139_v63 = vrot.slane %v3655_v59, %v4156_v61  ;;  %v3135_v1 = vrot.slane %v3655_v59, %v4159_v53 }
 0x44a   :  { %v3143_v19 = vrot.slane %v3655_v59, %v4162_v54 }
 0x44c   :  { %2679 = vmatpush1.bf16.msra.mxu0 %v1577_v2  ;;  %3007 = vmatpush1.bf16.msra.mxu1 %v1579_v3 }
 0x44d   :  { %2680 = vmatprep.subr.bf16.mxu0 %v1586_v17  ;;  %3008 = vmatprep.subr.bf16.mxu1 %v1588_v7 }
 0x450   :  { %2681 = vmatpush1.bf16.msra.mxu0 %v1585_v9  ;;  %3009 = vmatpush1.bf16.msra.mxu1 %v1587_v31 }
 0x451   :  { %2682 = vmatprep.subr.bf16.mxu0 %v1594_v10  ;;  %3010 = vmatprep.subr.bf16.mxu1 %v1596_v12 }
 0x454   :  { %2683 = vmatpush1.bf16.msra.mxu0 %v1593_v23  ;;  %3011 = vmatpush1.bf16.msra.mxu1 %v1595_v25 }
 0x455   :  { %2684 = vmatprep.subr.bf16.mxu0 %v1602_v21  ;;  %3012 = vmatprep.subr.bf16.mxu1 %v1604_v32 }
 0x458   :  { %2685 = vmatpush1.bf16.msra.mxu0 %v1601_v36  ;;  %3013 = vmatpush1.bf16.msra.mxu1 %v1603_v5 }
 0x459   :  { %2686 = vmatprep.subr.bf16.mxu0 %v1610_v28  ;;  %3014 = vmatprep.subr.bf16.mxu1 %v1612_v6 }
 0x45c   :  { %2687 = vmatpush1.bf16.msra.mxu0 %v1609_v60  ;;  %3015 = vmatpush1.bf16.msra.mxu1 %v1611_v37 }
 0x45d   :  { %2688 = vmatprep.subr.bf16.mxu0 %v1618_v11  ;;  %3016 = vmatprep.subr.bf16.mxu1 %v1620_v16 }
 0x460   :  { %2689 = vmatpush1.bf16.msra.mxu0 %v1617_v43  ;;  %3017 = vmatpush1.bf16.msra.mxu1 %v1619_v39 }
 0x461   :  { %2690 = vmatprep.subr.bf16.mxu0 %v1626_v40  ;;  %3018 = vmatprep.subr.bf16.mxu1 %v1628_v41 }
 0x464   :  { %2691 = vmatpush1.bf16.msra.mxu0 %v1625_v46  ;;  %3019 = vmatpush1.bf16.msra.mxu1 %v1627_v29 }
 0x465   :  { %2692 = vmatprep.subr.bf16.mxu0 %v1634_v47  ;;  %3020 = vmatprep.subr.bf16.mxu1 %v1636_v50 }
 0x468   :  { %2693 = vmatpush1.bf16.msra.mxu0 %v1633_v49  ;;  %3021 = vmatpush1.bf16.msra.mxu1 %v1635_v26 }
 0x469   :  { %2694 = vmatprep.subr.bf16.mxu0 %v1642_v30  ;;  %3022 = vmatprep.subr.bf16.mxu1 %v1644_v15 }
 0x46c   :  { %2695 = vmatpush1.bf16.msra.mxu0 %v1641_v34  ;;  %3023 = vmatpush1.bf16.msra.mxu1 %v1643_v35 }
 0x46f   :  { %2697 = vmatmul.mubr.bf16.vlgmr.msra.gmra.mrb[4].mxu0 %v4046_v18  ;;  %3025 = vmatmul.mubr.bf16.vlgmr.msra.gmra.mrb[4].mxu1 %v4046_v18  ;;  %v3093_v18 = vrot.slane %v3654_v55, %v4162_v54 }
 0x542   :  { %v2698_v0 = vpop.f32.mrb[4].mxu0  ;;  %v3026_v20 = vpop.f32.mrb[4].mxu1 }
 0x543   :  { %v3106_v2 = vmul.f32 %v3081_v56, %v2698_v0  ;;  %v3108_v3 = vmul.f32 %v3089_v57, %v3026_v20  ;;  %v2700_v17 = vpop.f32.mrb[5].mxu0  ;;  %v3028_v7 = vpop.f32.mrb[5].mxu1 }
 0x544   :  { %v3107_v8 = vmul.f32 %v3085_v58, %v2700_v17  ;;  %v3109_v44 = vmul.f32 %v3093_v18, %v3028_v7  ;;  %v2702_v9 = vpop.f32.mrb[6].mxu0  ;;  %v3030_v31 = vpop.f32.mrb[6].mxu1 }
 0x545   :  { %v3156_v10 = vadd.f32 %v3131_v62, %v3106_v2  ;;  %v3158_v12 = vadd.f32 %v3139_v63, %v3108_v3  ;;  %v2703_v13 = vpop.f32.mrb[7].mxu0  ;;  %v3031_v22 = vpop.f32.mrb[7].mxu1 }
 0x546   :  { %v3157_v23 = vadd.f32 %v3135_v1, %v3107_v8  ;;  %v3159_v25 = vadd.f32 %v3143_v19, %v3109_v44 }
 0x547   :  { %v3186_v21 = vrot.slane %v3156_v10, 4  ;;  %v3198_v32 = vrot.slane %v3158_v12, 4 }
 0x548   :  { %v3192_v52 = vrot.slane %v3157_v23, 4  ;;  %v3204_v42 = vrot.slane %v3159_v25, 4 }
 0x549   :  { %v3187_v36 = vadd.f32 %v3186_v21, %v3156_v10  ;;  %v3199_v5 = vadd.f32 %v3198_v32, %v3158_v12 }
 0x54a   :  { %v3193_v28 = vadd.f32 %v3192_v52, %v3157_v23  ;;  %v3205_v6 = vadd.f32 %v3204_v42, %v3159_v25 }
 0x54b   :  { %v3188_v24 = vrot.slane %v3187_v36, 2  ;;  %v3200_v4 = vrot.slane %v3199_v5, 2 }
 0x54c   :  { %v3194_v60 = vrot.slane %v3193_v28, 2  ;;  %v3206_v37 = vrot.slane %v3205_v6, 2 }
 0x54d   :  { %v3189_v11 = vadd.f32 %v3188_v24, %v3187_v36  ;;  %v3201_v16 = vadd.f32 %v3200_v4, %v3199_v5  ;;  %v3656_v24 = vld [vmem:[#allocation11] sm:$0xff] }
 0x54e   :  { %v3195_v45 = vadd.f32 %v3194_v60, %v3193_v28  ;;  %v3207_v38 = vadd.f32 %v3206_v37, %v3205_v6  ;;  %v3335_v4 = vrot.slane %v3656_v24, %v4153_v51  ;;  %v3343_v37 = vrot.slane %v3656_v24, %v4156_v61 }
 0x54f   :  { %v3190_v43 = vrot.slane %v3189_v11, 1  ;;  %v3202_v39 = vrot.slane %v3201_v16, 1 }
 0x550   :  { %v3196_v40 = vrot.slane %v3195_v45, 1  ;;  %v3208_v41 = vrot.slane %v3207_v38, 1 }
 0x551   :  { %v3191_v14 = vadd.f32 %v3190_v43, %v3189_v11  ;;  %v3203_v27 = vadd.f32 %v3202_v39, %v3201_v16 }
 0x552   :  { %v3197_v46 = vadd.f32 %v3196_v40, %v3195_v45  ;;  %v3209_v29 = vadd.f32 %v3208_v41, %v3207_v38  ;;  %v3339_v45 = vrot.slane %v3656_v24, %v4159_v53  ;;  %v3657_v38 = vld [vmem:[#allocation12] sm:$0xff]  ;;  %v3347_v41 = vrot.slane %v3656_v24, %v4162_v54 }
 0x553   :  { %v3215_v47 = vmul.f32 0.125, %v3191_v14  ;;  %v3217_v50 = vmul.f32 0.125, %v3203_v27  ;;  %v3384_v43 = vrot.slane %v3657_v38, %v4153_v51  ;;  %v3392_v14 = vrot.slane %v3657_v38, %v4156_v61 }
 0x554   :  { %v3216_v48 = vmul.f32 0.125, %v3197_v46  ;;  %v3218_v33 = vmul.f32 0.125, %v3209_v29 }
 0x555   :  { %v3223_v49 = vsub.f32 %v3156_v10, %v3215_v47  ;;  %v3225_v26 = vsub.f32 %v3158_v12, %v3217_v50  ;;  %v3388_v47 = vrot.slane %v3657_v38, %v4159_v53 }
 0x556   :  { %v3224_v30 = vsub.f32 %v3157_v23, %v3216_v48  ;;  %v3226_v15 = vsub.f32 %v3159_v25, %v3218_v33  ;;  %v3396_v33 = vrot.slane %v3657_v38, %v4162_v54 }
 0x557   :  { %v3231_v34 = vmul.f32 %v3223_v49, %v3223_v49  ;;  %v3233_v35 = vmul.f32 %v3225_v26, %v3225_v26 }
 0x558   :  { %v3232_v55 = vmul.f32 %v3224_v30, %v3224_v30  ;;  %v3234_v56 = vmul.f32 %v3226_v15, %v3226_v15 }
 0x559   :  { %v3259_v57 = vrot.slane %v3231_v34, 4  ;;  %v3271_v58 = vrot.slane %v3233_v35, 4 }
 0x55a   :  { %v3265_v18 = vrot.slane %v3232_v55, 4  ;;  %v3277_v59 = vrot.slane %v3234_v56, 4 }
 0x55b   :  { %v3260_v62 = vadd.f32 %v3259_v57, %v3231_v34  ;;  %v3272_v63 = vadd.f32 %v3271_v58, %v3233_v35 }
 0x55c   :  { %v3266_v0 = vadd.f32 %v3265_v18, %v3232_v55  ;;  %v3278_v20 = vadd.f32 %v3277_v59, %v3234_v56 }
 0x55d   :  { %v3261_v1 = vrot.slane %v3260_v62, 2  ;;  %v3273_v19 = vrot.slane %v3272_v63, 2 }
 0x55e   :  { %v3267_v2 = vrot.slane %v3266_v0, 2  ;;  %v3279_v3 = vrot.slane %v3278_v20, 2 }
 0x55f   :  { %v3262_v17 = vadd.f32 %v3261_v1, %v3260_v62  ;;  %v3274_v7 = vadd.f32 %v3273_v19, %v3272_v63 }
 0x560   :  { %v3268_v8 = vadd.f32 %v3267_v2, %v3266_v0  ;;  %v3280_v44 = vadd.f32 %v3279_v3, %v3278_v20 }
 0x561   :  { %v3263_v9 = vrot.slane %v3262_v17, 1  ;;  %v3275_v31 = vrot.slane %v3274_v7, 1 }
 0x562   :  { %v3269_v10 = vrot.slane %v3268_v8, 1  ;;  %v3281_v12 = vrot.slane %v3280_v44, 1 }
 0x563   :  { %v3264_v13 = vadd.f32 %v3263_v9, %v3262_v17  ;;  %v3276_v22 = vadd.f32 %v3275_v31, %v3274_v7 }
 0x564   :  { %v3270_v23 = vadd.f32 %v3269_v10, %v3268_v8  ;;  %v3282_v25 = vadd.f32 %v3281_v12, %v3280_v44 }
 0x565   :  { %v3287_v21 = vmul.f32 0.125, %v3264_v13  ;;  %v3289_v32 = vmul.f32 0.125, %v3276_v22 }
 0x566   :  { %v3288_v52 = vmul.f32 0.125, %v3270_v23  ;;  %v3290_v42 = vmul.f32 0.125, %v3282_v25 }
 0x567   :  { %v3295_v36 = vadd.f32 1e-05, %v3287_v21  ;;  %v3297_v5 = vadd.f32 1e-05, %v3289_v32 }
 0x568   :  { %v3296_v28 = vadd.f32 1e-05, %v3288_v52  ;;  %v3298_v6 = vadd.f32 1e-05, %v3290_v42 }
 0x569   :  { %3646 = vrsqrt.f32 %v3295_v36 }
 0x56a   :  { %3648 = vrsqrt.f32 %v3297_v5 }
 0x56b   :  { %3650 = vrsqrt.f32 %v3296_v28 }
 0x56c   :  { %3652 = vrsqrt.f32 %v3298_v6 }
 0x573   :  { %v3647_v60 = vpop.eup %3646 }
 0x574   :  { %v3649_v11 = vpop.eup %3648  ;;  %v3311_v16 = vmul.f32 %v3647_v60, %v3223_v49 }
 0x575   :  { %v3651_v39 = vpop.eup %3650  ;;  %v3313_v40 = vmul.f32 %v3649_v11, %v3225_v26 }
 0x576   :  { %v3653_v27 = vpop.eup %3652  ;;  %v3360_v46 = vmul.f32 %v3335_v4, %v3311_v16  ;;  %v3312_v29 = vmul.f32 %v3651_v39, %v3224_v30 }
 0x577   :  { %v3362_v50 = vmul.f32 %v3343_v37, %v3313_v40  ;;  %v3314_v48 = vmul.f32 %v3653_v27, %v3226_v15 }
 0x578   :  { %v3361_v49 = vmul.f32 %v3339_v45, %v3312_v29  ;;  %v3409_v34 = vadd.f32 %v3384_v43, %v3360_v46 }
 0x579   :  { %v3363_v35 = vmul.f32 %v3347_v41, %v3314_v48  ;;  %v3411_v55 = vadd.f32 %v3392_v14, %v3362_v50 }
 0x57a   :  { %v3410_v51 = vadd.f32 %v3388_v47, %v3361_v49  ;;  %v3417_v56 = vmax.f32 %v3409_v34, 0.0 }
 0x57b   :  { %v3412_v26 = vadd.f32 %v3396_v33, %v3363_v35  ;;  %v3419_v57 = vmax.f32 %v3411_v55, 0.0 }
 0x57c   :  { %v3418_v58 = vmax.f32 %v3410_v51, 0.0 }
 0x57d   :  { %v3420_v61 = vmax.f32 %v3412_v26, 0.0 }
 0x57e   :  { %v3499_v18 = vpack.c.bf16 %v3418_v58, %v3417_v56 }
 0x57f   :  { %v3500_v30 = vpack.c.bf16 %v3420_v61, %v3419_v57 }
 0x580   :  { %3455 = vst [vmem:[#allocation14 + $0x10] sm:$0xff] %v3499_v18 }
 0x581   :  { %3456 = vst [vmem:[#allocation14 + $0x18] sm:$0xff] %v3500_v30 }
 0x582   :  { %3801 = shalt.err (!%p3798_p10)
}
 0x583   :  { %s3802_s0 = scalar_lea.hbm %s4198_s6, 512 }
 0x584   :  { %p3803_p11 = scmp.ne.s32.totalorder %s4198_s6, %s3802_s0  ;;  %p3806_p12 = scmp.lt.u32.totalorder %s3802_s0, %s4198_s6 }
 0x586   :  { %p3808_p13 = pnand %p3806_p12, %p3803_p11 }
 0x588   :  { %3811 = shalt.err (!%p3808_p13)
}
 0x589   :  { %3466 = dma.vmem_to_hbm [thread:$0]  %s3464_s17, 512, %s4198_s6, [#allocation5]  }
 0x58a   :  { %3820 = dma.done.wait [#allocation5], 512  }
 0x58b   :  { %3821 = vsyncadd [#allocation5], 4294966784 }
 0x58c   :  { %3470 = vsyncpa [#allocation4], 1 }
 0x58d   :  { %3471 = vsyncpa [#allocation7], 1 }
 0x58e   :  { %3472 = vsyncpa [#allocation10], 1 }
 0x58f   :  { %3473 = vsyncpa [#allocation13], 1 }
 0x590   :  { %3474 = vsyncpa [#allocation5], 1 }

</bundles_post_ra>
